<compile_context>
chip_gen: v5e
topology: v5e:2x2
jax: 0.10.0
libtpu: 0.0.40
codegen_flags: <defaults>
</compile_context>

<pallas_src>
import functools

import jax
import jax.numpy as jnp
from jax.experimental import pallas as pl
from jax.experimental.pallas import tpu as pltpu

EPS = 1e-5
LANE = 128


def _ceil_to(x, m):
    return ((x + m - 1) // m) * m


def _vmem_limit_bytes():
    # ~60% of physical per-core VMEM (v5e/v6e: 128 MiB -> ~76 MiB,
    # v7x: 64 MiB -> ~38 MiB); conservative fallback if the query fails.
    try:
        cap = int(pltpu.get_tpu_info().vmem_capacity_bytes)
        return min(int(cap * 0.6), 96 * 1024 * 1024)
    except Exception:  # pragma: no cover - depends on runtime availability
        return 32 * 1024 * 1024


VMEM_LIMIT = _vmem_limit_bytes()


# ---------------------------------------------------------------------------
# Pallas kernel 1: phase-decomposed conv (tap-accumulating bf16 matmuls with a
# local f32 accumulator) + per-image BN partial statistics, bf16 output.
# ---------------------------------------------------------------------------
def _conv_kernel(x_ref, w_ref, y_ref, st_ref, *, taps, oh, ow, phw):
    cc_out = w_ref.shape[-1]
    L = oh * phw
    acc = None
    for t, start in enumerate(taps):
        a = x_ref[0, start:start + L, :]                      # [L, Cin] bf16
        c = jnp.dot(a, w_ref[t], preferred_element_type=jnp.float32)
        acc = c if acc is None else acc + c                   # local f32 acc
    out = acc.reshape(oh, phw, cc_out)[:, :ow, :]             # [oh, ow, Cout]
    yb = out.astype(y_ref.dtype)                              # single store
    y_ref[0] = yb
    yf = yb.astype(jnp.float32)
    st_ref[0, 0:1, :] = jnp.sum(yf, axis=(0, 1), keepdims=True)[0]
    st_ref[0, 1:2, :] = jnp.sum(yf * yf, axis=(0, 1), keepdims=True)[0]


def _phase_conv(phases, w_taps, taps, oh, ow, phw):
    """Conv on a flat phase slab. phases: [N, RF, Ccin] bf16 (RF*1 padded),
    w_taps: [T, Ccin, Ccout] bf16, taps: flat row offsets per tap.
    Returns y [N, OH, OW, Ccout] bf16 and stats [N, 2, Ccout] f32."""
    n, rf, cc_in = phases.shape
    t, _, cc_out = w_taps.shape
    kernel = functools.partial(_conv_kernel, taps=tuple(taps),
                               oh=oh, ow=ow, phw=phw)
    y, st = pl.pallas_call(
        kernel,
        out_shape=(jax.ShapeDtypeStruct((n, oh, ow, cc_out), jnp.bfloat16),
                   jax.ShapeDtypeStruct((n, 2, cc_out), jnp.float32)),
        grid=(n,),
        in_specs=[
            pl.BlockSpec((1, rf, cc_in), lambda i: (i, 0, 0)),
            pl.BlockSpec((t, cc_in, cc_out), lambda i: (0, 0, 0)),
        ],
        out_specs=(
            pl.BlockSpec((1, oh, ow, cc_out), lambda i: (i, 0, 0, 0)),
            pl.BlockSpec((1, 2, cc_out), lambda i: (i, 0, 0)),
        ),
        compiler_params=pltpu.CompilerParams(
            dimension_semantics=("parallel",),
            vmem_limit_bytes=VMEM_LIMIT),
    )(phases, w_taps)
    return y, st


# ---------------------------------------------------------------------------
# Pallas kernel 2: BN1-apply + ReLU, writing straight into conv2's padded
# phase layout (bf16) — zero border + interior store.
# ---------------------------------------------------------------------------
def _bn_relu_to_phases_kernel(y_ref, s_ref, b_ref, o_ref, *, oh, ow):
    o_ref[...] = jnp.zeros_like(o_ref)
    h = jnp.maximum(y_ref[0].astype(jnp.float32) * s_ref[...] + b_ref[...], 0.0)
    o_ref[0, 1:1 + oh, 1:1 + ow, :] = h.astype(o_ref.dtype)


# ---------------------------------------------------------------------------
# Pallas kernel 3: fused BN-apply (+ residual) + ReLU, row-tiled elementwise.
# ---------------------------------------------------------------------------
def _bn_add_relu_kernel(y_ref, s_ref, b_ref, r_ref, o_ref):
    o_ref[...] = jnp.maximum(
        y_ref[...].astype(jnp.float32) * s_ref[...] + b_ref[...]
        + r_ref[...].astype(jnp.float32), 0.0).astype(o_ref.dtype)


def _bn_bn_add_relu_kernel(y_ref, s_ref, b_ref, r_ref, s2_ref, b2_ref, o_ref):
    o_ref[...] = jnp.maximum(
        y_ref[...].astype(jnp.float32) * s_ref[...] + b_ref[...]
        + r_ref[...].astype(jnp.float32) * s2_ref[...] + b2_ref[...],
        0.0).astype(o_ref.dtype)


def _apply_call(kernel_fn, out_dtype, args, slab_flags):
    m, cc = args[0].shape
    tm = m if m <= 512 else 512           # fixed row tile, cdiv grid (masked tail)
    grid = pl.cdiv(m, tm)
    in_specs = []
    for is_slab in slab_flags:
        if is_slab:
            in_specs.append(pl.BlockSpec((tm, cc), lambda i: (i, 0)))
        else:
            in_specs.append(pl.BlockSpec((1, cc), lambda i: (0, 0)))
    return pl.pallas_call(
        kernel_fn,
        out_shape=jax.ShapeDtypeStruct((m, cc), out_dtype),
        grid=(grid,),
        in_specs=in_specs,
        out_specs=pl.BlockSpec((tm, cc), lambda i: (i, 0)),
        compiler_params=pltpu.CompilerParams(
            dimension_semantics=("parallel",),
            vmem_limit_bytes=VMEM_LIMIT),
    )(*args)


# ---------------------------------------------------------------------------
# Glue: phase decomposition, tap offsets, BN folding, weight prep, mask
# ---------------------------------------------------------------------------
def _build_phases(x_nhwc, k, s, pad, cc_in):
    """Pad + space-to-depth (stride s) decomposition of a channel-padded NHWC
    input; returns a flat [N, RF, Ccin] bf16 slab (+1 slack row) plus geometry."""
    n, h, w, _ = x_nhwc.shape
    oh = (h + 2 * pad - k) // s + 1
    ow = (w + 2 * pad - k) // s + 1
    phh = oh + (k - 1) // s
    phw = _ceil_to(ow + (k - 1) // s, 8)       # sublane-aligned phase width
    hp, wp = s * phh, s * phw
    assert hp >= h + pad and wp >= w + pad
    xp = jnp.pad(x_nhwc.astype(jnp.bfloat16),
                 ((0, 0), (pad, hp - h - pad), (pad, wp - w - pad), (0, 0)))
    xr = xp.reshape(n, phh, s, phw, s, cc_in)
    xr = jnp.transpose(xr, (0, 2, 4, 1, 3, 5))             # [N,s,s,phh,phw,C]
    phases = xr.reshape(n, s * s * phh, phw, cc_in)
    phases = jnp.pad(phases, ((0, 0), (0, 1), (0, 0), (0, 0)))   # slack row
    return phases.reshape(n, (s * s * phh + 1) * phw, cc_in), oh, ow, phh, phw


def _make_taps(k, s, pad_dec, conv_pad, phh, phw, pa):
    """Flat row offsets for each (kh, kw) tap of a k x k / stride-s / pad
    conv_pad conv, reading a phase slab built with top/left pad pad_dec."""
    off = pad_dec - conv_pad
    taps = []
    for kh in range(k):
        for kw in range(k):
            khd, kwd = kh + off, kw + off
            r0 = ((khd % s) * pa + (kwd % s)) * phh + khd // s
            taps.append(r0 * phw + kwd // s)
    return taps


def _fold_bn(stats, gamma_p, beta_p, m_total):
    # stats: [N, 2, Cc] per-image (sum, sum_sq) -> full-batch scale/bias rows.
    s = jnp.sum(stats, axis=0)
    mean = s[0] / m_total
    var = jnp.maximum(s[1] / m_total - mean * mean, 0.0)   # biased, train-mode
    scale = gamma_p * jax.lax.rsqrt(var + EPS)
    bias = beta_p - mean * scale
    return scale.reshape(1, -1), bias.reshape(1, -1)


def _pad_vec(v, cc):
    # NOTE: must be ZERO padding — padded channels have mean=var=0, so gamma=0
    # gives scale=bias=0 there (padding with ones would amplify rsqrt(eps)).
    return jnp.pad(v.astype(jnp.float32), (0, cc - v.shape[0]))


def _prep_weight(w_oihw, cc_in, cc_out, mask=None):
    cout, cin, kh, kw = w_oihw.shape
    if mask is not None:
        w_oihw = w_oihw * mask[:, :, None, None]
    w = jnp.transpose(w_oihw, (2, 3, 1, 0)).reshape(kh * kw, cin, cout)
    w = jnp.pad(w, ((0, 0), (0, cc_in - cin), (0, cc_out - cout)))
    return w.astype(jnp.bfloat16)


def _connectivity_mask(conn, out_ch, in_ch):
    # BinarizeByThreshold forward (threshold 0.5) + kronecker with ones block.
    binarized = (conn > 0.5).astype(jnp.float32)
    ones_block = jnp.ones((out_ch // conn.shape[0], in_ch // conn.shape[1]),
                          jnp.float32)
    return jnp.kron(binarized, ones_block)


# ---------------------------------------------------------------------------
# BasicBlock forward
# ---------------------------------------------------------------------------
def basic_block_forward(x_nchw, params, *, stride=1, use_connectivity=True):
    n, cin, h, w = x_nchw.shape
    planes = params['w1'].shape[0]
    cc_in = _ceil_to(cin, LANE)
    cc = _ceil_to(planes, LANE)

    # NCHW -> lane-padded NHWC once, at the block boundary.
    x_nhwc = jnp.transpose(x_nchw, (0, 2, 3, 1))
    x_nhwc = jnp.pad(x_nhwc, ((0, 0), (0, 0), (0, 0), (0, cc_in - cin)))

    mask = (_connectivity_mask(params['connectivity'], planes, cin)
            if use_connectivity else None)
    w1 = _prep_weight(params['w1'], cc_in, cc, mask)
    w2 = _prep_weight(params['w2'], cc, cc, None)
    gamma1, beta1 = _pad_vec(params['gamma1'], cc), _pad_vec(params['beta1'], cc)
    gamma2, beta2 = _pad_vec(params['gamma2'], cc), _pad_vec(params['beta2'], cc)

    # One shared phase decomposition of x (conv1 AND projection shortcut).
    phases_x, oh, ow, phh, phw = _build_phases(x_nhwc, 3, stride, 1, cc_in)
    m = n * oh * ow

    # conv1 (+ BN1 stats)
    taps1 = _make_taps(3, stride, 1, 1, phh, phw, stride)
    y1, st1 = _phase_conv(phases_x, w1, taps1, oh, ow, phw)
    scale1, bias1 = _fold_bn(st1, gamma1, beta1, m)

    # BN1-apply + ReLU, written directly in conv2's padded phase layout (bf16)
    phh2 = oh + 2
    phw2 = _ceil_to(ow + 2, 8)
    hpad = pl.pallas_call(
        functools.partial(_bn_relu_to_phases_kernel, oh=oh, ow=ow),
        out_shape=jax.ShapeDtypeStruct((n, phh2 + 1, phw2, cc), jnp.bfloat16),
        grid=(n,),
        in_specs=[
            pl.BlockSpec((1, oh, ow, cc), lambda i: (i, 0, 0, 0)),
            pl.BlockSpec((1, cc), lambda i: (0, 0)),
            pl.BlockSpec((1, cc), lambda i: (0, 0)),
        ],
        out_specs=pl.BlockSpec((1, phh2 + 1, phw2, cc), lambda i: (i, 0, 0, 0)),
        compiler_params=pltpu.CompilerParams(
            dimension_semantics=("parallel",),
            vmem_limit_bytes=VMEM_LIMIT),
    )(y1, scale1, bias1)

    # conv2 (+ BN2 stats) — reads the flat view of hpad, no XLA re-pad pass.
    taps2 = _make_taps(3, 1, 1, 1, phh2, phw2, 1)
    y2, st2 = _phase_conv(hpad.reshape(n, (phh2 + 1) * phw2, cc), w2,
                          taps2, oh, ow, phw2)
    scale2, bias2 = _fold_bn(st2, gamma2, beta2, m)

    if stride != 1 or cin != planes:
        # Projection shortcut: masked 1x1 conv (one tap on the SAME phase slab)
        # + BN, fused into the final apply.
        wsc = _prep_weight(params['w_sc'], cc_in, cc, mask)
        gsc, bsc = _pad_vec(params['gamma_sc'], cc), _pad_vec(params['beta_sc'], cc)
        taps_sc = _make_taps(1, stride, 1, 0, phh, phw, stride)
        ysc, stsc = _phase_conv(phases_x, wsc, taps_sc, oh, ow, phw)
        scale_sc, bias_sc = _fold_bn(stsc, gsc, bsc, m)
        out2d = _apply_call(
            _bn_bn_add_relu_kernel, jnp.float32,
            (y2.reshape(m, cc), scale2, bias2,
             ysc.reshape(m, cc), scale_sc, bias_sc),
            (True, False, False, True, False, False))
    else:
        # Identity shortcut: residual is the lane-padded input itself (f32).
        x_res = x_nhwc.reshape(m, cc_in)
        out2d = _apply_call(
            _bn_add_relu_kernel, jnp.float32,
            (y2.reshape(m, cc), scale2, bias2, x_res),
            (True, False, False, True))

    out = out2d.reshape(n, oh, ow, cc)[:, :, :, :planes]
    return jnp.transpose(out, (0, 3, 1, 2))   # back to NCHW


# ---------------------------------------------------------------------------
# Pure-JAX reference (mirrors bf16 MXU inputs + bf16 conv-output storage)
# ---------------------------------------------------------------------------
def reference_forward(x, params, *, stride=1, use_connectivity=True):
    cin = x.shape[1]
    planes = params['w1'].shape[0]

    def conv(xx, ww, s, p):
        y = jax.lax.conv_general_dilated(
            xx.astype(jnp.bfloat16), ww.astype(jnp.bfloat16), (s, s),
            [(p, p), (p, p)], dimension_numbers=('NCHW', 'OIHW', 'NCHW'),
            preferred_element_type=jnp.float32)
        # kernels store conv outputs in bf16; mirror that rounding here.
        return y.astype(jnp.bfloat16).astype(jnp.float32)

    def bn(xx, g, b):
        mu = xx.mean(axis=(0, 2, 3), keepdims=True)
        vr = ((xx - mu) ** 2).mean(axis=(0, 2, 3), keepdims=True)
        return ((xx - mu) * jax.lax.rsqrt(vr + EPS)
                * g.reshape(1, -1, 1, 1) + b.reshape(1, -1, 1, 1))

    mask = (_connectivity_mask(params['connectivity'], planes, cin)
            if use_connectivity else None)
    w1 = params['w1'] if mask is None else params['w1'] * mask[:, :, None, None]
    out = jax.nn.relu(bn(conv(x, w1, stride, 1), params['gamma1'], params['beta1']))
    out = bn(conv(out, params['w2'], 1, 1), params['gamma2'], params['beta2'])
    if stride != 1 or cin != planes:
        wsc = params['w_sc'] if mask is None else params['w_sc'] * mask[:, :, None, None]
        sc = bn(conv(x, wsc, stride, 0), params['gamma_sc'], params['beta_sc'])
    else:
        sc = x
    return jax.nn.relu(out + sc)


# ---------------------------------------------------------------------------
# Deterministic parameter init (shapes per BasicBlock.__init__)
# ---------------------------------------------------------------------------
def init_params(key, in_planes, planes, *, stride, conn_shape=None,
                use_connectivity=True):
    ks = jax.random.split(key, 8)
    p = {
        'w1': 0.1 * jax.random.normal(ks[0], (planes, in_planes, 3, 3), jnp.float32),
        'gamma1': 1.0 + 0.1 * jax.random.normal(ks[1], (planes,), jnp.float32),
        'beta1': 0.1 * jax.random.normal(ks[2], (planes,), jnp.float32),
        'w2': 0.1 * jax.random.normal(ks[3], (planes, planes, 3, 3), jnp.float32),
        'gamma2': 1.0 + 0.1 * jax.random.normal(ks[4], (planes,), jnp.float32),
        'beta2': 0.1 * jax.random.normal(ks[5], (planes,), jnp.float32),
    }
    if use_connectivity:
        p['connectivity'] = jax.random.uniform(ks[6], conn_shape, jnp.float32)
    if stride != 1 or in_planes != planes:
        k7, k8, k9 = jax.random.split(ks[7], 3)
        p['w_sc'] = 0.1 * jax.random.normal(k7, (planes, in_planes, 1, 1), jnp.float32)
        p['gamma_sc'] = 1.0 + 0.1 * jax.random.normal(k8, (planes,), jnp.float32)
        p['beta_sc'] = 0.1 * jax.random.normal(k9, (planes,), jnp.float32)
    return p


if __name__ == "__main__":
    key = jax.random.PRNGKey(0)
    kx, kpA, kpB = jax.random.split(key, 3)

    x = jax.random.normal(kx, (2, 4, 16, 16), jnp.float32)   # NCHW, like PyTorch

    # Config A: MaskedConv2d path (connectivity given), stride=2, projection shortcut.
    pA = init_params(kpA, 4, 8, stride=2, conn_shape=(2, 2), use_connectivity=True)
    fwdA = jax.jit(functools.partial(basic_block_forward, stride=2, use_connectivity=True))
    refA_fn = jax.jit(functools.partial(reference_forward, stride=2, use_connectivity=True))
    outA = fwdA(x, pA)
    refA = refA_fn(x, pA)

    # Config B: plain Conv2d path, stride=1, identity shortcut.
    pB = init_params(kpB, 4, 4, stride=1, use_connectivity=False)
    fwdB = jax.jit(functools.partial(basic_block_forward, stride=1, use_connectivity=False))
    refB_fn = jax.jit(functools.partial(reference_forward, stride=1, use_connectivity=False))
    outB = fwdB(x, pB)
    refB = refB_fn(x, pB)

    jax.block_until_ready((outA, outB, refA, refB))
    assert outA.shape == (2, 8, 8, 8) and outB.shape == (2, 4, 16, 16)
    # Both paths use bf16 MXU inputs, f32 accumulation and bf16 conv-output
    # storage; remaining differences are accumulation-order level.
    assert jnp.allclose(outA, refA, atol=1e-2, rtol=1e-2), \
        float(jnp.max(jnp.abs(outA - refA)))
    assert jnp.allclose(outB, refB, atol=1e-2, rtol=1e-2), \
        float(jnp.max(jnp.abs(outB - refB)))
    print("KERNEL_OK")
</pallas_src>

<mosaic_0001>
module attributes {stable_mosaic.version = 11 : i64} {
  func.func @_conv_kernel(%arg0: i32, %arg1: memref<1x592x128xbf16, #tpu.memory_space<vmem>>, %arg2: memref<9x128x128xbf16, #tpu.memory_space<vmem>>, %arg3: memref<1x8x8x128xbf16, #tpu.memory_space<vmem>>, %arg4: memref<1x2x128xf32, #tpu.memory_space<vmem>>) attributes {dimension_semantics = [#tpu.dimension_semantics<parallel>], iteration_bounds = array<i64: 2>, scalar_prefetch = 0 : i64, scratch_operands = 0 : i64, tpu.core_type = #tpu.core_type<tc>, window_params = [{transform_indices = @transform_0, window_bounds = array<i64: 1, 592, 128>}, {pipeline_mode = #tpu.pipeline_mode<synchronous>, transform_indices = @transform_1, window_bounds = array<i64: 9, 128, 128>}, {transform_indices = @transform_2, window_bounds = array<i64: 1, 8, 8, 128>}, {transform_indices = @transform_3, window_bounds = array<i64: 1, 2, 128>}]} {
    %c0 = arith.constant 0 : index
    %c0_0 = arith.constant 0 : index
    %c0_1 = arith.constant 0 : index
    %0 = vector.load %arg1[%c0, %c0_0, %c0_1] : memref<1x592x128xbf16, #tpu.memory_space<vmem>>, vector<1x128x128xbf16>
    %1 = vector.shape_cast %0 : vector<1x128x128xbf16> to vector<128x128xbf16>
    %c0_2 = arith.constant 0 : index
    %c0_3 = arith.constant 0 : index
    %c0_4 = arith.constant 0 : index
    %2 = vector.load %arg2[%c0_2, %c0_3, %c0_4] : memref<9x128x128xbf16, #tpu.memory_space<vmem>>, vector<1x128x128xbf16>
    %3 = vector.shape_cast %2 : vector<1x128x128xbf16> to vector<128x128xbf16>
    %cst = arith.constant dense<0.000000e+00> : vector<128x128xf32>
    %4 = tpu.matmul %1, %3, %cst {dimension_numbers = #tpu.dot_dimension_numbers<[1], [0], [0], [1], [0, 0, 1, 1], [], []>} : vector<128x128xbf16>, vector<128x128xbf16>, vector<128x128xf32> -> vector<128x128xf32>
    %c0_5 = arith.constant 0 : index
    %c144 = arith.constant 144 : index
    %c0_6 = arith.constant 0 : index
    %5 = vector.load %arg1[%c0_5, %c144, %c0_6] : memref<1x592x128xbf16, #tpu.memory_space<vmem>>, vector<1x128x128xbf16>
    %6 = vector.shape_cast %5 : vector<1x128x128xbf16> to vector<128x128xbf16>
    %c1 = arith.constant 1 : index
    %c0_7 = arith.constant 0 : index
    %c0_8 = arith.constant 0 : index
    %7 = vector.load %arg2[%c1, %c0_7, %c0_8] : memref<9x128x128xbf16, #tpu.memory_space<vmem>>, vector<1x128x128xbf16>
    %8 = vector.shape_cast %7 : vector<1x128x128xbf16> to vector<128x128xbf16>
    %cst_9 = arith.constant dense<0.000000e+00> : vector<128x128xf32>
    %9 = tpu.matmul %6, %8, %cst_9 {dimension_numbers = #tpu.dot_dimension_numbers<[1], [0], [0], [1], [0, 0, 1, 1], [], []>} : vector<128x128xbf16>, vector<128x128xbf16>, vector<128x128xf32> -> vector<128x128xf32>
    %10 = arith.addf %4, %9 : vector<128x128xf32>
    %c0_10 = arith.constant 0 : index
    %c1_11 = arith.constant 1 : index
    %c0_12 = arith.constant 0 : index
    %11 = vector.load %arg1[%c0_10, %c1_11, %c0_12] : memref<1x592x128xbf16, #tpu.memory_space<vmem>>, vector<1x128x128xbf16>
    %12 = vector.shape_cast %11 : vector<1x128x128xbf16> to vector<128x128xbf16>
    %c2 = arith.constant 2 : index
    %c0_13 = arith.constant 0 : index
    %c0_14 = arith.constant 0 : index
    %13 = vector.load %arg2[%c2, %c0_13, %c0_14] : memref<9x128x128xbf16, #tpu.memory_space<vmem>>, vector<1x128x128xbf16>
    %14 = vector.shape_cast %13 : vector<1x128x128xbf16> to vector<128x128xbf16>
    %cst_15 = arith.constant dense<0.000000e+00> : vector<128x128xf32>
    %15 = tpu.matmul %12, %14, %cst_15 {dimension_numbers = #tpu.dot_dimension_numbers<[1], [0], [0], [1], [0, 0, 1, 1], [], []>} : vector<128x128xbf16>, vector<128x128xbf16>, vector<128x128xf32> -> vector<128x128xf32>
    %16 = arith.addf %10, %15 : vector<128x128xf32>
    %c0_16 = arith.constant 0 : index
    %c288 = arith.constant 288 : index
    %c0_17 = arith.constant 0 : index
    %17 = vector.load %arg1[%c0_16, %c288, %c0_17] : memref<1x592x128xbf16, #tpu.memory_space<vmem>>, vector<1x128x128xbf16>
    %18 = vector.shape_cast %17 : vector<1x128x128xbf16> to vector<128x128xbf16>
    %c3 = arith.constant 3 : index
    %c0_18 = arith.constant 0 : index
    %c0_19 = arith.constant 0 : index
    %19 = vector.load %arg2[%c3, %c0_18, %c0_19] : memref<9x128x128xbf16, #tpu.memory_space<vmem>>, vector<1x128x128xbf16>
    %20 = vector.shape_cast %19 : vector<1x128x128xbf16> to vector<128x128xbf16>
    %cst_20 = arith.constant dense<0.000000e+00> : vector<128x128xf32>
    %21 = tpu.matmul %18, %20, %cst_20 {dimension_numbers = #tpu.dot_dimension_numbers<[1], [0], [0], [1], [0, 0, 1, 1], [], []>} : vector<128x128xbf16>, vector<128x128xbf16>, vector<128x128xf32> -> vector<128x128xf32>
    %22 = arith.addf %16, %21 : vector<128x128xf32>
    %c0_21 = arith.constant 0 : index
    %c432 = arith.constant 432 : index
    %c0_22 = arith.constant 0 : index
    %23 = vector.load %arg1[%c0_21, %c432, %c0_22] : memref<1x592x128xbf16, #tpu.memory_space<vmem>>, vector<1x128x128xbf16>
    %24 = vector.shape_cast %23 : vector<1x128x128xbf16> to vector<128x128xbf16>
    %c4 = arith.constant 4 : index
    %c0_23 = arith.constant 0 : index
    %c0_24 = arith.constant 0 : index
    %25 = vector.load %arg2[%c4, %c0_23, %c0_24] : memref<9x128x128xbf16, #tpu.memory_space<vmem>>, vector<1x128x128xbf16>
    %26 = vector.shape_cast %25 : vector<1x128x128xbf16> to vector<128x128xbf16>
    %cst_25 = arith.constant dense<0.000000e+00> : vector<128x128xf32>
    %27 = tpu.matmul %24, %26, %cst_25 {dimension_numbers = #tpu.dot_dimension_numbers<[1], [0], [0], [1], [0, 0, 1, 1], [], []>} : vector<128x128xbf16>, vector<128x128xbf16>, vector<128x128xf32> -> vector<128x128xf32>
    %28 = arith.addf %22, %27 : vector<128x128xf32>
    %c0_26 = arith.constant 0 : index
    %c289 = arith.constant 289 : index
    %c0_27 = arith.constant 0 : index
    %29 = vector.load %arg1[%c0_26, %c289, %c0_27] : memref<1x592x128xbf16, #tpu.memory_space<vmem>>, vector<1x128x128xbf16>
    %30 = vector.shape_cast %29 : vector<1x128x128xbf16> to vector<128x128xbf16>
    %c5 = arith.constant 5 : index
    %c0_28 = arith.constant 0 : index
    %c0_29 = arith.constant 0 : index
    %31 = vector.load %arg2[%c5, %c0_28, %c0_29] : memref<9x128x128xbf16, #tpu.memory_space<vmem>>, vector<1x128x128xbf16>
    %32 = vector.shape_cast %31 : vector<1x128x128xbf16> to vector<128x128xbf16>
    %cst_30 = arith.constant dense<0.000000e+00> : vector<128x128xf32>
    %33 = tpu.matmul %30, %32, %cst_30 {dimension_numbers = #tpu.dot_dimension_numbers<[1], [0], [0], [1], [0, 0, 1, 1], [], []>} : vector<128x128xbf16>, vector<128x128xbf16>, vector<128x128xf32> -> vector<128x128xf32>
    %34 = arith.addf %28, %33 : vector<128x128xf32>
    %c0_31 = arith.constant 0 : index
    %c16 = arith.constant 16 : index
    %c0_32 = arith.constant 0 : index
    %35 = vector.load %arg1[%c0_31, %c16, %c0_32] : memref<1x592x128xbf16, #tpu.memory_space<vmem>>, vector<1x128x128xbf16>
    %36 = vector.shape_cast %35 : vector<1x128x128xbf16> to vector<128x128xbf16>
    %c6 = arith.constant 6 : index
    %c0_33 = arith.constant 0 : index
    %c0_34 = arith.constant 0 : index
    %37 = vector.load %arg2[%c6, %c0_33, %c0_34] : memref<9x128x128xbf16, #tpu.memory_space<vmem>>, vector<1x128x128xbf16>
    %38 = vector.shape_cast %37 : vector<1x128x128xbf16> to vector<128x128xbf16>
    %cst_35 = arith.constant dense<0.000000e+00> : vector<128x128xf32>
    %39 = tpu.matmul %36, %38, %cst_35 {dimension_numbers = #tpu.dot_dimension_numbers<[1], [0], [0], [1], [0, 0, 1, 1], [], []>} : vector<128x128xbf16>, vector<128x128xbf16>, vector<128x128xf32> -> vector<128x128xf32>
    %40 = arith.addf %34, %39 : vector<128x128xf32>
    %c0_36 = arith.constant 0 : index
    %c160 = arith.constant 160 : index
    %c0_37 = arith.constant 0 : index
    %41 = vector.load %arg1[%c0_36, %c160, %c0_37] : memref<1x592x128xbf16, #tpu.memory_space<vmem>>, vector<1x128x128xbf16>
    %42 = vector.shape_cast %41 : vector<1x128x128xbf16> to vector<128x128xbf16>
    %c7 = arith.constant 7 : index
    %c0_38 = arith.constant 0 : index
    %c0_39 = arith.constant 0 : index
    %43 = vector.load %arg2[%c7, %c0_38, %c0_39] : memref<9x128x128xbf16, #tpu.memory_space<vmem>>, vector<1x128x128xbf16>
    %44 = vector.shape_cast %43 : vector<1x128x128xbf16> to vector<128x128xbf16>
    %cst_40 = arith.constant dense<0.000000e+00> : vector<128x128xf32>
    %45 = tpu.matmul %42, %44, %cst_40 {dimension_numbers = #tpu.dot_dimension_numbers<[1], [0], [0], [1], [0, 0, 1, 1], [], []>} : vector<128x128xbf16>, vector<128x128xbf16>, vector<128x128xf32> -> vector<128x128xf32>
    %46 = arith.addf %40, %45 : vector<128x128xf32>
    %c0_41 = arith.constant 0 : index
    %c17 = arith.constant 17 : index
    %c0_42 = arith.constant 0 : index
    %47 = vector.load %arg1[%c0_41, %c17, %c0_42] : memref<1x592x128xbf16, #tpu.memory_space<vmem>>, vector<1x128x128xbf16>
    %48 = vector.shape_cast %47 : vector<1x128x128xbf16> to vector<128x128xbf16>
    %c8 = arith.constant 8 : index
    %c0_43 = arith.constant 0 : index
    %c0_44 = arith.constant 0 : index
    %49 = vector.load %arg2[%c8, %c0_43, %c0_44] : memref<9x128x128xbf16, #tpu.memory_space<vmem>>, vector<1x128x128xbf16>
    %50 = vector.shape_cast %49 : vector<1x128x128xbf16> to vector<128x128xbf16>
    %cst_45 = arith.constant dense<0.000000e+00> : vector<128x128xf32>
    %51 = tpu.matmul %48, %50, %cst_45 {dimension_numbers = #tpu.dot_dimension_numbers<[1], [0], [0], [1], [0, 0, 1, 1], [], []>} : vector<128x128xbf16>, vector<128x128xbf16>, vector<128x128xf32> -> vector<128x128xf32>
    %52 = arith.addf %46, %51 : vector<128x128xf32>
    %53 = vector.shape_cast %52 : vector<128x128xf32> to vector<8x16x128xf32>
    %54 = vector.extract_strided_slice %53 {offsets = [0, 0, 0], sizes = [8, 8, 128], strides = [1, 1, 1]} : vector<8x16x128xf32> to vector<8x8x128xf32>
    %55 = arith.truncf %54 : vector<8x8x128xf32> to vector<8x8x128xbf16>
    %c0_46 = arith.constant 0 : index
    %c0_47 = arith.constant 0 : index
    %c0_48 = arith.constant 0 : index
    %c0_49 = arith.constant 0 : index
    %56 = vector.load %arg3[%c0_46, %c0_47, %c0_48, %c0_49] : memref<1x8x8x128xbf16, #tpu.memory_space<vmem>>, vector<1x8x8x128xbf16>
    %57 = vector.shape_cast %56 : vector<1x8x8x128xbf16> to vector<8x8x128xbf16>
    %58 = vector.shape_cast %55 : vector<8x8x128xbf16> to vector<1x8x8x128xbf16>
    tpu.vector_store %arg3[%c0_46, %c0_47, %c0_48, %c0_49], %58 {strides = array<i32>} : memref<1x8x8x128xbf16, #tpu.memory_space<vmem>>, vector<1x8x8x128xbf16>,
    %59 = arith.extf %55 : vector<8x8x128xbf16> to vector<8x8x128xf32>
    %cst_50 = arith.constant dense<0.000000e+00> : vector<128xf32>
    %60 = vector.multi_reduction <add>, %59, %cst_50 [0, 1] : vector<8x8x128xf32> to vector<128xf32>
    %61 = vector.shape_cast %60 : vector<128xf32> to vector<1x1x128xf32>
    %62 = vector.shape_cast %61 : vector<1x1x128xf32> to vector<1x128xf32>
    %c0_51 = arith.constant 0 : index
    %c0_52 = arith.constant 0 : index
    %c0_53 = arith.constant 0 : index
    %63 = vector.load %arg4[%c0_51, %c0_52, %c0_53] : memref<1x2x128xf32, #tpu.memory_space<vmem>>, vector<1x1x128xf32>
    %64 = vector.shape_cast %63 : vector<1x1x128xf32> to vector<1x128xf32>
    %65 = vector.shape_cast %62 : vector<1x128xf32> to vector<1x1x128xf32>
    tpu.vector_store %arg4[%c0_51, %c0_52, %c0_53], %65 {strides = array<i32>} : memref<1x2x128xf32, #tpu.memory_space<vmem>>, vector<1x1x128xf32>,
    %66 = arith.mulf %59, %59 : vector<8x8x128xf32>
    %cst_54 = arith.constant dense<0.000000e+00> : vector<128xf32>
    %67 = vector.multi_reduction <add>, %66, %cst_54 [0, 1] : vector<8x8x128xf32> to vector<128xf32>
    %68 = vector.shape_cast %67 : vector<128xf32> to vector<1x1x128xf32>
    %69 = vector.shape_cast %68 : vector<1x1x128xf32> to vector<1x128xf32>
    %c0_55 = arith.constant 0 : index
    %c1_56 = arith.constant 1 : index
    %c0_57 = arith.constant 0 : index
    %70 = vector.load %arg4[%c0_55, %c1_56, %c0_57] : memref<1x2x128xf32, #tpu.memory_space<vmem>>, vector<1x1x128xf32>
    %71 = vector.shape_cast %70 : vector<1x1x128xf32> to vector<1x128xf32>
    %72 = vector.shape_cast %69 : vector<1x128xf32> to vector<1x1x128xf32>
    tpu.vector_store %arg4[%c0_55, %c1_56, %c0_57], %72 {strides = array<i32>} : memref<1x2x128xf32, #tpu.memory_space<vmem>>, vector<1x1x128xf32>,
    return
  }
  func.func @transform_0(%arg0: i32) -> (i32, i32, i32) {
    %c0_i32 = arith.constant 0 : i32
    %c0_i32_0 = arith.constant 0 : i32
    %c0_i32_1 = arith.constant 0 : i32
    return %arg0, %c0_i32, %c0_i32_0 : i32, i32, i32
  }
  func.func @transform_1(%arg0: i32) -> (i32, i32, i32) {
    %c0_i32 = arith.constant 0 : i32
    %c0_i32_0 = arith.constant 0 : i32
    %c0_i32_1 = arith.constant 0 : i32
    %c0_i32_2 = arith.constant 0 : i32
    return %c0_i32, %c0_i32_0, %c0_i32_1 : i32, i32, i32
  }
  func.func @transform_2(%arg0: i32) -> (i32, i32, i32, i32) {
    %c0_i32 = arith.constant 0 : i32
    %c0_i32_0 = arith.constant 0 : i32
    %c0_i32_1 = arith.constant 0 : i32
    %c0_i32_2 = arith.constant 0 : i32
    return %arg0, %c0_i32, %c0_i32_0, %c0_i32_1 : i32, i32, i32, i32
  }
  func.func @transform_3(%arg0: i32) -> (i32, i32, i32) {
    %c0_i32 = arith.constant 0 : i32
    %c0_i32_0 = arith.constant 0 : i32
    %c0_i32_1 = arith.constant 0 : i32
    return %arg0, %c0_i32, %c0_i32_0 : i32, i32, i32
  }
}

module attributes {stable_mosaic.version = 11 : i64} {
  func.func @_bn_relu_to_phases_kernel(%arg0: i32, %arg1: memref<1x8x8x128xbf16, #tpu.memory_space<vmem>>, %arg2: memref<1x128xf32, #tpu.memory_space<vmem>>, %arg3: memref<1x128xf32, #tpu.memory_space<vmem>>, %arg4: memref<1x11x16x128xbf16, #tpu.memory_space<vmem>>) attributes {dimension_semantics = [#tpu.dimension_semantics<parallel>], iteration_bounds = array<i64: 2>, scalar_prefetch = 0 : i64, scratch_operands = 0 : i64, tpu.core_type = #tpu.core_type<tc>, window_params = [{transform_indices = @transform_0, window_bounds = array<i64: 1, 8, 8, 128>}, {pipeline_mode = #tpu.pipeline_mode<synchronous>, transform_indices = @transform_1, window_bounds = array<i64: 1, 128>}, {pipeline_mode = #tpu.pipeline_mode<synchronous>, transform_indices = @transform_2, window_bounds = array<i64: 1, 128>}, {transform_indices = @transform_3, window_bounds = array<i64: 1, 11, 16, 128>}]} {
    %cst = arith.constant 0.000000e+00 : bf16
    %0 = vector.broadcast %cst : bf16 to vector<1x11x16x128xbf16>
    %c0 = arith.constant 0 : index
    %c0_0 = arith.constant 0 : index
    %c0_1 = arith.constant 0 : index
    %c0_2 = arith.constant 0 : index
    %1 = vector.load %arg4[%c0, %c0_0, %c0_1, %c0_2] : memref<1x11x16x128xbf16, #tpu.memory_space<vmem>>, vector<1x11x16x128xbf16>
    tpu.vector_store %arg4[%c0, %c0_0, %c0_1, %c0_2], %0 {strides = array<i32>} : memref<1x11x16x128xbf16, #tpu.memory_space<vmem>>, vector<1x11x16x128xbf16>,
    %c0_3 = arith.constant 0 : index
    %c0_4 = arith.constant 0 : index
    %c0_5 = arith.constant 0 : index
    %c0_6 = arith.constant 0 : index
    %2 = vector.load %arg1[%c0_3, %c0_4, %c0_5, %c0_6] : memref<1x8x8x128xbf16, #tpu.memory_space<vmem>>, vector<1x8x8x128xbf16>
    %3 = vector.shape_cast %2 : vector<1x8x8x128xbf16> to vector<8x8x128xbf16>
    %4 = arith.extf %3 : vector<8x8x128xbf16> to vector<8x8x128xf32>
    %c0_7 = arith.constant 0 : index
    %c0_8 = arith.constant 0 : index
    %5 = vector.load %arg2[%c0_7, %c0_8] : memref<1x128xf32, #tpu.memory_space<vmem>>, vector<1x128xf32>
    %6 = vector.shape_cast %5 : vector<1x128xf32> to vector<1x1x128xf32>
    %7 = vector.broadcast %6 : vector<1x1x128xf32> to vector<8x8x128xf32>
    %8 = arith.mulf %4, %7 : vector<8x8x128xf32>
    %c0_9 = arith.constant 0 : index
    %c0_10 = arith.constant 0 : index
    %9 = vector.load %arg3[%c0_9, %c0_10] : memref<1x128xf32, #tpu.memory_space<vmem>>, vector<1x128xf32>
    %10 = vector.shape_cast %9 : vector<1x128xf32> to vector<1x1x128xf32>
    %11 = vector.broadcast %10 : vector<1x1x128xf32> to vector<8x8x128xf32>
    %12 = arith.addf %8, %11 : vector<8x8x128xf32>
    %cst_11 = arith.constant 0.000000e+00 : f32
    %13 = vector.broadcast %cst_11 : f32 to vector<8x8x128xf32>
    %14 = arith.maximumf %12, %13 : vector<8x8x128xf32>
    %15 = arith.truncf %14 : vector<8x8x128xf32> to vector<8x8x128xbf16>
    %c0_12 = arith.constant 0 : index
    %c1 = arith.constant 1 : index
    %c1_13 = arith.constant 1 : index
    %c0_14 = arith.constant 0 : index
    %16 = vector.load %arg4[%c0_12, %c1, %c1_13, %c0_14] : memref<1x11x16x128xbf16, #tpu.memory_space<vmem>>, vector<1x8x8x128xbf16>
    %17 = vector.shape_cast %16 : vector<1x8x8x128xbf16> to vector<8x8x128xbf16>
    %18 = vector.shape_cast %15 : vector<8x8x128xbf16> to vector<1x8x8x128xbf16>
    tpu.vector_store %arg4[%c0_12, %c1, %c1_13, %c0_14], %18 {strides = array<i32>} : memref<1x11x16x128xbf16, #tpu.memory_space<vmem>>, vector<1x8x8x128xbf16>,
    return
  }
  func.func @transform_0(%arg0: i32) -> (i32, i32, i32, i32) {
    %c0_i32 = arith.constant 0 : i32
    %c0_i32_0 = arith.constant 0 : i32
    %c0_i32_1 = arith.constant 0 : i32
    %c0_i32_2 = arith.constant 0 : i32
    return %arg0, %c0_i32, %c0_i32_0, %c0_i32_1 : i32, i32, i32, i32
  }
  func.func @transform_1(%arg0: i32) -> (i32, i32) {
    %c0_i32 = arith.constant 0 : i32
    %c0_i32_0 = arith.constant 0 : i32
    %c0_i32_1 = arith.constant 0 : i32
    return %c0_i32, %c0_i32_0 : i32, i32
  }
  func.func @transform_2(%arg0: i32) -> (i32, i32) {
    %c0_i32 = arith.constant 0 : i32
    %c0_i32_0 = arith.constant 0 : i32
    %c0_i32_1 = arith.constant 0 : i32
    return %c0_i32, %c0_i32_0 : i32, i32
  }
  func.func @transform_3(%arg0: i32) -> (i32, i32, i32, i32) {
    %c0_i32 = arith.constant 0 : i32
    %c0_i32_0 = arith.constant 0 : i32
    %c0_i32_1 = arith.constant 0 : i32
    %c0_i32_2 = arith.constant 0 : i32
    return %arg0, %c0_i32, %c0_i32_0, %c0_i32_1 : i32, i32, i32, i32
  }
}

module attributes {stable_mosaic.version = 11 : i64} {
  func.func @_conv_kernel(%arg0: i32, %arg1: memref<1x176x128xbf16, #tpu.memory_space<vmem>>, %arg2: memref<9x128x128xbf16, #tpu.memory_space<vmem>>, %arg3: memref<1x8x8x128xbf16, #tpu.memory_space<vmem>>, %arg4: memref<1x2x128xf32, #tpu.memory_space<vmem>>) attributes {dimension_semantics = [#tpu.dimension_semantics<parallel>], iteration_bounds = array<i64: 2>, scalar_prefetch = 0 : i64, scratch_operands = 0 : i64, tpu.core_type = #tpu.core_type<tc>, window_params = [{transform_indices = @transform_0, window_bounds = array<i64: 1, 176, 128>}, {pipeline_mode = #tpu.pipeline_mode<synchronous>, transform_indices = @transform_1, window_bounds = array<i64: 9, 128, 128>}, {transform_indices = @transform_2, window_bounds = array<i64: 1, 8, 8, 128>}, {transform_indices = @transform_3, window_bounds = array<i64: 1, 2, 128>}]} {
    %c0 = arith.constant 0 : index
    %c0_0 = arith.constant 0 : index
    %c0_1 = arith.constant 0 : index
    %0 = vector.load %arg1[%c0, %c0_0, %c0_1] : memref<1x176x128xbf16, #tpu.memory_space<vmem>>, vector<1x128x128xbf16>
    %1 = vector.shape_cast %0 : vector<1x128x128xbf16> to vector<128x128xbf16>
    %c0_2 = arith.constant 0 : index
    %c0_3 = arith.constant 0 : index
    %c0_4 = arith.constant 0 : index
    %2 = vector.load %arg2[%c0_2, %c0_3, %c0_4] : memref<9x128x128xbf16, #tpu.memory_space<vmem>>, vector<1x128x128xbf16>
    %3 = vector.shape_cast %2 : vector<1x128x128xbf16> to vector<128x128xbf16>
    %cst = arith.constant dense<0.000000e+00> : vector<128x128xf32>
    %4 = tpu.matmul %1, %3, %cst {dimension_numbers = #tpu.dot_dimension_numbers<[1], [0], [0], [1], [0, 0, 1, 1], [], []>} : vector<128x128xbf16>, vector<128x128xbf16>, vector<128x128xf32> -> vector<128x128xf32>
    %c0_5 = arith.constant 0 : index
    %c1 = arith.constant 1 : index
    %c0_6 = arith.constant 0 : index
    %5 = vector.load %arg1[%c0_5, %c1, %c0_6] : memref<1x176x128xbf16, #tpu.memory_space<vmem>>, vector<1x128x128xbf16>
    %6 = vector.shape_cast %5 : vector<1x128x128xbf16> to vector<128x128xbf16>
    %c1_7 = arith.constant 1 : index
    %c0_8 = arith.constant 0 : index
    %c0_9 = arith.constant 0 : index
    %7 = vector.load %arg2[%c1_7, %c0_8, %c0_9] : memref<9x128x128xbf16, #tpu.memory_space<vmem>>, vector<1x128x128xbf16>
    %8 = vector.shape_cast %7 : vector<1x128x128xbf16> to vector<128x128xbf16>
    %cst_10 = arith.constant dense<0.000000e+00> : vector<128x128xf32>
    %9 = tpu.matmul %6, %8, %cst_10 {dimension_numbers = #tpu.dot_dimension_numbers<[1], [0], [0], [1], [0, 0, 1, 1], [], []>} : vector<128x128xbf16>, vector<128x128xbf16>, vector<128x128xf32> -> vector<128x128xf32>
    %10 = arith.addf %4, %9 : vector<128x128xf32>
    %c0_11 = arith.constant 0 : index
    %c2 = arith.constant 2 : index
    %c0_12 = arith.constant 0 : index
    %11 = vector.load %arg1[%c0_11, %c2, %c0_12] : memref<1x176x128xbf16, #tpu.memory_space<vmem>>, vector<1x128x128xbf16>
    %12 = vector.shape_cast %11 : vector<1x128x128xbf16> to vector<128x128xbf16>
    %c2_13 = arith.constant 2 : index
    %c0_14 = arith.constant 0 : index
    %c0_15 = arith.constant 0 : index
    %13 = vector.load %arg2[%c2_13, %c0_14, %c0_15] : memref<9x128x128xbf16, #tpu.memory_space<vmem>>, vector<1x128x128xbf16>
    %14 = vector.shape_cast %13 : vector<1x128x128xbf16> to vector<128x128xbf16>
    %cst_16 = arith.constant dense<0.000000e+00> : vector<128x128xf32>
    %15 = tpu.matmul %12, %14, %cst_16 {dimension_numbers = #tpu.dot_dimension_numbers<[1], [0], [0], [1], [0, 0, 1, 1], [], []>} : vector<128x128xbf16>, vector<128x128xbf16>, vector<128x128xf32> -> vector<128x128xf32>
    %16 = arith.addf %10, %15 : vector<128x128xf32>
    %c0_17 = arith.constant 0 : index
    %c16 = arith.constant 16 : index
    %c0_18 = arith.constant 0 : index
    %17 = vector.load %arg1[%c0_17, %c16, %c0_18] : memref<1x176x128xbf16, #tpu.memory_space<vmem>>, vector<1x128x128xbf16>
    %18 = vector.shape_cast %17 : vector<1x128x128xbf16> to vector<128x128xbf16>
    %c3 = arith.constant 3 : index
    %c0_19 = arith.constant 0 : index
    %c0_20 = arith.constant 0 : index
    %19 = vector.load %arg2[%c3, %c0_19, %c0_20] : memref<9x128x128xbf16, #tpu.memory_space<vmem>>, vector<1x128x128xbf16>
    %20 = vector.shape_cast %19 : vector<1x128x128xbf16> to vector<128x128xbf16>
    %cst_21 = arith.constant dense<0.000000e+00> : vector<128x128xf32>
    %21 = tpu.matmul %18, %20, %cst_21 {dimension_numbers = #tpu.dot_dimension_numbers<[1], [0], [0], [1], [0, 0, 1, 1], [], []>} : vector<128x128xbf16>, vector<128x128xbf16>, vector<128x128xf32> -> vector<128x128xf32>
    %22 = arith.addf %16, %21 : vector<128x128xf32>
    %c0_22 = arith.constant 0 : index
    %c17 = arith.constant 17 : index
    %c0_23 = arith.constant 0 : index
    %23 = vector.load %arg1[%c0_22, %c17, %c0_23] : memref<1x176x128xbf16, #tpu.memory_space<vmem>>, vector<1x128x128xbf16>
    %24 = vector.shape_cast %23 : vector<1x128x128xbf16> to vector<128x128xbf16>
    %c4 = arith.constant 4 : index
    %c0_24 = arith.constant 0 : index
    %c0_25 = arith.constant 0 : index
    %25 = vector.load %arg2[%c4, %c0_24, %c0_25] : memref<9x128x128xbf16, #tpu.memory_space<vmem>>, vector<1x128x128xbf16>
    %26 = vector.shape_cast %25 : vector<1x128x128xbf16> to vector<128x128xbf16>
    %cst_26 = arith.constant dense<0.000000e+00> : vector<128x128xf32>
    %27 = tpu.matmul %24, %26, %cst_26 {dimension_numbers = #tpu.dot_dimension_numbers<[1], [0], [0], [1], [0, 0, 1, 1], [], []>} : vector<128x128xbf16>, vector<128x128xbf16>, vector<128x128xf32> -> vector<128x128xf32>
    %28 = arith.addf %22, %27 : vector<128x128xf32>
    %c0_27 = arith.constant 0 : index
    %c18 = arith.constant 18 : index
    %c0_28 = arith.constant 0 : index
    %29 = vector.load %arg1[%c0_27, %c18, %c0_28] : memref<1x176x128xbf16, #tpu.memory_space<vmem>>, vector<1x128x128xbf16>
    %30 = vector.shape_cast %29 : vector<1x128x128xbf16> to vector<128x128xbf16>
    %c5 = arith.constant 5 : index
    %c0_29 = arith.constant 0 : index
    %c0_30 = arith.constant 0 : index
    %31 = vector.load %arg2[%c5, %c0_29, %c0_30] : memref<9x128x128xbf16, #tpu.memory_space<vmem>>, vector<1x128x128xbf16>
    %32 = vector.shape_cast %31 : vector<1x128x128xbf16> to vector<128x128xbf16>
    %cst_31 = arith.constant dense<0.000000e+00> : vector<128x128xf32>
    %33 = tpu.matmul %30, %32, %cst_31 {dimension_numbers = #tpu.dot_dimension_numbers<[1], [0], [0], [1], [0, 0, 1, 1], [], []>} : vector<128x128xbf16>, vector<128x128xbf16>, vector<128x128xf32> -> vector<128x128xf32>
    %34 = arith.addf %28, %33 : vector<128x128xf32>
    %c0_32 = arith.constant 0 : index
    %c32 = arith.constant 32 : index
    %c0_33 = arith.constant 0 : index
    %35 = vector.load %arg1[%c0_32, %c32, %c0_33] : memref<1x176x128xbf16, #tpu.memory_space<vmem>>, vector<1x128x128xbf16>
    %36 = vector.shape_cast %35 : vector<1x128x128xbf16> to vector<128x128xbf16>
    %c6 = arith.constant 6 : index
    %c0_34 = arith.constant 0 : index
    %c0_35 = arith.constant 0 : index
    %37 = vector.load %arg2[%c6, %c0_34, %c0_35] : memref<9x128x128xbf16, #tpu.memory_space<vmem>>, vector<1x128x128xbf16>
    %38 = vector.shape_cast %37 : vector<1x128x128xbf16> to vector<128x128xbf16>
    %cst_36 = arith.constant dense<0.000000e+00> : vector<128x128xf32>
    %39 = tpu.matmul %36, %38, %cst_36 {dimension_numbers = #tpu.dot_dimension_numbers<[1], [0], [0], [1], [0, 0, 1, 1], [], []>} : vector<128x128xbf16>, vector<128x128xbf16>, vector<128x128xf32> -> vector<128x128xf32>
    %40 = arith.addf %34, %39 : vector<128x128xf32>
    %c0_37 = arith.constant 0 : index
    %c33 = arith.constant 33 : index
    %c0_38 = arith.constant 0 : index
    %41 = vector.load %arg1[%c0_37, %c33, %c0_38] : memref<1x176x128xbf16, #tpu.memory_space<vmem>>, vector<1x128x128xbf16>
    %42 = vector.shape_cast %41 : vector<1x128x128xbf16> to vector<128x128xbf16>
    %c7 = arith.constant 7 : index
    %c0_39 = arith.constant 0 : index
    %c0_40 = arith.constant 0 : index
    %43 = vector.load %arg2[%c7, %c0_39, %c0_40] : memref<9x128x128xbf16, #tpu.memory_space<vmem>>, vector<1x128x128xbf16>
    %44 = vector.shape_cast %43 : vector<1x128x128xbf16> to vector<128x128xbf16>
    %cst_41 = arith.constant dense<0.000000e+00> : vector<128x128xf32>
    %45 = tpu.matmul %42, %44, %cst_41 {dimension_numbers = #tpu.dot_dimension_numbers<[1], [0], [0], [1], [0, 0, 1, 1], [], []>} : vector<128x128xbf16>, vector<128x128xbf16>, vector<128x128xf32> -> vector<128x128xf32>
    %46 = arith.addf %40, %45 : vector<128x128xf32>
    %c0_42 = arith.constant 0 : index
    %c34 = arith.constant 34 : index
    %c0_43 = arith.constant 0 : index
    %47 = vector.load %arg1[%c0_42, %c34, %c0_43] : memref<1x176x128xbf16, #tpu.memory_space<vmem>>, vector<1x128x128xbf16>
    %48 = vector.shape_cast %47 : vector<1x128x128xbf16> to vector<128x128xbf16>
    %c8 = arith.constant 8 : index
    %c0_44 = arith.constant 0 : index
    %c0_45 = arith.constant 0 : index
    %49 = vector.load %arg2[%c8, %c0_44, %c0_45] : memref<9x128x128xbf16, #tpu.memory_space<vmem>>, vector<1x128x128xbf16>
    %50 = vector.shape_cast %49 : vector<1x128x128xbf16> to vector<128x128xbf16>
    %cst_46 = arith.constant dense<0.000000e+00> : vector<128x128xf32>
    %51 = tpu.matmul %48, %50, %cst_46 {dimension_numbers = #tpu.dot_dimension_numbers<[1], [0], [0], [1], [0, 0, 1, 1], [], []>} : vector<128x128xbf16>, vector<128x128xbf16>, vector<128x128xf32> -> vector<128x128xf32>
    %52 = arith.addf %46, %51 : vector<128x128xf32>
    %53 = vector.shape_cast %52 : vector<128x128xf32> to vector<8x16x128xf32>
    %54 = vector.extract_strided_slice %53 {offsets = [0, 0, 0], sizes = [8, 8, 128], strides = [1, 1, 1]} : vector<8x16x128xf32> to vector<8x8x128xf32>
    %55 = arith.truncf %54 : vector<8x8x128xf32> to vector<8x8x128xbf16>
    %c0_47 = arith.constant 0 : index
    %c0_48 = arith.constant 0 : index
    %c0_49 = arith.constant 0 : index
    %c0_50 = arith.constant 0 : index
    %56 = vector.load %arg3[%c0_47, %c0_48, %c0_49, %c0_50] : memref<1x8x8x128xbf16, #tpu.memory_space<vmem>>, vector<1x8x8x128xbf16>
    %57 = vector.shape_cast %56 : vector<1x8x8x128xbf16> to vector<8x8x128xbf16>
    %58 = vector.shape_cast %55 : vector<8x8x128xbf16> to vector<1x8x8x128xbf16>
    tpu.vector_store %arg3[%c0_47, %c0_48, %c0_49, %c0_50], %58 {strides = array<i32>} : memref<1x8x8x128xbf16, #tpu.memory_space<vmem>>, vector<1x8x8x128xbf16>,
    %59 = arith.extf %55 : vector<8x8x128xbf16> to vector<8x8x128xf32>
    %cst_51 = arith.constant dense<0.000000e+00> : vector<128xf32>
    %60 = vector.multi_reduction <add>, %59, %cst_51 [0, 1] : vector<8x8x128xf32> to vector<128xf32>
    %61 = vector.shape_cast %60 : vector<128xf32> to vector<1x1x128xf32>
    %62 = vector.shape_cast %61 : vector<1x1x128xf32> to vector<1x128xf32>
    %c0_52 = arith.constant 0 : index
    %c0_53 = arith.constant 0 : index
    %c0_54 = arith.constant 0 : index
    %63 = vector.load %arg4[%c0_52, %c0_53, %c0_54] : memref<1x2x128xf32, #tpu.memory_space<vmem>>, vector<1x1x128xf32>
    %64 = vector.shape_cast %63 : vector<1x1x128xf32> to vector<1x128xf32>
    %65 = vector.shape_cast %62 : vector<1x128xf32> to vector<1x1x128xf32>
    tpu.vector_store %arg4[%c0_52, %c0_53, %c0_54], %65 {strides = array<i32>} : memref<1x2x128xf32, #tpu.memory_space<vmem>>, vector<1x1x128xf32>,
    %66 = arith.mulf %59, %59 : vector<8x8x128xf32>
    %cst_55 = arith.constant dense<0.000000e+00> : vector<128xf32>
    %67 = vector.multi_reduction <add>, %66, %cst_55 [0, 1] : vector<8x8x128xf32> to vector<128xf32>
    %68 = vector.shape_cast %67 : vector<128xf32> to vector<1x1x128xf32>
    %69 = vector.shape_cast %68 : vector<1x1x128xf32> to vector<1x128xf32>
    %c0_56 = arith.constant 0 : index
    %c1_57 = arith.constant 1 : index
    %c0_58 = arith.constant 0 : index
    %70 = vector.load %arg4[%c0_56, %c1_57, %c0_58] : memref<1x2x128xf32, #tpu.memory_space<vmem>>, vector<1x1x128xf32>
    %71 = vector.shape_cast %70 : vector<1x1x128xf32> to vector<1x128xf32>
    %72 = vector.shape_cast %69 : vector<1x128xf32> to vector<1x1x128xf32>
    tpu.vector_store %arg4[%c0_56, %c1_57, %c0_58], %72 {strides = array<i32>} : memref<1x2x128xf32, #tpu.memory_space<vmem>>, vector<1x1x128xf32>,
    return
  }
  func.func @transform_0(%arg0: i32) -> (i32, i32, i32) {
    %c0_i32 = arith.constant 0 : i32
    %c0_i32_0 = arith.constant 0 : i32
    %c0_i32_1 = arith.constant 0 : i32
    return %arg0, %c0_i32, %c0_i32_0 : i32, i32, i32
  }
  func.func @transform_1(%arg0: i32) -> (i32, i32, i32) {
    %c0_i32 = arith.constant 0 : i32
    %c0_i32_0 = arith.constant 0 : i32
    %c0_i32_1 = arith.constant 0 : i32
    %c0_i32_2 = arith.constant 0 : i32
    return %c0_i32, %c0_i32_0, %c0_i32_1 : i32, i32, i32
  }
  func.func @transform_2(%arg0: i32) -> (i32, i32, i32, i32) {
    %c0_i32 = arith.constant 0 : i32
    %c0_i32_0 = arith.constant 0 : i32
    %c0_i32_1 = arith.constant 0 : i32
    %c0_i32_2 = arith.constant 0 : i32
    return %arg0, %c0_i32, %c0_i32_0, %c0_i32_1 : i32, i32, i32, i32
  }
  func.func @transform_3(%arg0: i32) -> (i32, i32, i32) {
    %c0_i32 = arith.constant 0 : i32
    %c0_i32_0 = arith.constant 0 : i32
    %c0_i32_1 = arith.constant 0 : i32
    return %arg0, %c0_i32, %c0_i32_0 : i32, i32, i32
  }
}

module attributes {stable_mosaic.version = 11 : i64} {
  func.func @_conv_kernel(%arg0: i32, %arg1: memref<1x592x128xbf16, #tpu.memory_space<vmem>>, %arg2: memref<1x128x128xbf16, #tpu.memory_space<vmem>>, %arg3: memref<1x8x8x128xbf16, #tpu.memory_space<vmem>>, %arg4: memref<1x2x128xf32, #tpu.memory_space<vmem>>) attributes {dimension_semantics = [#tpu.dimension_semantics<parallel>], iteration_bounds = array<i64: 2>, scalar_prefetch = 0 : i64, scratch_operands = 0 : i64, tpu.core_type = #tpu.core_type<tc>, window_params = [{transform_indices = @transform_0, window_bounds = array<i64: 1, 592, 128>}, {pipeline_mode = #tpu.pipeline_mode<synchronous>, transform_indices = @transform_1, window_bounds = array<i64: 1, 128, 128>}, {transform_indices = @transform_2, window_bounds = array<i64: 1, 8, 8, 128>}, {transform_indices = @transform_3, window_bounds = array<i64: 1, 2, 128>}]} {
    %c0 = arith.constant 0 : index
    %c432 = arith.constant 432 : index
    %c0_0 = arith.constant 0 : index
    %0 = vector.load %arg1[%c0, %c432, %c0_0] : memref<1x592x128xbf16, #tpu.memory_space<vmem>>, vector<1x128x128xbf16>
    %1 = vector.shape_cast %0 : vector<1x128x128xbf16> to vector<128x128xbf16>
    %c0_1 = arith.constant 0 : index
    %c0_2 = arith.constant 0 : index
    %c0_3 = arith.constant 0 : index
    %2 = vector.load %arg2[%c0_1, %c0_2, %c0_3] : memref<1x128x128xbf16, #tpu.memory_space<vmem>>, vector<1x128x128xbf16>
    %3 = vector.shape_cast %2 : vector<1x128x128xbf16> to vector<128x128xbf16>
    %cst = arith.constant dense<0.000000e+00> : vector<128x128xf32>
    %4 = tpu.matmul %1, %3, %cst {dimension_numbers = #tpu.dot_dimension_numbers<[1], [0], [0], [1], [0, 0, 1, 1], [], []>} : vector<128x128xbf16>, vector<128x128xbf16>, vector<128x128xf32> -> vector<128x128xf32>
    %5 = vector.shape_cast %4 : vector<128x128xf32> to vector<8x16x128xf32>
    %6 = vector.extract_strided_slice %5 {offsets = [0, 0, 0], sizes = [8, 8, 128], strides = [1, 1, 1]} : vector<8x16x128xf32> to vector<8x8x128xf32>
    %7 = arith.truncf %6 : vector<8x8x128xf32> to vector<8x8x128xbf16>
    %c0_4 = arith.constant 0 : index
    %c0_5 = arith.constant 0 : index
    %c0_6 = arith.constant 0 : index
    %c0_7 = arith.constant 0 : index
    %8 = vector.load %arg3[%c0_4, %c0_5, %c0_6, %c0_7] : memref<1x8x8x128xbf16, #tpu.memory_space<vmem>>, vector<1x8x8x128xbf16>
    %9 = vector.shape_cast %8 : vector<1x8x8x128xbf16> to vector<8x8x128xbf16>
    %10 = vector.shape_cast %7 : vector<8x8x128xbf16> to vector<1x8x8x128xbf16>
    tpu.vector_store %arg3[%c0_4, %c0_5, %c0_6, %c0_7], %10 {strides = array<i32>} : memref<1x8x8x128xbf16, #tpu.memory_space<vmem>>, vector<1x8x8x128xbf16>,
    %11 = arith.extf %7 : vector<8x8x128xbf16> to vector<8x8x128xf32>
    %cst_8 = arith.constant dense<0.000000e+00> : vector<128xf32>
    %12 = vector.multi_reduction <add>, %11, %cst_8 [0, 1] : vector<8x8x128xf32> to vector<128xf32>
    %13 = vector.shape_cast %12 : vector<128xf32> to vector<1x1x128xf32>
    %14 = vector.shape_cast %13 : vector<1x1x128xf32> to vector<1x128xf32>
    %c0_9 = arith.constant 0 : index
    %c0_10 = arith.constant 0 : index
    %c0_11 = arith.constant 0 : index
    %15 = vector.load %arg4[%c0_9, %c0_10, %c0_11] : memref<1x2x128xf32, #tpu.memory_space<vmem>>, vector<1x1x128xf32>
    %16 = vector.shape_cast %15 : vector<1x1x128xf32> to vector<1x128xf32>
    %17 = vector.shape_cast %14 : vector<1x128xf32> to vector<1x1x128xf32>
    tpu.vector_store %arg4[%c0_9, %c0_10, %c0_11], %17 {strides = array<i32>} : memref<1x2x128xf32, #tpu.memory_space<vmem>>, vector<1x1x128xf32>,
    %18 = arith.mulf %11, %11 : vector<8x8x128xf32>
    %cst_12 = arith.constant dense<0.000000e+00> : vector<128xf32>
    %19 = vector.multi_reduction <add>, %18, %cst_12 [0, 1] : vector<8x8x128xf32> to vector<128xf32>
    %20 = vector.shape_cast %19 : vector<128xf32> to vector<1x1x128xf32>
    %21 = vector.shape_cast %20 : vector<1x1x128xf32> to vector<1x128xf32>
    %c0_13 = arith.constant 0 : index
    %c1 = arith.constant 1 : index
    %c0_14 = arith.constant 0 : index
    %22 = vector.load %arg4[%c0_13, %c1, %c0_14] : memref<1x2x128xf32, #tpu.memory_space<vmem>>, vector<1x1x128xf32>
    %23 = vector.shape_cast %22 : vector<1x1x128xf32> to vector<1x128xf32>
    %24 = vector.shape_cast %21 : vector<1x128xf32> to vector<1x1x128xf32>
    tpu.vector_store %arg4[%c0_13, %c1, %c0_14], %24 {strides = array<i32>} : memref<1x2x128xf32, #tpu.memory_space<vmem>>, vector<1x1x128xf32>,
    return
  }
  func.func @transform_0(%arg0: i32) -> (i32, i32, i32) {
    %c0_i32 = arith.constant 0 : i32
    %c0_i32_0 = arith.constant 0 : i32
    %c0_i32_1 = arith.constant 0 : i32
    return %arg0, %c0_i32, %c0_i32_0 : i32, i32, i32
  }
  func.func @transform_1(%arg0: i32) -> (i32, i32, i32) {
    %c0_i32 = arith.constant 0 : i32
    %c0_i32_0 = arith.constant 0 : i32
    %c0_i32_1 = arith.constant 0 : i32
    %c0_i32_2 = arith.constant 0 : i32
    return %c0_i32, %c0_i32_0, %c0_i32_1 : i32, i32, i32
  }
  func.func @transform_2(%arg0: i32) -> (i32, i32, i32, i32) {
    %c0_i32 = arith.constant 0 : i32
    %c0_i32_0 = arith.constant 0 : i32
    %c0_i32_1 = arith.constant 0 : i32
    %c0_i32_2 = arith.constant 0 : i32
    return %arg0, %c0_i32, %c0_i32_0, %c0_i32_1 : i32, i32, i32, i32
  }
  func.func @transform_3(%arg0: i32) -> (i32, i32, i32) {
    %c0_i32 = arith.constant 0 : i32
    %c0_i32_0 = arith.constant 0 : i32
    %c0_i32_1 = arith.constant 0 : i32
    return %arg0, %c0_i32, %c0_i32_0 : i32, i32, i32
  }
}

module attributes {stable_mosaic.version = 11 : i64} {
  func.func @_bn_bn_add_relu_kernel(%arg0: i32, %arg1: memref<128x128xbf16, #tpu.memory_space<vmem>>, %arg2: memref<1x128xf32, #tpu.memory_space<vmem>>, %arg3: memref<1x128xf32, #tpu.memory_space<vmem>>, %arg4: memref<128x128xbf16, #tpu.memory_space<vmem>>, %arg5: memref<1x128xf32, #tpu.memory_space<vmem>>, %arg6: memref<1x128xf32, #tpu.memory_space<vmem>>, %arg7: memref<128x128xf32, #tpu.memory_space<vmem>>) attributes {dimension_semantics = [#tpu.dimension_semantics<parallel>], iteration_bounds = array<i64: 1>, scalar_prefetch = 0 : i64, scratch_operands = 0 : i64, tpu.core_type = #tpu.core_type<tc>, window_params = [{transform_indices = @transform_0, window_bounds = array<i64: 128, 128>}, {pipeline_mode = #tpu.pipeline_mode<synchronous>, transform_indices = @transform_1, window_bounds = array<i64: 1, 128>}, {pipeline_mode = #tpu.pipeline_mode<synchronous>, transform_indices = @transform_2, window_bounds = array<i64: 1, 128>}, {transform_indices = @transform_3, window_bounds = array<i64: 128, 128>}, {pipeline_mode = #tpu.pipeline_mode<synchronous>, transform_indices = @transform_4, window_bounds = array<i64: 1, 128>}, {pipeline_mode = #tpu.pipeline_mode<synchronous>, transform_indices = @transform_5, window_bounds = array<i64: 1, 128>}, {transform_indices = @transform_6, window_bounds = array<i64: 128, 128>}]} {
    %c0 = arith.constant 0 : index
    %c0_0 = arith.constant 0 : index
    %0 = vector.load %arg1[%c0, %c0_0] : memref<128x128xbf16, #tpu.memory_space<vmem>>, vector<128x128xbf16>
    %1 = arith.extf %0 : vector<128x128xbf16> to vector<128x128xf32>
    %c0_1 = arith.constant 0 : index
    %c0_2 = arith.constant 0 : index
    %2 = vector.load %arg2[%c0_1, %c0_2] : memref<1x128xf32, #tpu.memory_space<vmem>>, vector<1x128xf32>
    %3 = vector.broadcast %2 : vector<1x128xf32> to vector<128x128xf32>
    %4 = arith.mulf %1, %3 : vector<128x128xf32>
    %c0_3 = arith.constant 0 : index
    %c0_4 = arith.constant 0 : index
    %5 = vector.load %arg3[%c0_3, %c0_4] : memref<1x128xf32, #tpu.memory_space<vmem>>, vector<1x128xf32>
    %6 = vector.broadcast %5 : vector<1x128xf32> to vector<128x128xf32>
    %7 = arith.addf %4, %6 : vector<128x128xf32>
    %c0_5 = arith.constant 0 : index
    %c0_6 = arith.constant 0 : index
    %8 = vector.load %arg4[%c0_5, %c0_6] : memref<128x128xbf16, #tpu.memory_space<vmem>>, vector<128x128xbf16>
    %9 = arith.extf %8 : vector<128x128xbf16> to vector<128x128xf32>
    %c0_7 = arith.constant 0 : index
    %c0_8 = arith.constant 0 : index
    %10 = vector.load %arg5[%c0_7, %c0_8] : memref<1x128xf32, #tpu.memory_space<vmem>>, vector<1x128xf32>
    %11 = vector.broadcast %10 : vector<1x128xf32> to vector<128x128xf32>
    %12 = arith.mulf %9, %11 : vector<128x128xf32>
    %13 = arith.addf %7, %12 : vector<128x128xf32>
    %c0_9 = arith.constant 0 : index
    %c0_10 = arith.constant 0 : index
    %14 = vector.load %arg6[%c0_9, %c0_10] : memref<1x128xf32, #tpu.memory_space<vmem>>, vector<1x128xf32>
    %15 = vector.broadcast %14 : vector<1x128xf32> to vector<128x128xf32>
    %16 = arith.addf %13, %15 : vector<128x128xf32>
    %cst = arith.constant 0.000000e+00 : f32
    %17 = vector.broadcast %cst : f32 to vector<128x128xf32>
    %18 = arith.maximumf %16, %17 : vector<128x128xf32>
    %c0_11 = arith.constant 0 : index
    %c0_12 = arith.constant 0 : index
    %19 = vector.load %arg7[%c0_11, %c0_12] : memref<128x128xf32, #tpu.memory_space<vmem>>, vector<128x128xf32>
    tpu.vector_store %arg7[%c0_11, %c0_12], %18 {strides = array<i32>} : memref<128x128xf32, #tpu.memory_space<vmem>>, vector<128x128xf32>,
    return
  }
  func.func @transform_0(%arg0: i32) -> (i32, i32) {
    %c0_i32 = arith.constant 0 : i32
    %c0_i32_0 = arith.constant 0 : i32
    return %arg0, %c0_i32 : i32, i32
  }
  func.func @transform_1(%arg0: i32) -> (i32, i32) {
    %c0_i32 = arith.constant 0 : i32
    %c0_i32_0 = arith.constant 0 : i32
    %c0_i32_1 = arith.constant 0 : i32
    return %c0_i32, %c0_i32_0 : i32, i32
  }
  func.func @transform_2(%arg0: i32) -> (i32, i32) {
    %c0_i32 = arith.constant 0 : i32
    %c0_i32_0 = arith.constant 0 : i32
    %c0_i32_1 = arith.constant 0 : i32
    return %c0_i32, %c0_i32_0 : i32, i32
  }
  func.func @transform_3(%arg0: i32) -> (i32, i32) {
    %c0_i32 = arith.constant 0 : i32
    %c0_i32_0 = arith.constant 0 : i32
    return %arg0, %c0_i32 : i32, i32
  }
  func.func @transform_4(%arg0: i32) -> (i32, i32) {
    %c0_i32 = arith.constant 0 : i32
    %c0_i32_0 = arith.constant 0 : i32
    %c0_i32_1 = arith.constant 0 : i32
    return %c0_i32, %c0_i32_0 : i32, i32
  }
  func.func @transform_5(%arg0: i32) -> (i32, i32) {
    %c0_i32 = arith.constant 0 : i32
    %c0_i32_0 = arith.constant 0 : i32
    %c0_i32_1 = arith.constant 0 : i32
    return %c0_i32, %c0_i32_0 : i32, i32
  }
  func.func @transform_6(%arg0: i32) -> (i32, i32) {
    %c0_i32 = arith.constant 0 : i32
    %c0_i32_0 = arith.constant 0 : i32
    return %arg0, %c0_i32 : i32, i32
  }
}

</mosaic_0001>

<bundles_post_ra>
// kernel: basic_block_forward.6
= control target key start
LH: loop header
LB: loop body
LE: loop exit
PB: predicated region body
PF: predicated region fallthrough
CT: control target
= control target key end

     0   :  { %s543_s12 = smov 0   ;;  %s688_s0 = inlined_call_operand.vmem [shape: bf16[2,8,8,128], index: 0, kind: input, shape index: {}]   ;;  %s689_s1 = inlined_call_operand.vmem [shape: f32[1,128], index: 1, kind: input, shape index: {}]   ;;  %s690_s2 = inlined_call_operand.vmem [shape: f32[1,128], index: 2, kind: input, shape index: {}]   ;;  %s691_s3 = inlined_call_operand.vmem [shape: bf16[2,11,16,128], index: 3, kind: output, shape index: {}]  }
   0x1 LB: > { %s440_s13 = sadd.s32 4294967295, %s520_s12   ;;  %p444_p0 = scmp.ge.s32.totalorder %s520_s12, 1  ;;  %s520_s12 = sphi %s543_s12, %s13_s12  }
   0x2   : > { %p137_p1 = scmp.lt.s32.totalorder %s520_s12, 3 }
   0x4   : > { %p138_p2 = pnand %p444_p0, %p137_p1 }
   0x5   : > { %p161_p3 = scmp.lt.s32.totalorder (!%p138_p2), %s440_s13, 1 }
   0x6   : > { %141 = sbr.rel (%p138_p2) target bundleno = 53 (0x35), region = 32 }
   0xb   : > { %s697_s13 = smov (!%p161_p3, %s440_s13), 1  ;;  %v512_v0 = vld [vmem:[%s689_s1] ss:$0 sm:$0xff]  ;;  %v522_v4 = vmov 0   ;;  %vm331_vm0 = vcmask 1043456   ;;  %vm337_vm3 = vcmask 1040384  }
   0xc   : > { %s502_s14 = smul.u32 88, %s697_s13  ;;  %s482_s15 = sshll.u32 %s697_s13, 5  ;;  %v513_v6 = vld [vmem:[%s690_s2] ss:$0 sm:$0xff]  ;;  %vm332_vm1 = vsmask.f32 7938 }
   0xd   : > { %s165_s18 = scalar_lea.vmem %s688_s0, %s482_s15  ;;  %vm338_vm2 = vsmask.f32 256  ;;  %vm603_vm4 = vmand %vm331_vm0, %vm332_vm1 }
   0xe   : > { %s560_s23 = scalar_lea.vmem %s691_s3, %s502_s14  ;;  %v484_v1 = vld [vmem:[%s165_s18] sm:$0xff]   ;;  %v499_v2 = vld [vmem:[%s165_s18 + $0x8] sm:$0xff]   ;;  %v500_v3 = vld [vmem:[%s165_s18 + $0x10] sm:$0xff]  }
   0xf   : > { %174 = vst [vmem:[%s560_s23 + $0x8] sm:$0xf] %v522_v4  ;;  %v485_v5 = vunpack.c.l.bf16 %v484_v1  ;;  %v486_v7 = vunpack.c.h.bf16 %v484_v1  ;;  %v489_v8 = vunpack.c.l.bf16 %v499_v2  ;;  %v490_v9 = vunpack.c.h.bf16 %v499_v2  ;;  %v501_v10 = vld [vmem:[%s165_s18 + $0x18] sm:$0xff]   ;;  %vm612_vm5 = vmand %vm337_vm3, %vm338_vm2 }
  0x10   : > { %172 = vst [vmem:[%s560_s23] sm:$0xf] %v522_v4  ;;  %v493_v11 = vunpack.c.l.bf16 %v500_v3  ;;  %v494_v12 = vunpack.c.h.bf16 %v500_v3  ;;  %v497_v13 = vunpack.c.l.bf16 %v501_v10  ;;  %v498_v20 = vunpack.c.h.bf16 %v501_v10 }
  0x11   : > { %173 = vst [vmem:[%s560_s23 + $0x4] sm:$0xf] %v522_v4  ;;  %v214_v14 = vmul.f32 %v512_v0, %v485_v5  ;;  %v215_v15 = vmul.f32 %v512_v0, %v486_v7  ;;  %v216_v16 = vmul.f32 %v512_v0, %v489_v8  ;;  %v217_v17 = vmul.f32 %v512_v0, %v490_v9 }
  0x12   : > { %175 = vst [vmem:[%s560_s23 + $0xc] sm:$0xf] %v522_v4  ;;  %v218_v18 = vmul.f32 %v512_v0, %v493_v11  ;;  %v219_v19 = vmul.f32 %v512_v0, %v494_v12  ;;  %v220_v26 = vmul.f32 %v512_v0, %v497_v13  ;;  %v221_v35 = vmul.f32 %v512_v0, %v498_v20 }
  0x13   : > { %176 = vst [vmem:[%s560_s23 + $0x10] sm:$0xf] %v522_v4  ;;  %v226_v21 = vadd.f32 %v513_v6, %v214_v14  ;;  %v227_v22 = vadd.f32 %v513_v6, %v215_v15  ;;  %v228_v23 = vadd.f32 %v513_v6, %v216_v16  ;;  %v229_v24 = vadd.f32 %v513_v6, %v217_v17 }
  0x14   : > { %177 = vst [vmem:[%s560_s23 + $0x14] sm:$0xf] %v522_v4  ;;  %v230_v25 = vadd.f32 %v513_v6, %v218_v18  ;;  %v231_v30 = vadd.f32 %v513_v6, %v219_v19  ;;  %v232_v39 = vadd.f32 %v513_v6, %v220_v26  ;;  %v233_v45 = vadd.f32 %v513_v6, %v221_v35 }
  0x15   : > { %178 = vst [vmem:[%s560_s23 + $0x18] sm:$0xf] %v522_v4  ;;  %v234_v27 = vmax.f32 %v226_v21, 0.0  ;;  %v235_v28 = vmax.f32 %v227_v22, 0.0  ;;  %v236_v29 = vmax.f32 %v228_v23, 0.0  ;;  %v237_v31 = vmax.f32 %v229_v24, 0.0 }
  0x16   : > { %179 = vst [vmem:[%s560_s23 + $0x1c] sm:$0xf] %v522_v4  ;;  %v238_v36 = vmax.f32 %v230_v25, 0.0  ;;  %v239_v38 = vmax.f32 %v231_v30, 0.0  ;;  %v448_v49 = vld [vmem:[%s560_s23 + $0x8] sm:$0xf] }
  0x17   : > { %180 = vst [vmem:[%s560_s23 + $0x20] sm:$0xf] %v522_v4  ;;  %v242_v32 = vpack.c.bf16 %v234_v27, %v234_v27  ;;  %v243_v33 = vpack.c.bf16 %v235_v28, %v235_v28  ;;  %v244_v34 = vpack.c.bf16 %v236_v29, %v236_v29  ;;  %v245_v42 = vpack.c.bf16 %v237_v31, %v237_v31 }
  0x18   : > { %181 = vst [vmem:[%s560_s23 + $0x24] sm:$0xf] %v522_v4  ;;  %v246_v48 = vpack.c.bf16 %v238_v36, %v238_v36  ;;  %v247_v50 = vpack.c.bf16 %v239_v38, %v239_v38  ;;  %v240_v51 = vmax.f32 %v232_v39, 0.0  ;;  %v241_v60 = vmax.f32 %v233_v45, 0.0 }
  0x19   : > { %182 = vst [vmem:[%s560_s23 + $0x28] sm:$0xf] %v522_v4  ;;  %v251_v37 = vshrl.u32 %v242_v32, 16  ;;  %v254_v40 = vshll.u32 %v242_v32, 16  ;;  %v259_v41 = vshrl.u32 %v243_v33, 16  ;;  %v267_v44 = vshrl.u32 %v244_v34, 16 }
  0x1a   : > { %183 = vst [vmem:[%s560_s23 + $0x2c] sm:$0xf] %v522_v4  ;;  %v262_v47 = vshll.u32 %v243_v33, 16  ;;  %v450_v53 = vld [vmem:[%s560_s23 + $0xc] sm:$0x1]  ;;  %v270_v55 = vshll.u32 %v244_v34, 16  ;;  %v248_v6 = vpack.c.bf16 %v240_v51, %v240_v51  ;;  %v249_v15 = vpack.c.bf16 %v241_v60, %v241_v60 }
  0x1b   : > { %184 = vst [vmem:[%s560_s23 + $0x30] sm:$0xf] %v522_v4  ;;  %v253_v43 = vrot.slane %v251_v37, 7  ;;  %v261_v46 = vrot.slane %v259_v41, 7  ;;  %v269_v54 = vrot.slane %v267_v44, 7  ;;  %v275_v56 = vshrl.u32 %v245_v42, 16 }
  0x1c   : > { %185 = vst [vmem:[%s560_s23 + $0x34] sm:$0xf] %v522_v4  ;;  %v452_v59 = vld [vmem:[%s560_s23 + $0x10] sm:$0xf]  ;;  %v278_v0 = vshll.u32 %v245_v42, 16  ;;  %v283_v1 = vshrl.u32 %v246_v48, 16 }
  0x1d   : > { %186 = vst [vmem:[%s560_s23 + $0x38] sm:$0xf] %v522_v4  ;;  %v256_v52 = vor.u32 %v254_v40, %v253_v43  ;;  %v257_v58 = vrot.slane %v253_v43, 4  ;;  %v264_v62 = vor.u32 %v262_v47, %v261_v46  ;;  %v277_v63 = vrot.slane %v275_v56, 7  ;;  %v454_v3 = vld [vmem:[%s560_s23 + $0x14] sm:$0x1] }
  0x1e   : > { %187 = vst [vmem:[%s560_s23 + $0x3c] sm:$0xf] %v522_v4  ;;  %v265_v2 = vrot.slane %v261_v46, 4  ;;  %v291_v5 = vshrl.u32 %v247_v50, 16  ;;  %v272_v8 = vor.u32 %v270_v55, %v269_v54  ;;  %v456_v9 = vld [vmem:[%s560_s23 + $0x18] sm:$0xf] }
  0x1f   : > { %188 = vst [vmem:[%s560_s23 + $0x40] sm:$0xf] %v522_v4  ;;  %v335_v7 = vsel %vm603_vm4, %v256_v52, %v448_v49  ;;  %v285_v10 = vrot.slane %v283_v1, 7  ;;  %v286_v11 = vshll.u32 %v246_v48, 16  ;;  %v341_v12 = vsel %vm612_vm5, %v257_v58, %v450_v53  ;;  %v458_v14 = vld [vmem:[%s560_s23 + $0x1c] sm:$0x1] }
  0x20   : > { %189 = vst [vmem:[%s560_s23 + $0x44] sm:$0xf] %v522_v4  ;;  %v273_v13 = vrot.slane %v269_v54, 4  ;;  %v344_v16 = vsel %vm603_vm4, %v264_v62, %v452_v59  ;;  %v280_v17 = vor.u32 %v278_v0, %v277_v63  ;;  %v460_v18 = vld [vmem:[%s560_s23 + $0x20] sm:$0xf]  ;;  %v293_v19 = vrot.slane %v291_v5, 7 }
  0x21   : > { %190 = vst [vmem:[%s560_s23 + $0x48] sm:$0xf] %v522_v4  ;;  %v294_v20 = vshll.u32 %v247_v50, 16  ;;  %v347_v21 = vsel %vm612_vm5, %v265_v2, %v454_v3  ;;  %v281_v22 = vrot.slane %v277_v63, 4  ;;  %v462_v23 = vld [vmem:[%s560_s23 + $0x24] sm:$0x1]  ;;  %v288_v25 = vor.u32 %v286_v11, %v285_v10 }
  0x22   : > { %191 = vst [vmem:[%s560_s23 + $0x4c] sm:$0xf] %v522_v4  ;;  %v299_v24 = vshrl.u32 %v248_v6, 16  ;;  %v464_v26 = vld [vmem:[%s560_s23 + $0x28] sm:$0xf]  ;;  %v302_v27 = vshll.u32 %v248_v6, 16  ;;  %v353_v28 = vsel %vm612_vm5, %v273_v13, %v458_v14  ;;  %v356_v32 = vsel %vm603_vm4, %v280_v17, %v460_v18 }
  0x23   : > { %192 = vst [vmem:[%s560_s23 + $0x50] sm:$0xf] %v522_v4  ;;  %v289_v29 = vrot.slane %v285_v10, 4  ;;  %v307_v31 = vshrl.u32 %v249_v15, 16  ;;  %v466_v33 = vld [vmem:[%s560_s23 + $0x2c] sm:$0x1]  ;;  %v296_v34 = vor.u32 %v294_v20, %v293_v19  ;;  %v359_v36 = vsel %vm612_vm5, %v281_v22, %v462_v23 }
  0x24   : > { %193 = vst [vmem:[%s560_s23 + $0x54] sm:$0xf] %v522_v4  ;;  %v350_v4 = vsel %vm603_vm4, %v272_v8, %v456_v9  ;;  %v301_v30 = vrot.slane %v299_v24, 7  ;;  %v310_v35 = vshll.u32 %v249_v15, 16  ;;  %v468_v37 = vld [vmem:[%s560_s23 + $0x30] sm:$0xf]  ;;  %v362_v40 = vsel %vm603_vm4, %v288_v25, %v464_v26 }
  0x25   : > { %449 = vst [vmem:[%s560_s23 + $0x8] sm:$0xf] %v335_v7  ;;  %v297_v38 = vrot.slane %v293_v19, 4  ;;  %v309_v39 = vrot.slane %v307_v31, 7  ;;  %v470_v41 = vld [vmem:[%s560_s23 + $0x34] sm:$0x1]  ;;  %v365_v43 = vsel %vm612_vm5, %v289_v29, %v466_v33  ;;  %v368_v46 = vsel %vm603_vm4, %v296_v34, %v468_v37 }
  0x26   : > { %451 = vst [vmem:[%s560_s23 + $0xc] sm:$0x1] %v341_v12  ;;  %v304_v42 = vor.u32 %v302_v27, %v301_v30  ;;  %v472_v44 = vld [vmem:[%s560_s23 + $0x38] sm:$0xf]  ;;  %v305_v45 = vrot.slane %v301_v30, 4 }
  0x27   : > { %453 = vst [vmem:[%s560_s23 + $0x10] sm:$0xf] %v344_v16  ;;  %v474_v47 = vld [vmem:[%s560_s23 + $0x3c] sm:$0x1]  ;;  %v312_v48 = vor.u32 %v310_v35, %v309_v39  ;;  %v371_v49 = vsel %vm612_vm5, %v297_v38, %v470_v41  ;;  %v476_v50 = vld [vmem:[%s560_s23 + $0x40] sm:$0xf] }
  0x28   : > { %455 = vst [vmem:[%s560_s23 + $0x14] sm:$0x1] %v347_v21  ;;  %v313_v51 = vrot.slane %v309_v39, 4  ;;  %v374_v52 = vsel %vm603_vm4, %v304_v42, %v472_v44  ;;  %v478_v53 = vld [vmem:[%s560_s23 + $0x44] sm:$0x1]  ;;  %v377_v54 = vsel %vm612_vm5, %v305_v45, %v474_v47 }
  0x29   : > { %457 = vst [vmem:[%s560_s23 + $0x18] sm:$0xf] %v350_v4  ;;  %v380_v55 = vsel %vm603_vm4, %v312_v48, %v476_v50 }
  0x2a   : > { %459 = vst [vmem:[%s560_s23 + $0x1c] sm:$0x1] %v353_v28  ;;  %v383_v56 = vsel %vm612_vm5, %v313_v51, %v478_v53 }
  0x2b   : > { %461 = vst [vmem:[%s560_s23 + $0x20] sm:$0xf] %v356_v32 }
  0x2c   : > { %463 = vst [vmem:[%s560_s23 + $0x24] sm:$0x1] %v359_v36 }
  0x2d   : > { %465 = vst [vmem:[%s560_s23 + $0x28] sm:$0xf] %v362_v40 }
  0x2e   : > { %467 = vst [vmem:[%s560_s23 + $0x2c] sm:$0x1] %v365_v43 }
  0x2f   : > { %469 = vst [vmem:[%s560_s23 + $0x30] sm:$0xf] %v368_v46 }
  0x30   : > { %471 = vst [vmem:[%s560_s23 + $0x34] sm:$0x1] %v371_v49 }
  0x31   : > { %473 = vst [vmem:[%s560_s23 + $0x38] sm:$0xf] %v374_v52 }
  0x32   : > { %475 = vst [vmem:[%s560_s23 + $0x3c] sm:$0x1] %v377_v54 }
  0x33   : > { %477 = vst [vmem:[%s560_s23 + $0x40] sm:$0xf] %v380_v55 }
  0x34   : > { %479 = vst [vmem:[%s560_s23 + $0x44] sm:$0x1] %v383_v56 }
  0x35 PF: > { %s13_s12 = sadd.s32 1, %s520_s12  }
  0x36   : > { %p10_p4 = scmp.ge.s32.totalorder %s13_s12, 4  }
  0x38   :  { %12 = sbr.rel (!%p10_p4) target bundleno = 1 (0x1), region = 63 }

// kernel: basic_block_forward.8
= control target key start
LH: loop header
LB: loop body
LE: loop exit
PB: predicated region body
PF: predicated region fallthrough
CT: control target
= control target key end

     0   :  { %s673_s12 = smov 0   ;;  %s732_s0 = inlined_call_operand.vmem [shape: bf16[2,592,128], index: 0, kind: input, shape index: {}]   ;;  %s733_s1 = inlined_call_operand.vmem [shape: bf16[1,128,128], index: 1, kind: input, shape index: {}]   ;;  %s734_s2 = inlined_call_operand.vmem [shape: bf16[2,8,8,128], index: 2, kind: output, shape index: {0}]   ;;  %s735_s3 = inlined_call_operand.vmem [shape: f32[2,2,128], index: 3, kind: output, shape index: {1}]  }
   0x1 LB: > { %s497_s13 = sadd.s32 4294967295, %s651_s12   ;;  %p501_p0 = scmp.ge.s32.totalorder %s651_s12, 1  ;;  %s651_s12 = sphi %s673_s12, %s14_s12  }
   0x2   : > { %p140_p1 = scmp.lt.s32.totalorder %s651_s12, 3 }
   0x4   : > { %p141_p2 = pnand %p501_p0, %p140_p1 }
   0x5   : > { %p168_p3 = scmp.lt.s32.totalorder (!%p141_p2), %s497_s13, 1 }
   0x6   : > { %144 = sbr.rel (%p141_p2) target bundleno = 218 (0xda), region = 28 }
   0xb   : > { %v588_v0 = vld [vmem:[%s733_s1 + $0x38] sm:$0xff]  ;;  %v587_v1 = vld [vmem:[%s733_s1 + $0x30] sm:$0xff]  ;;  %v586_v2 = vld [vmem:[%s733_s1 + $0x28] sm:$0xff]  ;;  %s737_s13 = smov (!%p168_p3, %s497_s13), 1 }
   0xc   : > { %310 = vmatpush.bf16.msra.mxu0 %v588_v0  ;;  %612 = vmatpush.bf16.msra.mxu1 %v588_v0  ;;  %v585_v3 = vld [vmem:[%s733_s1 + $0x20] sm:$0xff]  ;;  %v584_v4 = vld [vmem:[%s733_s1 + $0x18] sm:$0xff]  ;;  %v583_v5 = vld [vmem:[%s733_s1 + $0x10] sm:$0xff]  ;;  %s636_s28 = smul.u32 296, %s737_s13  ;;  %s572_s7 = sshll.u32 %s737_s13, 5 }
   0xd   : > { %613 = vmatpush.bf16.msra.mxu2 %v588_v0  ;;  %614 = vmatpush.bf16.msra.mxu3 %v588_v0  ;;  %v582_v6 = vld [vmem:[%s733_s1 + $0x8] sm:$0xff]  ;;  %v581_v7 = vld [vmem:[%s733_s1] sm:$0xff]  ;;  %s719_s10 = scalar_lea.vmem %s734_s2, %s572_s7  ;;  %s505_s11 = sshll.u32 %s737_s13, 1 }
   0xe   : > { %s172_s6 = scalar_lea.vmem %s732_s0, %s636_s28  ;;  %s181_s16 = scalar_lea.vmem %s735_s3, %s505_s11 }
   0xf   : > { %v573_v8 = vld [vmem:[%s172_s6 + $0xd8] sm:$0xff]  ;;  %v575_v9 = vld [vmem:[%s172_s6 + $0xe8] sm:$0xff]  ;;  %v574_v12 = vld [vmem:[%s172_s6 + $0xe0] sm:$0xff] }
  0x10   : > { %311 = vmatpush.bf16.msra.mxu0 %v587_v1  ;;  %615 = vmatpush.bf16.msra.mxu1 %v587_v1  ;;  %v577_v10 = vld [vmem:[%s172_s6 + $0xf8] sm:$0xff]  ;;  %v579_v11 = vld [vmem:[%s172_s6 + $0x108] sm:$0xff]  ;;  %v576_v13 = vld [vmem:[%s172_s6 + $0xf0] sm:$0xff] }
  0x11   : > { %616 = vmatpush.bf16.msra.mxu2 %v587_v1  ;;  %617 = vmatpush.bf16.msra.mxu3 %v587_v1  ;;  %v578_v14 = vld [vmem:[%s172_s6 + $0x100] sm:$0xff]  ;;  %v580_v15 = vld [vmem:[%s172_s6 + $0x110] sm:$0xff] }
  0x14   : > { %312 = vmatpush.bf16.msra.mxu0 %v586_v2  ;;  %618 = vmatpush.bf16.msra.mxu1 %v586_v2 }
  0x15   : > { %619 = vmatpush.bf16.msra.mxu2 %v586_v2  ;;  %620 = vmatpush.bf16.msra.mxu3 %v586_v2 }
  0x18   : > { %313 = vmatpush.bf16.msra.mxu0 %v585_v3  ;;  %621 = vmatpush.bf16.msra.mxu1 %v585_v3 }
  0x19   : > { %622 = vmatpush.bf16.msra.mxu2 %v585_v3  ;;  %623 = vmatpush.bf16.msra.mxu3 %v585_v3 }
  0x1c   : > { %314 = vmatpush.bf16.msra.mxu0 %v584_v4  ;;  %624 = vmatpush.bf16.msra.mxu1 %v584_v4 }
  0x1d   : > { %625 = vmatpush.bf16.msra.mxu2 %v584_v4  ;;  %626 = vmatpush.bf16.msra.mxu3 %v584_v4 }
  0x20   : > { %315 = vmatpush.bf16.msra.mxu0 %v583_v5  ;;  %627 = vmatpush.bf16.msra.mxu1 %v583_v5 }
  0x21   : > { %628 = vmatpush.bf16.msra.mxu2 %v583_v5  ;;  %629 = vmatpush.bf16.msra.mxu3 %v583_v5 }
  0x24   : > { %316 = vmatpush.bf16.msra.mxu0 %v582_v6  ;;  %630 = vmatpush.bf16.msra.mxu1 %v582_v6 }
  0x25   : > { %631 = vmatpush.bf16.msra.mxu2 %v582_v6  ;;  %632 = vmatpush.bf16.msra.mxu3 %v582_v6 }
  0x28   : > { %317 = vmatpush.bf16.msra.mxu0 %v581_v7  ;;  %633 = vmatpush.bf16.msra.mxu1 %v581_v7 }
  0x29   : > { %634 = vmatpush.bf16.msra.mxu2 %v581_v7  ;;  %635 = vmatpush.bf16.msra.mxu3 %v581_v7 }
  0x2b   : > { %318 = vmatmul.bf16.vlgmr.msra.gmra.mxu0 %v573_v8  ;;  %326 = vmatmul.bf16.vlgmr.msra.gmra.mxu1 %v575_v9 }
  0x2c   : > { %334 = vmatmul.bf16.vlgmr.msra.gmra.mxu2 %v577_v10  ;;  %342 = vmatmul.bf16.vlgmr.msra.gmra.mxu3 %v579_v11 }
  0x3b   : > { %322 = vmatmul.bf16.gmra.mxu0 %v574_v12  ;;  %330 = vmatmul.bf16.gmra.mxu1 %v576_v13 }
  0x3c   : > { %338 = vmatmul.bf16.gmra.mxu2 %v578_v14  ;;  %346 = vmatmul.bf16.gmra.mxu3 %v580_v15 }
  0xa8   : > { %v319_v16 = vpop.f32.mrf.mxu0  ;;  %v327_v17 = vpop.f32.mrf.mxu1 }
  0xa9   : > { %v351_v22 = vpack.c.bf16 %v319_v16, %v319_v16  ;;  %v353_v23 = vpack.c.bf16 %v327_v17, %v327_v17 }
  0xab   : > { %v367_v26 = vunpack.c.l.bf16 %v351_v22  ;;  %v369_v33 = vunpack.c.l.bf16 %v353_v23 }
  0xad   : > { %v389_v37 = vmul.f32 %v367_v26, %v367_v26  ;;  %v391_v40 = vmul.f32 %v369_v33, %v369_v33 }
  0xaf   : > { %v335_v18 = vpop.f32.mrf.mxu2  ;;  %v343_v19 = vpop.f32.mrf.mxu3 }
  0xb0   : > { %v321_v20 = vpop.f32.mrf.mxu0  ;;  %v329_v21 = vpop.f32.mrf.mxu1  ;;  %v355_v34 = vpack.c.bf16 %v335_v18, %v335_v18  ;;  %v357_v41 = vpack.c.bf16 %v343_v19, %v343_v19 }
  0xb2   : > { %v371_v42 = vunpack.c.l.bf16 %v355_v34  ;;  %v373_v56 = vunpack.c.l.bf16 %v357_v41 }
  0xb4   : > { %v393_v58 = vmul.f32 %v371_v42, %v371_v42  ;;  %v395_v1 = vmul.f32 %v373_v56, %v373_v56 }
  0xb7   : > { %v337_v24 = vpop.f32.mrf.mxu2  ;;  %v345_v25 = vpop.f32.mrf.mxu3 }
  0xb8   : > { %v323_v27 = vpop.f32.mrf.mxu0  ;;  %v331_v28 = vpop.f32.mrf.mxu1 }
  0xb9   : > { %v352_v29 = vpack.c.bf16 %v323_v27, %v323_v27  ;;  %v592_v30 = vpack.c.bf16 %v323_v27, %v319_v16  ;;  %v354_v31 = vpack.c.bf16 %v331_v28, %v331_v28  ;;  %v597_v32 = vpack.c.bf16 %v331_v28, %v327_v17 }
  0xbb   : > { %593 = vst [vmem:[%s719_s10] sm:$0xff] %v592_v30   ;;  %v368_v35 = vunpack.c.l.bf16 %v352_v29  ;;  %v370_v36 = vunpack.c.l.bf16 %v354_v31 }
  0xbc   : > { %609 = vst [vmem:[%s719_s10 + $0x8] sm:$0xff] %v597_v32  }
  0xbd   : > { %v375_v38 = vadd.f32 %v368_v35, %v367_v26  ;;  %v390_v39 = vmul.f32 %v368_v35, %v368_v35  ;;  %v392_v45 = vmul.f32 %v370_v36, %v370_v36 }
  0xbf   : > { %v397_v43 = vadd.f32 %v390_v39, %v389_v37  ;;  %v376_v44 = vadd.f32 %v375_v38, %v369_v33  ;;  %v339_v46 = vpop.f32.mrf.mxu2  ;;  %v347_v47 = vpop.f32.mrf.mxu3 }
  0xc0   : > { %v356_v48 = vpack.c.bf16 %v339_v46, %v339_v46  ;;  %v602_v49 = vpack.c.bf16 %v339_v46, %v335_v18  ;;  %v358_v50 = vpack.c.bf16 %v347_v47, %v347_v47  ;;  %v607_v51 = vpack.c.bf16 %v347_v47, %v343_v19  ;;  %v325_v52 = vpop.f32.mrf.mxu0  ;;  %v333_v53 = vpop.f32.mrf.mxu1 }
  0xc1   : > { %v377_v54 = vadd.f32 %v376_v44, %v370_v36  ;;  %v398_v55 = vadd.f32 %v397_v43, %v391_v40 }
  0xc2   : > { %610 = vst [vmem:[%s719_s10 + $0x10] sm:$0xff] %v602_v49   ;;  %v372_v57 = vunpack.c.l.bf16 %v356_v48  ;;  %v374_v61 = vunpack.c.l.bf16 %v358_v50 }
  0xc3   : > { %v399_v59 = vadd.f32 %v398_v55, %v392_v45  ;;  %v378_v60 = vadd.f32 %v377_v54, %v371_v42  ;;  %611 = vst [vmem:[%s719_s10 + $0x18] sm:$0xff] %v607_v51  }
  0xc4   : > { %v394_v62 = vmul.f32 %v372_v57, %v372_v57  ;;  %v396_v4 = vmul.f32 %v374_v61, %v374_v61 }
  0xc5   : > { %v379_v63 = vadd.f32 %v378_v60, %v372_v57  ;;  %v400_v0 = vadd.f32 %v399_v59, %v393_v58 }
  0xc7   : > { %v401_v2 = vadd.f32 %v400_v0, %v394_v62  ;;  %v380_v3 = vadd.f32 %v379_v63, %v373_v56  ;;  %v341_v5 = vpop.f32.mrf.mxu2  ;;  %v349_v6 = vpop.f32.mrf.mxu3 }
  0xc9   : > { %v381_v7 = vadd.f32 %v380_v3, %v374_v61  ;;  %v402_v8 = vadd.f32 %v401_v2, %v395_v1 }
  0xcb   : > { %v382_v9 = vrot.slane %v381_v7, 4  ;;  %v403_v10 = vadd.f32 %v402_v8, %v396_v4 }
  0xcd   : > { %v383_v11 = vadd.f32 %v382_v9, %v381_v7  ;;  %v404_v12 = vrot.slane %v403_v10, 4 }
  0xcf   : > { %v384_v13 = vrot.slane %v383_v11, 2  ;;  %v405_v14 = vadd.f32 %v404_v12, %v403_v10 }
  0xd1   : > { %v385_v15 = vadd.f32 %v384_v13, %v383_v11  ;;  %v406_v16 = vrot.slane %v405_v14, 2 }
  0xd3   : > { %v386_v17 = vrot.slane %v385_v15, 1  ;;  %v407_v18 = vadd.f32 %v406_v16, %v405_v14 }
  0xd5   : > { %v387_v19 = vadd.f32 %v386_v17, %v385_v15  ;;  %v408_v20 = vrot.slane %v407_v18, 1 }
  0xd7   : > { %388 = vst [vmem:[%s181_s16] sm:$0x1] %v387_v19  ;;  %v409_v21 = vadd.f32 %v408_v20, %v407_v18 }
  0xd9   : > { %410 = vst [vmem:[%s181_s16 + $0x1] sm:$0x1] %v409_v21 }
  0xda PF: > { %s14_s12 = sadd.s32 1, %s651_s12  }
  0xdb   : > { %p11_p4 = scmp.ge.s32.totalorder %s14_s12, 4  }
  0xdd   :  { %13 = sbr.rel (!%p11_p4) target bundleno = 1 (0x1), region = 70 }

// kernel: basic_block_forward.9
= control target key start
LH: loop header
LB: loop body
LE: loop exit
PB: predicated region body
PF: predicated region fallthrough
CT: control target
= control target key end

     0   :  { %s516_s0 = inlined_call_operand.vmem [shape: bf16[128,128], index: 0, kind: input, shape index: {}]   ;;  %s517_s1 = inlined_call_operand.vmem [shape: f32[1,128], index: 1, kind: input, shape index: {}]   ;;  %s518_s2 = inlined_call_operand.vmem [shape: f32[1,128], index: 2, kind: input, shape index: {}]   ;;  %s519_s3 = inlined_call_operand.vmem [shape: bf16[128,128], index: 3, kind: input, shape index: {}]   ;;  %s520_s4 = inlined_call_operand.vmem [shape: f32[1,128], index: 4, kind: input, shape index: {}]   ;;  %s521_s5 = inlined_call_operand.vmem [shape: f32[1,128], index: 5, kind: input, shape index: {}]   ;;  %s522_s6 = inlined_call_operand.vmem [shape: f32[128,128], index: 6, kind: output, shape index: {}]  }
   0x1   :  { %v220_v0 = vld [vmem:[%s516_s0] sm:$0xff]   ;;  %v283_v11 = vld [vmem:[%s516_s0 + $0x8] sm:$0xff]   ;;  %v284_v17 = vld [vmem:[%s516_s0 + $0x10] sm:$0xff]  }
   0x2   :  { %v342_v1 = vld [vmem:[%s517_s1] ss:$0 sm:$0xff]  ;;  %v221_v2 = vunpack.c.l.bf16 %v220_v0  ;;  %v222_v5 = vunpack.c.h.bf16 %v220_v0  ;;  %v290_v12 = vld [vmem:[%s519_s3 + $0x8] sm:$0xff]   ;;  %v225_v15 = vunpack.c.l.bf16 %v283_v11  ;;  %v291_v18 = vld [vmem:[%s519_s3 + $0x10] sm:$0xff]   ;;  %v226_v22 = vunpack.c.h.bf16 %v283_v11 }
   0x3   :  { %v347_v3 = vld [vmem:[%s518_s2] ss:$0 sm:$0xff]  ;;  %v257_v16 = vunpack.c.l.bf16 %v290_v12  ;;  %v258_v23 = vunpack.c.h.bf16 %v290_v12  ;;  %v229_v26 = vunpack.c.l.bf16 %v284_v17  ;;  %v261_v27 = vunpack.c.l.bf16 %v291_v18  ;;  %v285_v32 = vld [vmem:[%s516_s0 + $0x18] sm:$0xff]  }
   0x4   :  { %v252_v4 = vld [vmem:[%s519_s3] sm:$0xff]   ;;  %v59_v9 = vmul.f32 %v342_v1, %v221_v2  ;;  %v60_v10 = vmul.f32 %v342_v1, %v222_v5  ;;  %v61_v24 = vmul.f32 %v342_v1, %v225_v15  ;;  %v62_v30 = vmul.f32 %v342_v1, %v226_v22  ;;  %v292_v45 = vld [vmem:[%s519_s3 + $0x18] sm:$0xff]  }
   0x5   :  { %v253_v6 = vunpack.c.l.bf16 %v252_v4  ;;  %v355_v7 = vld [vmem:[%s520_s4] ss:$0 sm:$0xff]  ;;  %v254_v8 = vunpack.c.h.bf16 %v252_v4  ;;  %v63_v34 = vmul.f32 %v342_v1, %v229_v26  ;;  %v230_v36 = vunpack.c.h.bf16 %v284_v17 }
   0x6   :  { %v79_v19 = vadd.f32 %v347_v3, %v59_v9  ;;  %v377_v20 = vld [vmem:[%s521_s5] ss:$0 sm:$0xff]  ;;  %v80_v21 = vadd.f32 %v347_v3, %v60_v10  ;;  %v133_v25 = vmul.f32 %v355_v7, %v257_v16  ;;  %v134_v31 = vmul.f32 %v355_v7, %v258_v23  ;;  %v294_v16 = vld [vmem:[%s519_s3 + $0x28] sm:$0xff]  }
   0x7   :  { %v131_v13 = vmul.f32 %v355_v7, %v253_v6  ;;  %v132_v14 = vmul.f32 %v355_v7, %v254_v8  ;;  %v81_v33 = vadd.f32 %v347_v3, %v61_v24  ;;  %v135_v35 = vmul.f32 %v355_v7, %v261_v27  ;;  %v286_v58 = vld [vmem:[%s516_s0 + $0x20] sm:$0xff]   ;;  %v287_v6 = vld [vmem:[%s516_s0 + $0x28] sm:$0xff]  }
   0x8   :  { %v82_v39 = vadd.f32 %v347_v3, %v62_v30  ;;  %v262_v40 = vunpack.c.h.bf16 %v291_v18  ;;  %v83_v42 = vadd.f32 %v347_v3, %v63_v34  ;;  %v64_v43 = vmul.f32 %v342_v1, %v230_v36  ;;  %v293_v59 = vld [vmem:[%s519_s3 + $0x20] sm:$0xff]   ;;  %v288_v30 = vld [vmem:[%s516_s0 + $0x30] sm:$0xff]  }
   0x9   :  { %v147_v28 = vadd.f32 %v131_v13, %v79_v19  ;;  %v148_v29 = vadd.f32 %v132_v14, %v80_v21  ;;  %v149_v41 = vadd.f32 %v133_v25, %v81_v33  ;;  %v233_v44 = vunpack.c.l.bf16 %v285_v32 }
   0xa   :  { %v150_v48 = vadd.f32 %v134_v31, %v82_v39  ;;  %v136_v49 = vmul.f32 %v355_v7, %v262_v40  ;;  %v151_v51 = vadd.f32 %v135_v35, %v83_v42  ;;  %v84_v52 = vadd.f32 %v347_v3, %v64_v43  ;;  %v295_v35 = vld [vmem:[%s519_s3 + $0x30] sm:$0xff]  }
   0xb   :  { %v167_v37 = vadd.f32 %v377_v20, %v147_v28  ;;  %v168_v38 = vadd.f32 %v377_v20, %v148_v29  ;;  %v169_v50 = vadd.f32 %v377_v20, %v149_v41  ;;  %v65_v53 = vmul.f32 %v342_v1, %v233_v44 }
   0xc   :  { %v170_v54 = vadd.f32 %v377_v20, %v150_v48  ;;  %v265_v55 = vunpack.c.l.bf16 %v292_v45  ;;  %v234_v56 = vunpack.c.h.bf16 %v285_v32  ;;  %v266_v57 = vunpack.c.h.bf16 %v292_v45 }
   0xd   :  { %v183_v46 = vmax.f32 %v167_v37, 0.0  ;;  %v184_v47 = vmax.f32 %v168_v38, 0.0  ;;  %v185_v60 = vmax.f32 %v169_v50, 0.0  ;;  %v171_v61 = vadd.f32 %v377_v20, %v151_v51 }
   0xe   :  { %v152_v62 = vadd.f32 %v136_v49, %v84_v52  ;;  %v85_v63 = vadd.f32 %v347_v3, %v65_v53  ;;  %v186_v0 = vmax.f32 %v170_v54, 0.0  ;;  %v137_v2 = vmul.f32 %v355_v7, %v265_v55  ;;  %v289_v52 = vld [vmem:[%s516_s0 + $0x38] sm:$0xff]  }
   0xf   :  { %199 = vst [vmem:[%s522_s6] sm:$0xff] %v183_v46  ;;  %v66_v4 = vmul.f32 %v342_v1, %v234_v56  ;;  %v138_v5 = vmul.f32 %v355_v7, %v266_v57  ;;  %v187_v8 = vmax.f32 %v171_v61, 0.0  ;;  %v237_v10 = vunpack.c.l.bf16 %v286_v58  ;;  %v296_v53 = vld [vmem:[%s519_s3 + $0x38] sm:$0xff]  }
  0x10   :  { %200 = vst [vmem:[%s522_s6 + $0x8] sm:$0xff] %v184_v47  ;;  %v172_v9 = vadd.f32 %v377_v20, %v152_v62  ;;  %v269_v11 = vunpack.c.l.bf16 %v293_v59  ;;  %v153_v12 = vadd.f32 %v137_v2, %v85_v63  ;;  %v238_v14 = vunpack.c.h.bf16 %v286_v58 }
  0x11   :  { %201 = vst [vmem:[%s522_s6 + $0x10] sm:$0xff] %v185_v60  ;;  %v86_v13 = vadd.f32 %v347_v3, %v66_v4  ;;  %v270_v15 = vunpack.c.h.bf16 %v293_v59  ;;  %v67_v18 = vmul.f32 %v342_v1, %v237_v10  ;;  %v241_v21 = vunpack.c.l.bf16 %v287_v6 }
  0x12   :  { %202 = vst [vmem:[%s522_s6 + $0x18] sm:$0xff] %v186_v0  ;;  %v188_v17 = vmax.f32 %v172_v9, 0.0  ;;  %v139_v19 = vmul.f32 %v355_v7, %v269_v11  ;;  %v173_v22 = vadd.f32 %v377_v20, %v153_v12  ;;  %v68_v24 = vmul.f32 %v342_v1, %v238_v14 }
  0x13   :  { %203 = vst [vmem:[%s522_s6 + $0x20] sm:$0xff] %v187_v8  ;;  %v154_v23 = vadd.f32 %v138_v5, %v86_v13  ;;  %v140_v25 = vmul.f32 %v355_v7, %v270_v15  ;;  %v87_v26 = vadd.f32 %v347_v3, %v67_v18  ;;  %v69_v27 = vmul.f32 %v342_v1, %v241_v21 }
  0x14   :  { %204 = vst [vmem:[%s522_s6 + $0x28] sm:$0xff] %v188_v17  ;;  %v273_v28 = vunpack.c.l.bf16 %v294_v16  ;;  %v242_v29 = vunpack.c.h.bf16 %v287_v6  ;;  %v189_v31 = vmax.f32 %v173_v22, 0.0  ;;  %v88_v33 = vadd.f32 %v347_v3, %v68_v24 }
  0x15   :  { %v174_v32 = vadd.f32 %v377_v20, %v154_v23  ;;  %v274_v34 = vunpack.c.h.bf16 %v294_v16  ;;  %v155_v36 = vadd.f32 %v139_v19, %v87_v26  ;;  %v89_v37 = vadd.f32 %v347_v3, %v69_v27 }
  0x16   :  { %v141_v38 = vmul.f32 %v355_v7, %v273_v28  ;;  %v70_v39 = vmul.f32 %v342_v1, %v242_v29  ;;  %205 = vst [vmem:[%s522_s6 + $0x30] sm:$0xff] %v189_v31  ;;  %v156_v41 = vadd.f32 %v140_v25, %v88_v33  ;;  %v245_v43 = vunpack.c.l.bf16 %v288_v30 }
  0x17   :  { %v190_v40 = vmax.f32 %v174_v32, 0.0  ;;  %v142_v42 = vmul.f32 %v355_v7, %v274_v34  ;;  %v175_v44 = vadd.f32 %v377_v20, %v155_v36  ;;  %v277_v47 = vunpack.c.l.bf16 %v295_v35 }
  0x18   :  { %v157_v45 = vadd.f32 %v141_v38, %v89_v37  ;;  %v90_v46 = vadd.f32 %v347_v3, %v70_v39  ;;  %v176_v48 = vadd.f32 %v377_v20, %v156_v41  ;;  %v71_v49 = vmul.f32 %v342_v1, %v245_v43 }
  0x19   :  { %206 = vst [vmem:[%s522_s6 + $0x38] sm:$0xff] %v190_v40  ;;  %v246_v50 = vunpack.c.h.bf16 %v288_v30  ;;  %v278_v51 = vunpack.c.h.bf16 %v295_v35  ;;  %v191_v54 = vmax.f32 %v175_v44, 0.0  ;;  %v143_v57 = vmul.f32 %v355_v7, %v277_v47 }
  0x1a   :  { %v177_v55 = vadd.f32 %v377_v20, %v157_v45  ;;  %v158_v56 = vadd.f32 %v142_v42, %v90_v46  ;;  %v192_v58 = vmax.f32 %v176_v48, 0.0  ;;  %v91_v59 = vadd.f32 %v347_v3, %v71_v49 }
  0x1b   :  { %v72_v60 = vmul.f32 %v342_v1, %v246_v50  ;;  %v144_v61 = vmul.f32 %v355_v7, %v278_v51  ;;  %207 = vst [vmem:[%s522_s6 + $0x40] sm:$0xff] %v191_v54  ;;  %v249_v0 = vunpack.c.l.bf16 %v289_v52  ;;  %v281_v2 = vunpack.c.l.bf16 %v296_v53 }
  0x1c   :  { %v193_v62 = vmax.f32 %v177_v55, 0.0  ;;  %v178_v63 = vadd.f32 %v377_v20, %v158_v56  ;;  %208 = vst [vmem:[%s522_s6 + $0x48] sm:$0xff] %v192_v58  ;;  %v159_v4 = vadd.f32 %v143_v57, %v91_v59  ;;  %v250_v6 = vunpack.c.h.bf16 %v289_v52 }
  0x1d   :  { %v92_v5 = vadd.f32 %v347_v3, %v72_v60  ;;  %v282_v8 = vunpack.c.h.bf16 %v296_v53  ;;  %v73_v10 = vmul.f32 %v342_v1, %v249_v0  ;;  %v145_v11 = vmul.f32 %v355_v7, %v281_v2 }
  0x1e   :  { %209 = vst [vmem:[%s522_s6 + $0x50] sm:$0xff] %v193_v62  ;;  %v194_v9 = vmax.f32 %v178_v63, 0.0  ;;  %v179_v12 = vadd.f32 %v377_v20, %v159_v4  ;;  %v74_v14 = vmul.f32 %v342_v1, %v250_v6 }
  0x1f   :  { %v160_v13 = vadd.f32 %v144_v61, %v92_v5  ;;  %v146_v15 = vmul.f32 %v355_v7, %v282_v8  ;;  %v93_v16 = vadd.f32 %v347_v3, %v73_v10 }
  0x20   :  { %210 = vst [vmem:[%s522_s6 + $0x58] sm:$0xff] %v194_v9  ;;  %v195_v17 = vmax.f32 %v179_v12, 0.0  ;;  %v94_v19 = vadd.f32 %v347_v3, %v74_v14 }
  0x21   :  { %v180_v18 = vadd.f32 %v377_v20, %v160_v13  ;;  %v161_v21 = vadd.f32 %v145_v11, %v93_v16 }
  0x22   :  { %211 = vst [vmem:[%s522_s6 + $0x60] sm:$0xff] %v195_v17  ;;  %v162_v1 = vadd.f32 %v146_v15, %v94_v19 }
  0x23   :  { %v196_v22 = vmax.f32 %v180_v18, 0.0  ;;  %v181_v7 = vadd.f32 %v377_v20, %v161_v21 }
  0x24   :  { %v182_v23 = vadd.f32 %v377_v20, %v162_v1 }
  0x25   :  { %212 = vst [vmem:[%s522_s6 + $0x68] sm:$0xff] %v196_v22  ;;  %v197_v24 = vmax.f32 %v181_v7, 0.0 }
  0x26   :  { %v198_v25 = vmax.f32 %v182_v23, 0.0 }
  0x27   :  { %213 = vst [vmem:[%s522_s6 + $0x70] sm:$0xff] %v197_v24 }
  0x28   :  { %214 = vst [vmem:[%s522_s6 + $0x78] sm:$0xff] %v198_v25 }

// kernel: basic_block_forward.5
= control target key start
LH: loop header
LB: loop body
LE: loop exit
PB: predicated region body
PF: predicated region fallthrough
CT: control target
= control target key end

     0   :  { %s3074_s12 = smov 0   ;;  %s3472_s0 = inlined_call_operand.vmem [shape: bf16[2,592,128], index: 0, kind: input, shape index: {}]   ;;  %s3473_s1 = inlined_call_operand.vmem [shape: bf16[9,128,128], index: 1, kind: input, shape index: {}]   ;;  %s3474_s2 = inlined_call_operand.vmem [shape: bf16[2,8,8,128], index: 2, kind: output, shape index: {0}]   ;;  %s3475_s3 = inlined_call_operand.vmem [shape: f32[2,2,128], index: 3, kind: output, shape index: {1}]  }
   0x1 LB: > { %s2130_s13 = sadd.s32 4294967295, %s3052_s12   ;;  %p2134_p0 = scmp.ge.s32.totalorder %s3052_s12, 1  ;;  %s3052_s12 = sphi %s3074_s12, %s14_s12  }
   0x2   : > { %p140_p1 = scmp.lt.s32.totalorder %s3052_s12, 3 }
   0x4   : > { %p141_p2 = pnand %p2134_p0, %p140_p1 }
   0x5   : > { %p168_p3 = scmp.lt.s32.totalorder (!%p141_p2), %s2130_s13, 1 }
   0x6   : > { %144 = sbr.rel (%p141_p2) target bundleno = 474 (0x1da), region = 28 }
   0xb   : > { %v2877_v0 = vld [vmem:[%s3473_s1 + $0x78] sm:$0xff]  ;;  %v2876_v1 = vld [vmem:[%s3473_s1 + $0x70] sm:$0xff]  ;;  %v2875_v2 = vld [vmem:[%s3473_s1 + $0x68] sm:$0xff]  ;;  %s3477_s13 = smov (!%p168_p3, %s2130_s13), 1  ;;  %vm598_vm0 = vsmask.f32 7424 }
   0xc   : > { %3013 = vmatpush.bf16.msra.mxu1 %v2877_v0  ;;  %3014 = vmatpush.bf16.msra.mxu2 %v2877_v0  ;;  %v2874_v3 = vld [vmem:[%s3473_s1 + $0x60] sm:$0xff]  ;;  %v2873_v4 = vld [vmem:[%s3473_s1 + $0x58] sm:$0xff]  ;;  %v2872_v5 = vld [vmem:[%s3473_s1 + $0x50] sm:$0xff]  ;;  %s3037_s28 = smul.u32 296, %s3477_s13  ;;  %s2138_s20 = sshll.u32 %s3477_s13, 1 }
   0xd   : > { %3015 = vmatpush.bf16.msra.mxu3 %v2877_v0  ;;  %343 = vmatpush.bf16.msra.mxu0 %v2877_v0  ;;  %v2871_v6 = vld [vmem:[%s3473_s1 + $0x48] sm:$0xff]  ;;  %v2870_v7 = vld [vmem:[%s3473_s1 + $0x40] sm:$0xff]  ;;  %v2893_v8 = vld [vmem:[%s3473_s1 + $0xb8] sm:$0xff]  ;;  %s181_s23 = scalar_lea.vmem %s3475_s3, %s2138_s20 }
   0xe   : > { %s3116_s6 = scalar_lea.vmem %s3472_s0, %s3037_s28  ;;  %v2861_v9 = vld [vmem:[%s3473_s1 + $0x38] sm:$0xff]  ;;  %v2892_v16 = vld [vmem:[%s3473_s1 + $0xb0] sm:$0xff]  ;;  %v2891_v20 = vld [vmem:[%s3473_s1 + $0xa8] sm:$0xff] }
   0xf   : > { %v2864_v10 = vld [vmem:[%s3116_s6 + $0x58] sm:$0xff]  ;;  %v2866_v11 = vld [vmem:[%s3116_s6 + $0x68] sm:$0xff]  ;;  %v2860_v17 = vld [vmem:[%s3473_s1 + $0x30] sm:$0xff] }
  0x10   : > { %3016 = vmatpush.bf16.msra.mxu1 %v2876_v1  ;;  %3017 = vmatpush.bf16.msra.mxu2 %v2876_v1  ;;  %v2868_v12 = vld [vmem:[%s3116_s6 + $0x78] sm:$0xff]  ;;  %v2862_v13 = vld [vmem:[%s3116_s6 + $0x48] sm:$0xff]  ;;  %v2908_v18 = vld [vmem:[%s3473_s1 + $0xf0] sm:$0xff] }
  0x11   : > { %3018 = vmatpush.bf16.msra.mxu3 %v2876_v1  ;;  %344 = vmatpush.bf16.msra.mxu0 %v2876_v1  ;;  %v2909_v14 = vld [vmem:[%s3473_s1 + $0xf8] sm:$0xff]  ;;  %v2924_v19 = vld [vmem:[%s3473_s1 + $0x130] sm:$0xff]  ;;  %v2859_v21 = vld [vmem:[%s3473_s1 + $0x28] sm:$0xff] }
  0x12   : > { %v2925_v15 = vld [vmem:[%s3473_s1 + $0x138] sm:$0xff]  ;;  %v2907_v22 = vld [vmem:[%s3473_s1 + $0xe8] sm:$0xff]  ;;  %v2890_v24 = vld [vmem:[%s3473_s1 + $0xa0] sm:$0xff] }
  0x13   : > { %v2923_v23 = vld [vmem:[%s3473_s1 + $0x128] sm:$0xff]  ;;  %v2858_v25 = vld [vmem:[%s3473_s1 + $0x20] sm:$0xff]  ;;  %v2889_v28 = vld [vmem:[%s3473_s1 + $0x98] sm:$0xff] }
  0x14   : > { %3019 = vmatpush.bf16.msra.mxu1 %v2875_v2  ;;  %3020 = vmatpush.bf16.msra.mxu2 %v2875_v2  ;;  %v2906_v26 = vld [vmem:[%s3473_s1 + $0xe0] sm:$0xff]  ;;  %v2857_v29 = vld [vmem:[%s3473_s1 + $0x18] sm:$0xff]  ;;  %v2867_v31 = vld [vmem:[%s3116_s6 + $0x70] sm:$0xff] }
  0x15   : > { %3021 = vmatpush.bf16.msra.mxu3 %v2875_v2  ;;  %345 = vmatpush.bf16.msra.mxu0 %v2875_v2  ;;  %v2922_v27 = vld [vmem:[%s3473_s1 + $0x120] sm:$0xff]  ;;  %v2863_v33 = vld [vmem:[%s3116_s6 + $0x50] sm:$0xff]  ;;  %v2905_v35 = vld [vmem:[%s3473_s1 + $0xd8] sm:$0xff] }
  0x16   : > { %v2865_v30 = vld [vmem:[%s3116_s6 + $0x60] sm:$0xff]  ;;  %v2921_v36 = vld [vmem:[%s3473_s1 + $0x118] sm:$0xff]  ;;  %v2888_v37 = vld [vmem:[%s3473_s1 + $0x90] sm:$0xff] }
  0x17   : > { %v2869_v32 = vld [vmem:[%s3116_s6 + $0x80] sm:$0xff]  ;;  %v2856_v38 = vld [vmem:[%s3473_s1 + $0x10] sm:$0xff]  ;;  %v3194_v39 = vld [vmem:[%s3116_s6 + $0x8] sm:$0xff] }
  0x18   : > { %3022 = vmatpush.bf16.msra.mxu1 %v2874_v3  ;;  %3023 = vmatpush.bf16.msra.mxu2 %v2874_v3  ;;  %v2878_v34 = vld [vmem:[%s3116_s6] sm:$0xff]  ;;  %v2904_v41 = vld [vmem:[%s3473_s1 + $0xd0] sm:$0xff]  ;;  %v2887_v43 = vld [vmem:[%s3473_s1 + $0x88] sm:$0xff]  ;;  %v607_v47 = vshll.u32 %v3194_v39, 16 }
  0x19   : > { %3024 = vmatpush.bf16.msra.mxu3 %v2874_v3  ;;  %346 = vmatpush.bf16.msra.mxu0 %v2874_v3  ;;  %v602_v40 = vshll.u32 %v2878_v34, 16  ;;  %v2920_v42 = vld [vmem:[%s3473_s1 + $0x110] sm:$0xff]  ;;  %v2855_v44 = vld [vmem:[%s3473_s1 + $0x8] sm:$0xff]  ;;  %v600_v45 = vshrl.u32 %v2878_v34, 16  ;;  %v2886_v50 = vld [vmem:[%s3473_s1 + $0x80] sm:$0xff] }
  0x1a   : > { %v2903_v48 = vld [vmem:[%s3473_s1 + $0xc8] sm:$0xff]  ;;  %v2854_v51 = vld [vmem:[%s3473_s1] sm:$0xff]  ;;  %v2957_v52 = vld [vmem:[%s3473_s1 + $0x1b8] sm:$0xff]  ;;  %v609_v55 = vrot.slane %v607_v47, 1 }
  0x1b   : > { %v604_v46 = vrot.slane %v602_v40, 1  ;;  %v2919_v49 = vld [vmem:[%s3473_s1 + $0x108] sm:$0xff]  ;;  %v2941_v53 = vld [vmem:[%s3473_s1 + $0x178] sm:$0xff]  ;;  %v2902_v56 = vld [vmem:[%s3473_s1 + $0xc0] sm:$0xff] }
  0x1c   : > { %3025 = vmatpush.bf16.msra.mxu1 %v2873_v4  ;;  %3026 = vmatpush.bf16.msra.mxu2 %v2873_v4  ;;  %v2918_v57 = vld [vmem:[%s3473_s1 + $0x100] sm:$0xff]  ;;  %v2973_v58 = vld [vmem:[%s3473_s1 + $0x1f8] sm:$0xff]  ;;  %v2894_v62 = vld [vmem:[%s3116_s6 + $0x90] sm:$0xff] }
  0x1d   : > { %3027 = vmatpush.bf16.msra.mxu3 %v2873_v4  ;;  %347 = vmatpush.bf16.msra.mxu0 %v2873_v4  ;;  %v605_v54 = vor.u32 %v604_v46, %v600_v45  ;;  %v2989_v59 = vld [vmem:[%s3473_s1 + $0x238] sm:$0xff]  ;;  %v2846_v60 = vld [vmem:[%s3116_s6] sm:$0xff]  ;;  %v2956_v0 = vld [vmem:[%s3473_s1 + $0x1b0] sm:$0xff] }
  0x1e   : > { %v2910_v63 = vld [vmem:[%s3116_s6 + $0xd8] sm:$0xff]  ;;  %v2940_v1 = vld [vmem:[%s3473_s1 + $0x170] sm:$0xff] }
  0x1f   : > { %v610_v61 = vsel %vm598_vm0, %v605_v54, %v609_v55  ;;  %v2972_v2 = vld [vmem:[%s3473_s1 + $0x1f0] sm:$0xff]  ;;  %v2985_v34 = vld [vmem:[%s3473_s1 + $0x218] sm:$0xff] }
  0x20   : > { %3028 = vmatpush.bf16.msra.mxu1 %v2872_v5  ;;  %3029 = vmatpush.bf16.msra.mxu2 %v2872_v5  ;;  %v2988_v3 = vld [vmem:[%s3473_s1 + $0x230] sm:$0xff] }
  0x21   : > { %3030 = vmatpush.bf16.msra.mxu3 %v2872_v5  ;;  %348 = vmatpush.bf16.msra.mxu0 %v2872_v5  ;;  %v2880_v4 = vld [vmem:[%s3116_s6 + $0x10] sm:$0xff]  ;;  %v2955_v5 = vld [vmem:[%s3473_s1 + $0x1a8] sm:$0xff] }
  0x22   : > { %v2968_v45 = vld [vmem:[%s3473_s1 + $0x1d0] sm:$0xff] }
  0x23   : > { %v2936_v46 = vld [vmem:[%s3473_s1 + $0x150] sm:$0xff] }
  0x24   : > { %3031 = vmatpush.bf16.msra.mxu1 %v2871_v6  ;;  %3032 = vmatpush.bf16.msra.mxu2 %v2871_v6  ;;  %v2984_v47 = vld [vmem:[%s3473_s1 + $0x210] sm:$0xff] }
  0x25   : > { %3033 = vmatpush.bf16.msra.mxu3 %v2871_v6  ;;  %349 = vmatpush.bf16.msra.mxu0 %v2871_v6  ;;  %v2939_v6 = vld [vmem:[%s3473_s1 + $0x168] sm:$0xff]  ;;  %v2898_v54 = vld [vmem:[%s3116_s6 + $0xb0] sm:$0xff] }
  0x28   : > { %3034 = vmatpush.bf16.msra.mxu1 %v2870_v7  ;;  %3035 = vmatpush.bf16.msra.mxu2 %v2870_v7 }
  0x29   : > { %3036 = vmatpush.bf16.msra.mxu3 %v2870_v7  ;;  %350 = vmatpush.bf16.msra.mxu0 %v2870_v7  ;;  %v2971_v7 = vld [vmem:[%s3473_s1 + $0x1e8] sm:$0xff] }
  0x2b   : > { %359 = vmatmul.bf16.vlgmr.msra.gmra.mxu1 %v2864_v10  ;;  %367 = vmatmul.bf16.vlgmr.msra.gmra.mxu2 %v2866_v11  ;;  %v615_v10 = vshll.u32 %v2880_v4, 16 }
  0x2c   : > { %723 = vmatpush.bf16.msrb.mxu2 %v2893_v8  ;;  %480 = vmatpush.bf16.msrb.mxu1 %v2861_v9  ;;  %v2987_v8 = vld [vmem:[%s3473_s1 + $0x228] sm:$0xff]  ;;  %v611_v9 = vshrl.u32 %v3194_v39, 16  ;;  %v2849_v39 = vld [vmem:[%s3116_s6 + $0x18] sm:$0xff] }
  0x2d   : > { %375 = vmatmul.bf16.vlgmr.msra.gmra.mxu3 %v2868_v12  ;;  %351 = vmatmul.bf16.vlgmr.msra.gmra.mxu0 %v2862_v13  ;;  %v617_v12 = vrot.slane %v615_v10, 1  ;;  %v2847_v13 = vld [vmem:[%s3116_s6 + $0x8] sm:$0xff] }
  0x2e   : > { %901 = vmatpush.bf16.msrb.mxu3 %v2909_v14  ;;  %1079 = vmatpush.bf16.msrb.mxu0 %v2925_v15  ;;  %v613_v11 = vor.u32 %v611_v9, %v609_v55  ;;  %v2895_v15 = vld [vmem:[%s3116_s6 + $0x98] sm:$0xff] }
  0x2f   : > { %v2914_v55 = vld [vmem:[%s3116_s6 + $0xf8] sm:$0xff] }
  0x30   : > { %724 = vmatpush.bf16.msrb.mxu2 %v2892_v16  ;;  %481 = vmatpush.bf16.msrb.mxu1 %v2860_v17  ;;  %v618_v14 = vsel %vm598_vm0, %v613_v11, %v617_v12  ;;  %v2911_v16 = vld [vmem:[%s3116_s6 + $0xe0] sm:$0xff]  ;;  %v2881_v17 = vld [vmem:[%s3116_s6 + $0x18] sm:$0xff] }
  0x31   : > { %v2982_v11 = vld [vmem:[%s3473_s1 + $0x200] sm:$0xff] }
  0x32   : > { %902 = vmatpush.bf16.msrb.mxu3 %v2908_v18  ;;  %1080 = vmatpush.bf16.msrb.mxu0 %v2924_v19  ;;  %v2954_v18 = vld [vmem:[%s3473_s1 + $0x1a0] sm:$0xff] }
  0x33   : > { %v2970_v19 = vld [vmem:[%s3473_s1 + $0x1e0] sm:$0xff] }
  0x34   : > { %725 = vmatpush.bf16.msrb.mxu2 %v2891_v20  ;;  %482 = vmatpush.bf16.msrb.mxu1 %v2859_v21  ;;  %v2938_v20 = vld [vmem:[%s3473_s1 + $0x160] sm:$0xff] }
  0x35   : > { %v2986_v21 = vld [vmem:[%s3473_s1 + $0x220] sm:$0xff] }
  0x36   : > { %903 = vmatpush.bf16.msrb.mxu3 %v2907_v22  ;;  %1081 = vmatpush.bf16.msrb.mxu0 %v2923_v23  ;;  %v619_v22 = vshrl.u32 %v2880_v4, 16  ;;  %v623_v23 = vshll.u32 %v2881_v17, 16  ;;  %v2915_v4 = vld [vmem:[%s3116_s6 + $0x100] sm:$0xff] }
  0x38   : > { %726 = vmatpush.bf16.msrb.mxu2 %v2890_v24  ;;  %483 = vmatpush.bf16.msrb.mxu1 %v2858_v25  ;;  %v621_v24 = vor.u32 %v619_v22, %v617_v12  ;;  %v625_v25 = vrot.slane %v623_v23, 1 }
  0x3a   : > { %904 = vmatpush.bf16.msrb.mxu3 %v2906_v26  ;;  %1082 = vmatpush.bf16.msrb.mxu0 %v2922_v27  ;;  %v2848_v26 = vld [vmem:[%s3116_s6 + $0x10] sm:$0xff]  ;;  %v626_v27 = vsel %vm598_vm0, %v621_v24, %v625_v25 }
  0x3b   : > { %363 = vmatmul.bf16.gmra.mxu1 %v2865_v30  ;;  %371 = vmatmul.bf16.gmra.mxu2 %v2867_v31  ;;  %v2882_v30 = vld [vmem:[%s3116_s6 + $0x20] sm:$0xff]  ;;  %v2953_v31 = vld [vmem:[%s3473_s1 + $0x198] sm:$0xff] }
  0x3c   : > { %727 = vmatpush.bf16.msrb.mxu2 %v2889_v28  ;;  %484 = vmatpush.bf16.msrb.mxu1 %v2857_v29  ;;  %v2896_v28 = vld [vmem:[%s3116_s6 + $0xa0] sm:$0xff]  ;;  %v2912_v29 = vld [vmem:[%s3116_s6 + $0xe8] sm:$0xff] }
  0x3d   : > { %379 = vmatmul.bf16.gmra.mxu3 %v2869_v32  ;;  %355 = vmatmul.bf16.gmra.mxu0 %v2863_v33  ;;  %v2969_v32 = vld [vmem:[%s3473_s1 + $0x1d8] sm:$0xff] }
  0x3e   : > { %905 = vmatpush.bf16.msrb.mxu3 %v2905_v35  ;;  %1083 = vmatpush.bf16.msrb.mxu0 %v2921_v36  ;;  %v2937_v33 = vld [vmem:[%s3473_s1 + $0x158] sm:$0xff]  ;;  %v627_v35 = vshrl.u32 %v2881_v17, 16  ;;  %v631_v36 = vshll.u32 %v2882_v30, 16 }
  0x40   : > { %728 = vmatpush.bf16.msrb.mxu2 %v2888_v37  ;;  %485 = vmatpush.bf16.msrb.mxu1 %v2856_v38  ;;  %v629_v37 = vor.u32 %v627_v35, %v625_v25  ;;  %v633_v38 = vrot.slane %v631_v36, 1  ;;  %v2901_v36 = vld [vmem:[%s3116_s6 + $0xc8] sm:$0xff] }
  0x42   : > { %906 = vmatpush.bf16.msrb.mxu3 %v2904_v41  ;;  %1084 = vmatpush.bf16.msrb.mxu0 %v2920_v42  ;;  %v634_v40 = vsel %vm598_vm0, %v629_v37, %v633_v38  ;;  %v2897_v41 = vld [vmem:[%s3116_s6 + $0xa8] sm:$0xff]  ;;  %v2913_v42 = vld [vmem:[%s3116_s6 + $0xf0] sm:$0xff] }
  0x43   : > { %v2917_v37 = vld [vmem:[%s3116_s6 + $0x110] sm:$0xff] }
  0x44   : > { %729 = vmatpush.bf16.msrb.mxu2 %v2887_v43  ;;  %486 = vmatpush.bf16.msrb.mxu1 %v2855_v44  ;;  %v2883_v43 = vld [vmem:[%s3116_s6 + $0x28] sm:$0xff]  ;;  %v2952_v44 = vld [vmem:[%s3473_s1 + $0x190] sm:$0xff] }
  0x46   : > { %907 = vmatpush.bf16.msrb.mxu3 %v2903_v48  ;;  %1085 = vmatpush.bf16.msrb.mxu0 %v2919_v49  ;;  %v635_v48 = vshrl.u32 %v2882_v30, 16  ;;  %v639_v49 = vshll.u32 %v2883_v43, 16 }
  0x48   : > { %730 = vmatpush.bf16.msrb.mxu2 %v2886_v50  ;;  %487 = vmatpush.bf16.msrb.mxu1 %v2854_v51  ;;  %v637_v50 = vor.u32 %v635_v48, %v633_v38  ;;  %v641_v51 = vrot.slane %v639_v49, 1  ;;  %v2926_v38 = vld [vmem:[%s3116_s6 + $0x90] sm:$0xff] }
  0x49   : > { %v1206_v48 = vshrl.u32 %v2926_v38, 16 }
  0x4a   : > { %908 = vmatpush.bf16.msrb.mxu3 %v2902_v56  ;;  %1086 = vmatpush.bf16.msrb.mxu0 %v2918_v57  ;;  %v2884_v56 = vld [vmem:[%s3116_s6 + $0x30] sm:$0xff]  ;;  %v2951_v57 = vld [vmem:[%s3473_s1 + $0x188] sm:$0xff] }
  0x4b   : > { %488 = vmatmul.bf16.vlgmr.msrb.gmra.mxu1 %v2846_v60  ;;  %731 = vmatmul.bf16.vlgmr.msrb.gmra.mxu2 %v610_v61  ;;  %v643_v60 = vshrl.u32 %v2883_v43, 16  ;;  %v647_v61 = vshll.u32 %v2884_v56, 16  ;;  %v651_v9 = vshrl.u32 %v2884_v56, 16  ;;  %v2975_v43 = vld [vmem:[%s3116_s6 + $0x10] sm:$0xff] }
  0x4c   : > { %1507 = vmatpush.bf16.msra.mxu2 %v2957_v52  ;;  %1329 = vmatpush.bf16.msra.mxu1 %v2941_v53  ;;  %v2850_v52 = vld [vmem:[%s3116_s6 + $0x20] sm:$0xff]  ;;  %v642_v53 = vsel %vm598_vm0, %v637_v50, %v641_v51 }
  0x4d   : > { %909 = vmatmul.bf16.vlgmr.msrb.gmra.mxu3 %v2894_v62  ;;  %1087 = vmatmul.bf16.vlgmr.msrb.gmra.mxu0 %v2910_v63  ;;  %v2983_v62 = vld [vmem:[%s3473_s1 + $0x208] sm:$0xff]  ;;  %v645_v63 = vor.u32 %v643_v60, %v641_v51 }
  0x4e   : > { %1685 = vmatpush.bf16.msra.mxu3 %v2973_v58  ;;  %1935 = vmatpush.bf16.msra.mxu0 %v2989_v59  ;;  %v2967_v58 = vld [vmem:[%s3473_s1 + $0x1c8] sm:$0xff] }
  0x4f   : > { %v2935_v59 = vld [vmem:[%s3473_s1 + $0x148] sm:$0xff] }
  0x50   : > { %1508 = vmatpush.bf16.msra.mxu2 %v2956_v0  ;;  %1330 = vmatpush.bf16.msra.mxu1 %v2940_v1  ;;  %v649_v0 = vrot.slane %v647_v61, 1  ;;  %v2851_v1 = vld [vmem:[%s3116_s6 + $0x28] sm:$0xff] }
  0x51   : > { %v2942_v61 = vld [vmem:[%s3116_s6 + $0x8] sm:$0xff] }
  0x52   : > { %1686 = vmatpush.bf16.msra.mxu3 %v2972_v2  ;;  %1936 = vmatpush.bf16.msra.mxu0 %v2988_v3  ;;  %v650_v2 = vsel %vm598_vm0, %v645_v63, %v649_v0  ;;  %v2899_v3 = vld [vmem:[%s3116_s6 + $0xb8] sm:$0xff]  ;;  %v653_v12 = vor.u32 %v651_v9, %v649_v0  ;;  %v2958_v0 = vld [vmem:[%s3116_s6 + $0x50] sm:$0xff] }
  0x54   : > { %1509 = vmatpush.bf16.msra.mxu2 %v2955_v5  ;;  %1331 = vmatpush.bf16.msra.mxu1 %v2939_v6  ;;  %v2885_v5 = vld [vmem:[%s3116_s6 + $0x38] sm:$0xff]  ;;  %v2950_v6 = vld [vmem:[%s3473_s1 + $0x180] sm:$0xff] }
  0x55   : > { %v655_v10 = vshll.u32 %v2885_v5, 16 }
  0x56   : > { %1687 = vmatpush.bf16.msra.mxu3 %v2971_v7  ;;  %1937 = vmatpush.bf16.msra.mxu0 %v2987_v8  ;;  %v2966_v7 = vld [vmem:[%s3473_s1 + $0x1c0] sm:$0xff] }
  0x57   : > { %v2934_v8 = vld [vmem:[%s3473_s1 + $0x140] sm:$0xff] }
  0x58   : > { %1510 = vmatpush.bf16.msra.mxu2 %v2954_v18  ;;  %1332 = vmatpush.bf16.msra.mxu1 %v2938_v20  ;;  %v2900_v18 = vld [vmem:[%s3116_s6 + $0xc0] sm:$0xff] }
  0x5a   : > { %1688 = vmatpush.bf16.msra.mxu3 %v2970_v19  ;;  %1938 = vmatpush.bf16.msra.mxu0 %v2986_v21  ;;  %v2916_v19 = vld [vmem:[%s3116_s6 + $0x108] sm:$0xff] }
  0x5b   : > { %492 = vmatmul.bf16.gmra.mxu1 %v2847_v13  ;;  %735 = vmatmul.bf16.gmra.mxu2 %v618_v14  ;;  %v657_v13 = vrot.slane %v655_v10, 1  ;;  %v537_v14 = vld [vmem:[%s3116_s6 + $0x40] sm:$0x1] }
  0x5c   : > { %1511 = vmatpush.bf16.msra.mxu2 %v2953_v31  ;;  %1333 = vmatpush.bf16.msra.mxu1 %v2937_v33  ;;  %v588_v20 = vunpack.c.l.b16 %v537_v14  ;;  %v2853_v33 = vld [vmem:[%s3116_s6 + $0x38] sm:$0xff]  ;;  %v1823_v14 = vshrl.u32 %v2975_v43, 16 }
  0x5d   : > { %913 = vmatmul.bf16.gmra.mxu3 %v2895_v15  ;;  %1091 = vmatmul.bf16.gmra.mxu0 %v2911_v16  ;;  %v2852_v15 = vld [vmem:[%s3116_s6 + $0x30] sm:$0xff]  ;;  %v658_v17 = vsel %vm598_vm0, %v653_v12, %v657_v13 }
  0x5e   : > { %1689 = vmatpush.bf16.msra.mxu3 %v2969_v32  ;;  %1939 = vmatpush.bf16.msra.mxu0 %v2985_v34  ;;  %v597_v22 = vpack.c.b16 %v588_v20, %v588_v20 }
  0x60   : > { %1512 = vmatpush.bf16.msra.mxu2 %v2952_v44  ;;  %1334 = vmatpush.bf16.msra.mxu1 %v2936_v46 }
  0x62   : > { %1690 = vmatpush.bf16.msra.mxu3 %v2968_v45  ;;  %1940 = vmatpush.bf16.msra.mxu0 %v2984_v47 }
  0x64   : > { %1513 = vmatpush.bf16.msra.mxu2 %v2951_v57  ;;  %1335 = vmatpush.bf16.msra.mxu1 %v2935_v59 }
  0x66   : > { %1691 = vmatpush.bf16.msra.mxu3 %v2967_v58  ;;  %1941 = vmatpush.bf16.msra.mxu0 %v2983_v62 }
  0x68   : > { %1514 = vmatpush.bf16.msra.mxu2 %v2950_v6  ;;  %1336 = vmatpush.bf16.msra.mxu1 %v2934_v8 }
  0x6a   : > { %1692 = vmatpush.bf16.msra.mxu3 %v2966_v7  ;;  %1942 = vmatpush.bf16.msra.mxu0 %v2982_v11 }
  0x6b   : > { %496 = vmatmul.bf16.gmra.mxu1 %v2848_v26  ;;  %739 = vmatmul.bf16.gmra.mxu2 %v626_v27  ;;  %v659_v26 = vshrl.u32 %v2885_v5, 16  ;;  %v663_v27 = vshll.u32 %v597_v22, 16  ;;  %v2976_v5 = vld [vmem:[%s3116_s6 + $0x18] sm:$0xff] }
  0x6d   : > { %917 = vmatmul.bf16.gmra.mxu3 %v2896_v28  ;;  %1095 = vmatmul.bf16.gmra.mxu0 %v2912_v29  ;;  %v661_v29 = vor.u32 %v659_v26, %v657_v13  ;;  %v665_v30 = vrot.slane %v663_v27, 1  ;;  %v2943_v26 = vld [vmem:[%s3116_s6 + $0x10] sm:$0xff] }
  0x6f   : > { %v666_v35 = vsel %vm598_vm0, %v661_v29, %v665_v30  ;;  %v2959_v29 = vld [vmem:[%s3116_s6 + $0x58] sm:$0xff] }
  0x7b   : > { %500 = vmatmul.bf16.gmra.mxu1 %v2849_v39  ;;  %743 = vmatmul.bf16.gmra.mxu2 %v634_v40  ;;  %v2974_v40 = vld [vmem:[%s3116_s6 + $0x8] sm:$0xff] }
  0x7c   : > { %v1814_v44 = vshll.u32 %v2974_v40, 16 }
  0x7d   : > { %921 = vmatmul.bf16.gmra.mxu3 %v2897_v41  ;;  %1099 = vmatmul.bf16.gmra.mxu0 %v2913_v42  ;;  %v2927_v41 = vld [vmem:[%s3116_s6 + $0x98] sm:$0xff]  ;;  %v1208_v42 = vshll.u32 %v2926_v38, 16 }
  0x7e   : > { %v1213_v50 = vshll.u32 %v2927_v41, 16  ;;  %v1217_v10 = vshrl.u32 %v2927_v41, 16 }
  0x7f   : > { %v1210_v49 = vrot.slane %v1208_v42, 1 }
  0x80   : > { %v1215_v56 = vrot.slane %v1213_v50, 1 }
  0x8b   : > { %504 = vmatmul.bf16.gmra.mxu1 %v2850_v52  ;;  %747 = vmatmul.bf16.gmra.mxu2 %v642_v53  ;;  %v1812_v52 = vshrl.u32 %v2974_v40, 16  ;;  %v1816_v53 = vrot.slane %v1814_v44, 1 }
  0x8d   : > { %925 = vmatmul.bf16.gmra.mxu3 %v2898_v54  ;;  %1103 = vmatmul.bf16.gmra.mxu0 %v2914_v55  ;;  %v1819_v54 = vshll.u32 %v2975_v43, 16  ;;  %v1211_v55 = vor.u32 %v1210_v49, %v1206_v48  ;;  %v1817_v57 = vor.u32 %v1816_v53, %v1812_v52 }
  0x8f   : > { %v1821_v58 = vrot.slane %v1819_v54, 1  ;;  %v1216_v63 = vsel %vm598_vm0, %v1211_v55, %v1215_v56  ;;  %v2944_v55 = vld [vmem:[%s3116_s6 + $0x18] sm:$0xff] }
  0x91   : > { %v1825_v20 = vor.u32 %v1823_v14, %v1821_v58 }
  0x9b   : > { %508 = vmatmul.bf16.gmra.mxu1 %v2851_v1  ;;  %751 = vmatmul.bf16.gmra.mxu2 %v650_v2 }
  0x9d   : > { %929 = vmatmul.bf16.gmra.mxu3 %v2899_v3  ;;  %1107 = vmatmul.bf16.gmra.mxu0 %v2915_v4  ;;  %v1822_v3 = vsel %vm598_vm0, %v1817_v57, %v1821_v58  ;;  %v2928_v4 = vld [vmem:[%s3116_s6 + $0xa0] sm:$0xff] }
  0x9e   : > { %v1221_v11 = vshll.u32 %v2928_v4, 16  ;;  %v1225_v41 = vshrl.u32 %v2928_v4, 16  ;;  %v2960_v58 = vld [vmem:[%s3116_s6 + $0x60] sm:$0xff] }
  0xa8   : > { %v3356_v16 = vpop.f32.mrf.mxu1 }
  0xaa   : > { %v352_v21 = vpop.f32.mrf.mxu0 }
  0xab   : > { %512 = vmatmul.bf16.gmra.mxu1 %v2852_v15  ;;  %755 = vmatmul.bf16.gmra.mxu2 %v658_v17  ;;  %v1827_v15 = vshll.u32 %v2976_v5, 16 }
  0xad   : > { %933 = vmatmul.bf16.gmra.mxu3 %v2900_v18  ;;  %1111 = vmatmul.bf16.gmra.mxu0 %v2916_v19  ;;  %v1219_v18 = vor.u32 %v1217_v10, %v1215_v56  ;;  %v1223_v19 = vrot.slane %v1221_v11, 1 }
  0xae   : > { %v3361_v23 = vpop.f32.mrf.mxu2 }
  0xaf   : > { %v1227_v49 = vor.u32 %v1225_v41, %v1223_v19 }
  0xb0   : > { %v3363_v24 = vpop.f32.mrf.mxu3  ;;  %v362_v25 = vpop.f32.mrf.mxu1 }
  0xb2   : > { %v354_v28 = vpop.f32.mrf.mxu0 }
  0xb3   : > { %v1224_v28 = vsel %vm598_vm0, %v1219_v18, %v1223_v19  ;;  %v2945_v18 = vld [vmem:[%s3116_s6 + $0x20] sm:$0xff] }
  0xb6   : > { %v370_v31 = vpop.f32.mrf.mxu2 }
  0xb8   : > { %v378_v32 = vpop.f32.mrf.mxu3  ;;  %v3366_v34 = vpop.f32.mrf.mxu1 }
  0xba   : > { %v356_v39 = vpop.f32.mrf.mxu0 }
  0xbb   : > { %516 = vmatmul.bf16.gmra.mxu1 %v2853_v33  ;;  %759 = vmatmul.bf16.gmra.mxu2 %v666_v35  ;;  %v2929_v33 = vld [vmem:[%s3116_s6 + $0xa8] sm:$0xff]  ;;  %v2977_v35 = vld [vmem:[%s3116_s6 + $0x20] sm:$0xff] }
  0xbc   : > { %v1229_v42 = vshll.u32 %v2929_v33, 16  ;;  %v1233_v4 = vshrl.u32 %v2929_v33, 16 }
  0xbd   : > { %937 = vmatmul.bf16.gmra.mxu3 %v2901_v36  ;;  %1115 = vmatmul.bf16.gmra.mxu0 %v2917_v37 }
  0xbe   : > { %v3375_v45 = vpop.f32.mrf.mxu2  ;;  %v1231_v50 = vrot.slane %v1229_v42, 1 }
  0xc0   : > { %v3377_v46 = vpop.f32.mrf.mxu3  ;;  %v366_v47 = vpop.f32.mrf.mxu1  ;;  %v1232_v57 = vsel %vm598_vm0, %v1227_v49, %v1231_v50  ;;  %v1235_v10 = vor.u32 %v1233_v4, %v1231_v50  ;;  %v2946_v49 = vld [vmem:[%s3116_s6 + $0x28] sm:$0xff] }
  0xc1   : > { %v1835_v47 = vshll.u32 %v2977_v35, 16 }
  0xc2   : > { %v358_v51 = vpop.f32.mrf.mxu0 }
  0xc3   : > { %v1837_v52 = vrot.slane %v1835_v47, 1 }
  0xc6   : > { %v374_v59 = vpop.f32.mrf.mxu2 }
  0xc8   : > { %v382_v60 = vpop.f32.mrf.mxu3  ;;  %v489_v62 = vpop.f32.mrf.mxu1 }
  0xc9   : > { %v490_v1 = vadd.f32 %v489_v62, %v352_v21  ;;  %v1829_v21 = vrot.slane %v1827_v15, 1  ;;  %v2930_v62 = vld [vmem:[%s3116_s6 + $0xb0] sm:$0xff] }
  0xca   : > { %v1088_v2 = vpop.f32.mrf.mxu0  ;;  %v1241_v33 = vshrl.u32 %v2930_v62, 16 }
  0xcb   : > { %1337 = vmatmul.bf16.vlgmr.msra.gmra.mxu1 %v1216_v63  ;;  %1515 = vmatmul.bf16.vlgmr.msra.gmra.mxu2 %v2942_v61  ;;  %v1830_v32 = vsel %vm598_vm0, %v1825_v20, %v1829_v21  ;;  %v2978_v63 = vld [vmem:[%s3116_s6 + $0x28] sm:$0xff] }
  0xcd   : > { %1693 = vmatmul.bf16.vlgmr.msra.gmra.mxu3 %v2958_v0  ;;  %1943 = vmatmul.bf16.vlgmr.msra.gmra.mxu0 %v1822_v3 }
  0xce   : > { %v732_v6 = vpop.f32.mrf.mxu2 }
  0xcf   : > { %v764_v7 = vadd.f32 %v732_v6, %v490_v1 }
  0xd0   : > { %v910_v8 = vpop.f32.mrf.mxu3  ;;  %v491_v9 = vpop.f32.mrf.mxu1 }
  0xd1   : > { %v942_v12 = vadd.f32 %v910_v8, %v764_v7  ;;  %v1843_v8 = vshll.u32 %v2978_v63, 16 }
  0xd2   : > { %v1090_v13 = vpop.f32.mrf.mxu0 }
  0xd3   : > { %v3385_v17 = vadd.f32 %v1088_v2, %v942_v12  ;;  %v1845_v13 = vrot.slane %v1843_v8, 1 }
  0xd6   : > { %v734_v22 = vpop.f32.mrf.mxu2 }
  0xd8   : > { %v912_v25 = vpop.f32.mrf.mxu3  ;;  %v493_v27 = vpop.f32.mrf.mxu1 }
  0xd9   : > { %v494_v30 = vadd.f32 %v493_v27, %v356_v39  ;;  %v1831_v39 = vshrl.u32 %v2976_v5, 16  ;;  %v1237_v5 = vshll.u32 %v2930_v62, 16  ;;  %v2931_v27 = vld [vmem:[%s3116_s6 + $0xb8] sm:$0xff] }
  0xda   : > { %v1092_v31 = vpop.f32.mrf.mxu0  ;;  %v1249_v62 = vshrl.u32 %v2931_v27, 16 }
  0xdb   : > { %1341 = vmatmul.bf16.gmra.mxu1 %v1224_v28  ;;  %1519 = vmatmul.bf16.gmra.mxu2 %v2943_v26  ;;  %v1833_v51 = vor.u32 %v1831_v39, %v1829_v21  ;;  %v1239_v11 = vrot.slane %v1237_v5, 1  ;;  %v2961_v21 = vld [vmem:[%s3116_s6 + $0x68] sm:$0xff]  ;;  %v2979_v28 = vld [vmem:[%s3116_s6 + $0x30] sm:$0xff] }
  0xdd   : > { %1697 = vmatmul.bf16.gmra.mxu3 %v2959_v29  ;;  %1947 = vmatmul.bf16.gmra.mxu0 %v1830_v32  ;;  %v1838_v61 = vsel %vm598_vm0, %v1833_v51, %v1837_v52  ;;  %v1240_v20 = vsel %vm598_vm0, %v1235_v10, %v1239_v11  ;;  %v1243_v41 = vor.u32 %v1241_v33, %v1239_v11  ;;  %v2947_v10 = vld [vmem:[%s3116_s6 + $0x30] sm:$0xff] }
  0xde   : > { %v736_v36 = vpop.f32.mrf.mxu2 }
  0xdf   : > { %v765_v37 = vadd.f32 %v736_v36, %v494_v30 }
  0xe0   : > { %v914_v38 = vpop.f32.mrf.mxu3  ;;  %v495_v40 = vpop.f32.mrf.mxu1 }
  0xe1   : > { %v943_v43 = vadd.f32 %v914_v38, %v765_v37  ;;  %v1851_v38 = vshll.u32 %v2979_v28, 16 }
  0xe2   : > { %v1094_v44 = vpop.f32.mrf.mxu0 }
  0xe3   : > { %v3393_v48 = vadd.f32 %v1092_v31, %v943_v43  ;;  %v1853_v44 = vrot.slane %v1851_v38, 1 }
  0xe6   : > { %v738_v53 = vpop.f32.mrf.mxu2 }
  0xe8   : > { %v916_v54 = vpop.f32.mrf.mxu3  ;;  %v497_v56 = vpop.f32.mrf.mxu1 }
  0xe9   : > { %v498_v59 = vadd.f32 %v497_v56, %v3356_v16  ;;  %v1839_v16 = vshrl.u32 %v2977_v35, 16  ;;  %v1245_v35 = vshll.u32 %v2931_v27, 16 }
  0xea   : > { %v1096_v60 = vpop.f32.mrf.mxu0 }
  0xeb   : > { %1345 = vmatmul.bf16.gmra.mxu1 %v1232_v57  ;;  %1523 = vmatmul.bf16.gmra.mxu2 %v2944_v55  ;;  %v1841_v12 = vor.u32 %v1839_v16, %v1837_v52  ;;  %v1247_v42 = vrot.slane %v1245_v35, 1  ;;  %v2962_v52 = vld [vmem:[%s3116_s6 + $0x70] sm:$0xff]  ;;  %v2932_v55 = vld [vmem:[%s3116_s6 + $0xc0] sm:$0xff]  ;;  %v2980_v57 = vld [vmem:[%s3116_s6 + $0x38] sm:$0xff] }
  0xec   : > { %v1257_v27 = vshrl.u32 %v2932_v55, 16 }
  0xed   : > { %1701 = vmatmul.bf16.gmra.mxu3 %v2960_v58  ;;  %1951 = vmatmul.bf16.gmra.mxu0 %v1838_v61  ;;  %v1846_v26 = vsel %vm598_vm0, %v1841_v12, %v1845_v13  ;;  %v1248_v51 = vsel %vm598_vm0, %v1243_v41, %v1247_v42  ;;  %v1251_v5 = vor.u32 %v1249_v62, %v1247_v42  ;;  %v1750_v41 = vld [vmem:[%s3116_s6 + $0x48] sm:$0x1] }
  0xee   : > { %v740_v0 = vpop.f32.mrf.mxu2 }
  0xef   : > { %v766_v1 = vadd.f32 %v740_v0, %v498_v59 }
  0xf0   : > { %v918_v2 = vpop.f32.mrf.mxu3  ;;  %v499_v3 = vpop.f32.mrf.mxu1 }
  0xf1   : > { %v944_v6 = vadd.f32 %v918_v2, %v766_v1  ;;  %v1855_v2 = vshrl.u32 %v2979_v28, 16  ;;  %v1859_v3 = vshll.u32 %v2980_v57, 16 }
  0xf2   : > { %v1098_v7 = vpop.f32.mrf.mxu0 }
  0xf3   : > { %v3402_v9 = vadd.f32 %v1096_v60, %v944_v6  ;;  %v1857_v7 = vor.u32 %v1855_v2, %v1853_v44 }
  0xf6   : > { %v742_v14 = vpop.f32.mrf.mxu2 }
  0xf8   : > { %v920_v15 = vpop.f32.mrf.mxu3  ;;  %v501_v19 = vpop.f32.mrf.mxu1 }
  0xf9   : > { %v502_v22 = vadd.f32 %v501_v19, %v3366_v34  ;;  %v1847_v34 = vshrl.u32 %v2978_v63, 16  ;;  %v1253_v63 = vshll.u32 %v2932_v55, 16 }
  0xfa   : > { %v1100_v25 = vpop.f32.mrf.mxu0 }
  0xfb   : > { %1349 = vmatmul.bf16.gmra.mxu1 %v1240_v20  ;;  %1527 = vmatmul.bf16.gmra.mxu2 %v2945_v18  ;;  %v1849_v43 = vor.u32 %v1847_v34, %v1845_v13  ;;  %v1255_v6 = vrot.slane %v1253_v63, 1  ;;  %v2963_v13 = vld [vmem:[%s3116_s6 + $0x78] sm:$0xff]  ;;  %v2933_v18 = vld [vmem:[%s3116_s6 + $0xc8] sm:$0xff]  ;;  %v2981_v20 = vld [vmem:[%s3116_s6 + $0x40] sm:$0xff] }
  0xfc   : > { %v1261_v28 = vshll.u32 %v2933_v18, 16  ;;  %v1144_v34 = vld [vmem:[%s3116_s6 + $0xd0] sm:$0x1] }
  0xfd   : > { %1705 = vmatmul.bf16.gmra.mxu3 %v2961_v21  ;;  %1955 = vmatmul.bf16.gmra.mxu0 %v1846_v26  ;;  %v1854_v54 = vsel %vm598_vm0, %v1849_v43, %v1853_v44  ;;  %v1256_v12 = vsel %vm598_vm0, %v1251_v5, %v1255_v6  ;;  %v1259_v35 = vor.u32 %v1257_v27, %v1255_v6  ;;  %v2948_v43 = vld [vmem:[%s3116_s6 + $0x38] sm:$0xff] }
  0xfe   : > { %v744_v29 = vpop.f32.mrf.mxu2 }
  0xff   : > { %v767_v30 = vadd.f32 %v744_v29, %v502_v22 }
 0x100   : > { %v922_v31 = vpop.f32.mrf.mxu3  ;;  %v503_v32 = vpop.f32.mrf.mxu1 }
 0x101   : > { %v945_v36 = vadd.f32 %v922_v31, %v767_v30  ;;  %v1863_v31 = vshrl.u32 %v2980_v57, 16  ;;  %v1867_v32 = vshll.u32 %v2981_v20, 16 }
 0x102   : > { %v1102_v37 = vpop.f32.mrf.mxu0 }
 0x103   : > { %v3411_v40 = vadd.f32 %v1100_v25, %v945_v36  ;;  %v1263_v36 = vrot.slane %v1261_v28, 1  ;;  %v1869_v37 = vrot.slane %v1867_v32, 1 }
 0x106   : > { %v746_v39 = vpop.f32.mrf.mxu2 }
 0x107   : > { %v1264_v39 = vsel %vm598_vm0, %v1259_v35, %v1263_v36 }
 0x108   : > { %v924_v47 = vpop.f32.mrf.mxu3  ;;  %v505_v50 = vpop.f32.mrf.mxu1 }
 0x109   : > { %v506_v56 = vadd.f32 %v505_v50, %v3361_v23  ;;  %v1861_v23 = vrot.slane %v1859_v3, 1  ;;  %v2964_v47 = vld [vmem:[%s3116_s6 + $0x80] sm:$0xff] }
 0x10a   : > { %v1104_v53 = vpop.f32.mrf.mxu0 }
 0x10b   : > { %1353 = vmatmul.bf16.gmra.mxu1 %v1248_v51  ;;  %1531 = vmatmul.bf16.gmra.mxu2 %v2946_v49  ;;  %v1862_v15 = vsel %vm598_vm0, %v1857_v7, %v1861_v23  ;;  %v1195_v49 = vunpack.c.l.b16 %v1144_v34 }
 0x10d   : > { %1709 = vmatmul.bf16.gmra.mxu3 %v2962_v52  ;;  %1959 = vmatmul.bf16.gmra.mxu0 %v1854_v54  ;;  %v1801_v52 = vunpack.c.l.b16 %v1750_v41 }
 0x10e   : > { %v748_v58 = vpop.f32.mrf.mxu2 }
 0x10f   : > { %v768_v59 = vadd.f32 %v748_v58, %v506_v56  ;;  %v1810_v55 = vpack.c.b16 %v1801_v52, %v1801_v52 }
 0x110   : > { %v926_v60 = vpop.f32.mrf.mxu3  ;;  %v507_v61 = vpop.f32.mrf.mxu1 }
 0x111   : > { %v946_v0 = vadd.f32 %v926_v60, %v768_v59  ;;  %v1265_v60 = vshrl.u32 %v2933_v18, 16 }
 0x112   : > { %v1106_v1 = vpop.f32.mrf.mxu0 }
 0x113   : > { %v3420_v4 = vadd.f32 %v1104_v53, %v946_v0  ;;  %v1204_v53 = vpack.c.b16 %v1195_v49, %v1195_v49  ;;  %v1871_v0 = vshrl.u32 %v2981_v20, 16  ;;  %v1875_v1 = vshll.u32 %v1810_v55, 16 }
 0x114   : > { %v1267_v3 = vor.u32 %v1265_v60, %v1263_v36 }
 0x115   : > { %v1269_v61 = vshll.u32 %v1204_v53, 16  ;;  %v1873_v6 = vor.u32 %v1871_v0, %v1869_v37  ;;  %v1877_v7 = vrot.slane %v1875_v1, 1 }
 0x116   : > { %v750_v16 = vpop.f32.mrf.mxu2 }
 0x117   : > { %v1271_v5 = vrot.slane %v1269_v61, 1  ;;  %v2949_v16 = vld [vmem:[%s3116_s6 + $0x40] sm:$0xff] }
 0x118   : > { %v928_v8 = vpop.f32.mrf.mxu3  ;;  %v509_v11 = vpop.f32.mrf.mxu1 }
 0x119   : > { %v510_v19 = vadd.f32 %v509_v11, %v3375_v45  ;;  %v1865_v45 = vor.u32 %v1863_v31, %v1861_v23  ;;  %v2965_v11 = vld [vmem:[%s3116_s6 + $0x88] sm:$0xff]  ;;  %s2845_s6 = sshll.u32 %s3477_s13, 5 }
 0x11a   : > { %v1108_v14 = vpop.f32.mrf.mxu0  ;;  %s3453_s19 = scalar_lea.vmem %s3474_s2, %s2845_s6 }
 0x11b   : > { %1357 = vmatmul.bf16.gmra.mxu1 %v1256_v12  ;;  %1535 = vmatmul.bf16.gmra.mxu2 %v2947_v10  ;;  %v1870_v51 = vsel %vm598_vm0, %v1865_v45, %v1869_v37  ;;  %v1272_v10 = vsel %vm598_vm0, %v1267_v3, %v1271_v5 }
 0x11d   : > { %1713 = vmatmul.bf16.gmra.mxu3 %v2963_v13  ;;  %1963 = vmatmul.bf16.gmra.mxu0 %v1862_v15  ;;  %v1878_v13 = vsel %vm598_vm0, %v1873_v6, %v1877_v7 }
 0x11e   : > { %v752_v21 = vpop.f32.mrf.mxu2 }
 0x11f   : > { %v769_v22 = vadd.f32 %v752_v21, %v510_v19 }
 0x120   : > { %v930_v25 = vpop.f32.mrf.mxu3  ;;  %v511_v26 = vpop.f32.mrf.mxu1 }
 0x121   : > { %v947_v29 = vadd.f32 %v930_v25, %v769_v22 }
 0x122   : > { %v1110_v30 = vpop.f32.mrf.mxu0 }
 0x123   : > { %v3429_v33 = vadd.f32 %v1108_v14, %v947_v29 }
 0x126   : > { %v754_v38 = vpop.f32.mrf.mxu2 }
 0x128   : > { %v932_v42 = vpop.f32.mrf.mxu3  ;;  %v513_v44 = vpop.f32.mrf.mxu1 }
 0x129   : > { %v514_v54 = vadd.f32 %v513_v44, %v3363_v24 }
 0x12a   : > { %v1112_v50 = vpop.f32.mrf.mxu0 }
 0x12b   : > { %1361 = vmatmul.bf16.gmra.mxu1 %v1264_v39  ;;  %1539 = vmatmul.bf16.gmra.mxu2 %v2948_v43 }
 0x12d   : > { %1717 = vmatmul.bf16.gmra.mxu3 %v2964_v47  ;;  %1967 = vmatmul.bf16.gmra.mxu0 %v1870_v51 }
 0x12e   : > { %v756_v56 = vpop.f32.mrf.mxu2 }
 0x12f   : > { %v770_v57 = vadd.f32 %v756_v56, %v514_v54 }
 0x130   : > { %v934_v58 = vpop.f32.mrf.mxu3  ;;  %v515_v59 = vpop.f32.mrf.mxu1 }
 0x131   : > { %v948_v62 = vadd.f32 %v934_v58, %v770_v57 }
 0x132   : > { %v1114_v63 = vpop.f32.mrf.mxu0 }
 0x133   : > { %v3438_v2 = vadd.f32 %v1112_v50, %v948_v62 }
 0x136   : > { %v758_v24 = vpop.f32.mrf.mxu2 }
 0x138   : > { %v936_v23 = vpop.f32.mrf.mxu3  ;;  %v517_v8 = vpop.f32.mrf.mxu1 }
 0x139   : > { %v518_v14 = vadd.f32 %v517_v8, %v3377_v46 }
 0x13a   : > { %v1116_v12 = vpop.f32.mrf.mxu0 }
 0x13b   : > { %1365 = vmatmul.bf16.gmra.mxu1 %v1272_v10  ;;  %1543 = vmatmul.bf16.gmra.mxu2 %v2949_v16 }
 0x13d   : > { %1721 = vmatmul.bf16.gmra.mxu3 %v2965_v11  ;;  %1971 = vmatmul.bf16.gmra.mxu0 %v1878_v13 }
 0x13e   : > { %v760_v15 = vpop.f32.mrf.mxu2 }
 0x13f   : > { %v771_v18 = vadd.f32 %v760_v15, %v518_v14 }
 0x140   : > { %v938_v19 = vpop.f32.mrf.mxu3  ;;  %v519_v20 = vpop.f32.mrf.mxu1 }
 0x141   : > { %v949_v21 = vadd.f32 %v938_v19, %v771_v18 }
 0x142   : > { %v1118_v22 = vpop.f32.mrf.mxu0 }
 0x143   : > { %v3445_v25 = vadd.f32 %v1116_v12, %v949_v21 }
 0x146   : > { %v762_v26 = vpop.f32.mrf.mxu2 }
 0x148   : > { %v940_v27 = vpop.f32.mrf.mxu3  ;;  %v1338_v28 = vpop.f32.mrf.mxu1 }
 0x149   : > { %v1370_v36 = vadd.f32 %v1338_v28, %v3385_v17 }
 0x14a   : > { %v1944_v29 = vpop.f32.mrf.mxu0 }
 0x14e   : > { %v1516_v30 = vpop.f32.mrf.mxu2 }
 0x14f   : > { %v1548_v46 = vadd.f32 %v1516_v30, %v1370_v36 }
 0x150   : > { %v1694_v31 = vpop.f32.mrf.mxu3  ;;  %v1340_v32 = vpop.f32.mrf.mxu1 }
 0x151   : > { %v1726_v38 = vadd.f32 %v1694_v31, %v1548_v46 }
 0x152   : > { %v1946_v35 = vpop.f32.mrf.mxu0 }
 0x153   : > { %v1976_v42 = vadd.f32 %v1944_v29, %v1726_v38 }
 0x155   : > { %v1984_v50 = vpack.c.bf16 %v1976_v42, %v1976_v42 }
 0x156   : > { %v1518_v45 = vpop.f32.mrf.mxu2 }
 0x157   : > { %v2000_v17 = vunpack.c.l.bf16 %v1984_v50 }
 0x158   : > { %v1696_v37 = vpop.f32.mrf.mxu3  ;;  %v1342_v34 = vpop.f32.mrf.mxu1 }
 0x159   : > { %v1371_v43 = vadd.f32 %v1342_v34, %v3393_v48  ;;  %v2022_v59 = vmul.f32 %v2000_v17, %v2000_v17 }
 0x15a   : > { %v1948_v41 = vpop.f32.mrf.mxu0 }
 0x15e   : > { %v1520_v44 = vpop.f32.mrf.mxu2 }
 0x15f   : > { %v1549_v39 = vadd.f32 %v1520_v44, %v1371_v43 }
 0x160   : > { %v1698_v47 = vpop.f32.mrf.mxu3  ;;  %v1344_v49 = vpop.f32.mrf.mxu1 }
 0x161   : > { %v1727_v51 = vadd.f32 %v1698_v47, %v1549_v39 }
 0x162   : > { %v1950_v52 = vpop.f32.mrf.mxu0 }
 0x163   : > { %v1977_v53 = vadd.f32 %v1948_v41, %v1727_v51 }
 0x165   : > { %v1985_v54 = vpack.c.bf16 %v1977_v53, %v1977_v53  ;;  %v2993_v55 = vpack.c.bf16 %v1977_v53, %v1976_v42 }
 0x166   : > { %v1522_v56 = vpop.f32.mrf.mxu2 }
 0x167   : > { %2994 = vst [vmem:[%s3453_s19] sm:$0xff] %v2993_v55   ;;  %v2001_v48 = vunpack.c.l.bf16 %v1985_v54 }
 0x168   : > { %v1700_v57 = vpop.f32.mrf.mxu3  ;;  %v1346_v58 = vpop.f32.mrf.mxu1 }
 0x169   : > { %v2008_v60 = vadd.f32 %v2001_v48, %v2000_v17  ;;  %v2023_v61 = vmul.f32 %v2001_v48, %v2001_v48  ;;  %v1372_v0 = vadd.f32 %v1346_v58, %v3402_v9 }
 0x16a   : > { %v1952_v62 = vpop.f32.mrf.mxu0 }
 0x16b   : > { %v2030_v63 = vadd.f32 %v2023_v61, %v2022_v59 }
 0x16e   : > { %v1524_v1 = vpop.f32.mrf.mxu2 }
 0x16f   : > { %v1550_v3 = vadd.f32 %v1524_v1, %v1372_v0 }
 0x170   : > { %v1702_v5 = vpop.f32.mrf.mxu3  ;;  %v1348_v6 = vpop.f32.mrf.mxu1 }
 0x171   : > { %v1728_v7 = vadd.f32 %v1702_v5, %v1550_v3 }
 0x172   : > { %v1954_v24 = vpop.f32.mrf.mxu0 }
 0x173   : > { %v1978_v23 = vadd.f32 %v1952_v62, %v1728_v7 }
 0x175   : > { %v1986_v16 = vpack.c.bf16 %v1978_v23, %v1978_v23 }
 0x176   : > { %v1526_v8 = vpop.f32.mrf.mxu2 }
 0x177   : > { %v2002_v10 = vunpack.c.l.bf16 %v1986_v16 }
 0x178   : > { %v1704_v11 = vpop.f32.mrf.mxu3  ;;  %v1350_v12 = vpop.f32.mrf.mxu1 }
 0x179   : > { %v2009_v13 = vadd.f32 %v2008_v60, %v2002_v10  ;;  %v2024_v14 = vmul.f32 %v2002_v10, %v2002_v10  ;;  %v1373_v19 = vadd.f32 %v1350_v12, %v3411_v40 }
 0x17a   : > { %v1956_v15 = vpop.f32.mrf.mxu0 }
 0x17b   : > { %v2031_v18 = vadd.f32 %v2030_v63, %v2024_v14 }
 0x17e   : > { %v1528_v9 = vpop.f32.mrf.mxu2 }
 0x17f   : > { %v1551_v20 = vadd.f32 %v1528_v9, %v1373_v19 }
 0x180   : > { %v1706_v21 = vpop.f32.mrf.mxu3  ;;  %v1352_v22 = vpop.f32.mrf.mxu1 }
 0x181   : > { %v1729_v26 = vadd.f32 %v1706_v21, %v1551_v20 }
 0x182   : > { %v1958_v27 = vpop.f32.mrf.mxu0 }
 0x183   : > { %v1979_v28 = vadd.f32 %v1956_v15, %v1729_v26 }
 0x185   : > { %v1987_v29 = vpack.c.bf16 %v1979_v28, %v1979_v28  ;;  %v2998_v30 = vpack.c.bf16 %v1979_v28, %v1978_v23 }
 0x186   : > { %v1530_v31 = vpop.f32.mrf.mxu2 }
 0x187   : > { %3010 = vst [vmem:[%s3453_s19 + $0x8] sm:$0xff] %v2998_v30   ;;  %v2003_v32 = vunpack.c.l.bf16 %v1987_v29 }
 0x188   : > { %v1708_v35 = vpop.f32.mrf.mxu3  ;;  %v1354_v36 = vpop.f32.mrf.mxu1 }
 0x189   : > { %v2010_v46 = vadd.f32 %v2009_v13, %v2003_v32  ;;  %v2025_v45 = vmul.f32 %v2003_v32, %v2003_v32  ;;  %v1374_v40 = vadd.f32 %v1354_v36, %v3420_v4 }
 0x18a   : > { %v1960_v37 = vpop.f32.mrf.mxu0 }
 0x18b   : > { %v2032_v34 = vadd.f32 %v2031_v18, %v2025_v45 }
 0x18e   : > { %v1532_v38 = vpop.f32.mrf.mxu2 }
 0x18f   : > { %v1552_v41 = vadd.f32 %v1532_v38, %v1374_v40 }
 0x190   : > { %v1710_v42 = vpop.f32.mrf.mxu3  ;;  %v1356_v43 = vpop.f32.mrf.mxu1 }
 0x191   : > { %v1730_v44 = vadd.f32 %v1710_v42, %v1552_v41 }
 0x192   : > { %v1962_v39 = vpop.f32.mrf.mxu0 }
 0x193   : > { %v1980_v47 = vadd.f32 %v1960_v37, %v1730_v44 }
 0x195   : > { %v1988_v49 = vpack.c.bf16 %v1980_v47, %v1980_v47 }
 0x196   : > { %v1534_v50 = vpop.f32.mrf.mxu2 }
 0x197   : > { %v2004_v51 = vunpack.c.l.bf16 %v1988_v49 }
 0x198   : > { %v1712_v52 = vpop.f32.mrf.mxu3  ;;  %v1358_v53 = vpop.f32.mrf.mxu1 }
 0x199   : > { %v2011_v17 = vadd.f32 %v2010_v46, %v2004_v51  ;;  %v2026_v54 = vmul.f32 %v2004_v51, %v2004_v51  ;;  %v1375_v48 = vadd.f32 %v1358_v53, %v3429_v33 }
 0x19a   : > { %v1964_v55 = vpop.f32.mrf.mxu0 }
 0x19b   : > { %v2033_v56 = vadd.f32 %v2032_v34, %v2026_v54 }
 0x19e   : > { %v1536_v4 = vpop.f32.mrf.mxu2 }
 0x19f   : > { %v1553_v57 = vadd.f32 %v1536_v4, %v1375_v48 }
 0x1a0   : > { %v1714_v58 = vpop.f32.mrf.mxu3  ;;  %v1360_v59 = vpop.f32.mrf.mxu1 }
 0x1a1   : > { %v1731_v60 = vadd.f32 %v1714_v58, %v1553_v57 }
 0x1a2   : > { %v1966_v61 = vpop.f32.mrf.mxu0 }
 0x1a3   : > { %v1981_v62 = vadd.f32 %v1964_v55, %v1731_v60 }
 0x1a5   : > { %v1989_v63 = vpack.c.bf16 %v1981_v62, %v1981_v62  ;;  %v3003_v0 = vpack.c.bf16 %v1981_v62, %v1980_v47 }
 0x1a6   : > { %v1538_v1 = vpop.f32.mrf.mxu2 }
 0x1a7   : > { %3011 = vst [vmem:[%s3453_s19 + $0x10] sm:$0xff] %v3003_v0   ;;  %v2005_v3 = vunpack.c.l.bf16 %v1989_v63 }
 0x1a8   : > { %v1716_v5 = vpop.f32.mrf.mxu3  ;;  %v1362_v6 = vpop.f32.mrf.mxu1 }
 0x1a9   : > { %v2012_v7 = vadd.f32 %v2011_v17, %v2005_v3  ;;  %v2027_v24 = vmul.f32 %v2005_v3, %v2005_v3  ;;  %v1376_v33 = vadd.f32 %v1362_v6, %v3438_v2 }
 0x1aa   : > { %v1968_v23 = vpop.f32.mrf.mxu0 }
 0x1ab   : > { %v2034_v16 = vadd.f32 %v2033_v56, %v2027_v24 }
 0x1ae   : > { %v1540_v8 = vpop.f32.mrf.mxu2 }
 0x1af   : > { %v1554_v10 = vadd.f32 %v1540_v8, %v1376_v33 }
 0x1b0   : > { %v1718_v11 = vpop.f32.mrf.mxu3  ;;  %v1364_v12 = vpop.f32.mrf.mxu1 }
 0x1b1   : > { %v1732_v13 = vadd.f32 %v1718_v11, %v1554_v10 }
 0x1b2   : > { %v1970_v14 = vpop.f32.mrf.mxu0 }
 0x1b3   : > { %v1982_v15 = vadd.f32 %v1968_v23, %v1732_v13 }
 0x1b5   : > { %v1990_v18 = vpack.c.bf16 %v1982_v15, %v1982_v15 }
 0x1b6   : > { %v1542_v19 = vpop.f32.mrf.mxu2 }
 0x1b7   : > { %v2006_v9 = vunpack.c.l.bf16 %v1990_v18 }
 0x1b8   : > { %v1720_v20 = vpop.f32.mrf.mxu3  ;;  %v1366_v21 = vpop.f32.mrf.mxu1 }
 0x1b9   : > { %v2013_v22 = vadd.f32 %v2012_v7, %v2006_v9  ;;  %v2028_v26 = vmul.f32 %v2006_v9, %v2006_v9  ;;  %v1377_v29 = vadd.f32 %v1366_v21, %v3445_v25 }
 0x1ba   : > { %v1972_v27 = vpop.f32.mrf.mxu0 }
 0x1bb   : > { %v2035_v28 = vadd.f32 %v2034_v16, %v2028_v26 }
 0x1be   : > { %v1544_v2 = vpop.f32.mrf.mxu2 }
 0x1bf   : > { %v1555_v30 = vadd.f32 %v1544_v2, %v1377_v29 }
 0x1c0   : > { %v1722_v31 = vpop.f32.mrf.mxu3  ;;  %v1368_v32 = vpop.f32.mrf.mxu1 }
 0x1c1   : > { %v1733_v35 = vadd.f32 %v1722_v31, %v1555_v30 }
 0x1c2   : > { %v1974_v36 = vpop.f32.mrf.mxu0 }
 0x1c3   : > { %v1983_v46 = vadd.f32 %v1972_v27, %v1733_v35 }
 0x1c5   : > { %v1991_v45 = vpack.c.bf16 %v1983_v46, %v1983_v46  ;;  %v3008_v37 = vpack.c.bf16 %v1983_v46, %v1982_v15 }
 0x1c6   : > { %v1546_v34 = vpop.f32.mrf.mxu2 }
 0x1c7   : > { %3012 = vst [vmem:[%s3453_s19 + $0x18] sm:$0xff] %v3008_v37   ;;  %v2007_v40 = vunpack.c.l.bf16 %v1991_v45 }
 0x1c8   : > { %v1724_v38 = vpop.f32.mrf.mxu3 }
 0x1c9   : > { %v2014_v41 = vadd.f32 %v2013_v22, %v2007_v40  ;;  %v2029_v42 = vmul.f32 %v2007_v40, %v2007_v40 }
 0x1cb   : > { %v2015_v43 = vrot.slane %v2014_v41, 4  ;;  %v2036_v44 = vadd.f32 %v2035_v28, %v2029_v42 }
 0x1cd   : > { %v2016_v39 = vadd.f32 %v2015_v43, %v2014_v41  ;;  %v2037_v25 = vrot.slane %v2036_v44, 4 }
 0x1cf   : > { %v2017_v47 = vrot.slane %v2016_v39, 2  ;;  %v2038_v49 = vadd.f32 %v2037_v25, %v2036_v44 }
 0x1d1   : > { %v2018_v50 = vadd.f32 %v2017_v47, %v2016_v39  ;;  %v2039_v51 = vrot.slane %v2038_v49, 2 }
 0x1d3   : > { %v2019_v52 = vrot.slane %v2018_v50, 1  ;;  %v2040_v53 = vadd.f32 %v2039_v51, %v2038_v49 }
 0x1d5   : > { %v2020_v17 = vadd.f32 %v2019_v52, %v2018_v50  ;;  %v2041_v54 = vrot.slane %v2040_v53, 1 }
 0x1d7   : > { %2021 = vst [vmem:[%s181_s23] sm:$0x1] %v2020_v17  ;;  %v2042_v55 = vadd.f32 %v2041_v54, %v2040_v53 }
 0x1d9   : > { %2043 = vst [vmem:[%s181_s23 + $0x1] sm:$0x1] %v2042_v55 }
 0x1da PF: > { %s14_s12 = sadd.s32 1, %s3052_s12  }
 0x1db   : > { %p11_p4 = scmp.ge.s32.totalorder %s14_s12, 4  }
 0x1dd   :  { %13 = sbr.rel (!%p11_p4) target bundleno = 1 (0x1), region = 78 }

// kernel: basic_block_forward.7
= control target key start
LH: loop header
LB: loop body
LE: loop exit
PB: predicated region body
PF: predicated region fallthrough
CT: control target
= control target key end

     0   :  { %s2762_s12 = smov 0   ;;  %s3252_s0 = inlined_call_operand.vmem [shape: bf16[2,176,128], index: 0, kind: input, shape index: {}]   ;;  %s3253_s1 = inlined_call_operand.vmem [shape: bf16[9,128,128], index: 1, kind: input, shape index: {}]   ;;  %s3254_s2 = inlined_call_operand.vmem [shape: bf16[2,8,8,128], index: 2, kind: output, shape index: {0}]   ;;  %s3255_s3 = inlined_call_operand.vmem [shape: f32[2,2,128], index: 3, kind: output, shape index: {1}]  }
   0x1 LB: > { %s1970_s13 = sadd.s32 4294967295, %s2740_s12   ;;  %p1974_p0 = scmp.ge.s32.totalorder %s2740_s12, 1  ;;  %s2740_s12 = sphi %s2762_s12, %s14_s12  }
   0x2   : > { %p140_p1 = scmp.lt.s32.totalorder %s2740_s12, 3 }
   0x4   : > { %p141_p2 = pnand %p1974_p0, %p140_p1 }
   0x5   : > { %p168_p3 = scmp.lt.s32.totalorder (!%p141_p2), %s1970_s13, 1 }
   0x6   : > { %144 = sbr.rel (%p141_p2) target bundleno = 474 (0x1da), region = 28 }
   0xb   : > { %v2568_v0 = vld [vmem:[%s3253_s1 + $0x78] sm:$0xff]  ;;  %v2567_v1 = vld [vmem:[%s3253_s1 + $0x70] sm:$0xff]  ;;  %s3257_s13 = smov (!%p168_p3, %s1970_s13), 1  ;;  %v2566_v2 = vld [vmem:[%s3253_s1 + $0x68] sm:$0xff]  ;;  %vm275_vm0 = vsmask.f32 7424 }
   0xc   : > { %2701 = vmatpush.bf16.msra.mxu1 %v2568_v0  ;;  %2702 = vmatpush.bf16.msra.mxu2 %v2568_v0  ;;  %s2725_s20 = smul.u32 88, %s3257_s13  ;;  %v2565_v3 = vld [vmem:[%s3253_s1 + $0x60] sm:$0xff]  ;;  %v2564_v4 = vld [vmem:[%s3253_s1 + $0x58] sm:$0xff]  ;;  %v2563_v11 = vld [vmem:[%s3253_s1 + $0x50] sm:$0xff]  ;;  %vm559_vm1 = vcmask 1046528  }
   0xd   : > { %2703 = vmatpush.bf16.msra.mxu3 %v2568_v0  ;;  %400 = vmatpush.bf16.msra.mxu0 %v2568_v0  ;;  %v2562_v22 = vld [vmem:[%s3253_s1 + $0x48] sm:$0xff]  ;;  %v2561_v31 = vld [vmem:[%s3253_s1 + $0x40] sm:$0xff]  ;;  %v2576_v40 = vld [vmem:[%s3253_s1 + $0xb8] sm:$0xff] }
   0xe   : > { %s2788_s25 = scalar_lea.vmem %s3252_s0, %s2725_s20  ;;  %v2560_v41 = vld [vmem:[%s3253_s1 + $0x38] sm:$0xff]  ;;  %v2575_v50 = vld [vmem:[%s3253_s1 + $0xb0] sm:$0xff]  ;;  %v2574_v55 = vld [vmem:[%s3253_s1 + $0xa8] sm:$0xff]  ;;  %s1978_s20 = sshll.u32 %s3257_s13, 1 }
   0xf   : > { %v2794_v5 = vld [vmem:[%s2788_s25 + $0x10] sm:$0xff]  ;;  %v2797_v6 = vld [vmem:[%s2788_s25 + $0x20] sm:$0xff]  ;;  %v2806_v9 = vld [vmem:[%s2788_s25 + $0x18] sm:$0xff]  ;;  %s181_s23 = scalar_lea.vmem %s3255_s3, %s1978_s20 }
  0x10   : > { %2704 = vmatpush.bf16.msra.mxu1 %v2567_v1  ;;  %2705 = vmatpush.bf16.msra.mxu2 %v2567_v1  ;;  %v2800_v7 = vld [vmem:[%s2788_s25 + $0x30] sm:$0xff]  ;;  %v2803_v8 = vld [vmem:[%s2788_s25] sm:$0xff]   ;;  %v2809_v10 = vld [vmem:[%s2788_s25 + $0x28] sm:$0xff]  ;;  %v292_v12 = vshll.u32 %v2794_v5, 16  ;;  %v308_v13 = vshll.u32 %v2797_v6, 16  ;;  %v296_v18 = vshrl.u32 %v2794_v5, 16 }
  0x11   : > { %2706 = vmatpush.bf16.msra.mxu3 %v2567_v1  ;;  %401 = vmatpush.bf16.msra.mxu0 %v2567_v1  ;;  %v2817_v14 = vld [vmem:[%s2788_s25 + $0x38] sm:$0xff]  ;;  %v324_v15 = vshll.u32 %v2800_v7, 16  ;;  %v2821_v16 = vld [vmem:[%s2788_s25 + $0x8] sm:$0xff]  ;;  %v279_v17 = vshll.u32 %v2803_v8, 16  ;;  %v300_v19 = vshll.u32 %v2806_v9, 16  ;;  %v312_v20 = vshrl.u32 %v2797_v6, 16 }
  0x12   : > { %v316_v21 = vshll.u32 %v2809_v10, 16  ;;  %v2831_v23 = vrot.slane %v292_v12, 1  ;;  %v2833_v24 = vrot.slane %v308_v13, 1  ;;  %v328_v25 = vshrl.u32 %v2800_v7, 16  ;;  %v214_v42 = vld [vmem:[%s2788_s25 + $0x40] sm:$0x1] }
  0x13   : > { %v332_v26 = vshll.u32 %v2817_v14, 16  ;;  %v2837_v27 = vrot.slane %v324_v15, 1  ;;  %v277_v28 = vshrl.u32 %v2803_v8, 16  ;;  %v281_v29 = vrot.slane %v279_v17, 1  ;;  %v2592_v46 = vld [vmem:[%s3253_s1 + $0xf8] sm:$0xff]  ;;  %v2559_v51 = vld [vmem:[%s3253_s1 + $0x30] sm:$0xff] }
  0x14   : > { %2707 = vmatpush.bf16.msra.mxu1 %v2566_v2  ;;  %2708 = vmatpush.bf16.msra.mxu2 %v2566_v2  ;;  %v284_v30 = vshll.u32 %v2821_v16, 16  ;;  %v298_v32 = vor.u32 %v296_v18, %v2831_v23  ;;  %v302_v33 = vrot.slane %v300_v19, 1  ;;  %v314_v34 = vor.u32 %v312_v20, %v2833_v24  ;;  %v2607_v48 = vld [vmem:[%s3253_s1 + $0x138] sm:$0xff]  ;;  %v2591_v52 = vld [vmem:[%s3253_s1 + $0xf0] sm:$0xff]  ;;  %v2558_v56 = vld [vmem:[%s3253_s1 + $0x28] sm:$0xff] }
  0x15   : > { %2709 = vmatpush.bf16.msra.mxu3 %v2566_v2  ;;  %402 = vmatpush.bf16.msra.mxu0 %v2566_v2  ;;  %v318_v35 = vrot.slane %v316_v21, 1  ;;  %v330_v36 = vor.u32 %v328_v25, %v2837_v27  ;;  %v334_v37 = vrot.slane %v332_v26, 1  ;;  %v282_v38 = vor.u32 %v281_v29, %v277_v28  ;;  %v2606_v53 = vld [vmem:[%s3253_s1 + $0x130] sm:$0xff]  ;;  %v2590_v59 = vld [vmem:[%s3253_s1 + $0xe8] sm:$0xff]  ;;  %v2573_v0 = vld [vmem:[%s3253_s1 + $0xa0] sm:$0xff] }
  0x16   : > { %v286_v39 = vrot.slane %v284_v30, 1  ;;  %v303_v43 = vsel %vm275_vm0, %v298_v32, %v302_v33  ;;  %v265_v49 = vunpack.c.l.b16 %v214_v42  ;;  %v304_v57 = vshrl.u32 %v2806_v9, 16  ;;  %v2605_v60 = vld [vmem:[%s3253_s1 + $0x128] sm:$0xff]  ;;  %v2557_v1 = vld [vmem:[%s3253_s1 + $0x20] sm:$0xff]  ;;  %v2572_v17 = vld [vmem:[%s3253_s1 + $0x98] sm:$0xff] }
  0x17   : > { %v319_v44 = vsel %vm275_vm0, %v314_v34, %v318_v35  ;;  %v335_v45 = vsel %vm275_vm0, %v330_v36, %v334_v37  ;;  %v320_v58 = vshrl.u32 %v2809_v10, 16  ;;  %v336_v61 = vshrl.u32 %v2817_v14, 16  ;;  %v2556_v18 = vld [vmem:[%s3253_s1 + $0x18] sm:$0xff]  ;;  %v2571_v26 = vld [vmem:[%s3253_s1 + $0x90] sm:$0xff]  ;;  %v2690_v28 = vld [vmem:[%s2788_s25 + $0x8] sm:$0xff]  }
  0x18   : > { %2710 = vmatpush.bf16.msra.mxu1 %v2565_v3  ;;  %2711 = vmatpush.bf16.msra.mxu2 %v2565_v3  ;;  %v287_v47 = vsel %vm275_vm0, %v282_v38, %v286_v39  ;;  %v2876_v54 = vpack.c.b16 %v265_v49, %v265_v49  ;;  %v288_v63 = vshrl.u32 %v2821_v16, 16  ;;  %v306_v2 = vor.u32 %v304_v57, %v302_v33  ;;  %v2602_v29 = vld [vmem:[%s3253_s1 + $0x110] sm:$0xff]  ;;  %v2687_v30 = vld [vmem:[%s2788_s25] sm:$0xf0]  ;;  %v2570_v34 = vld [vmem:[%s3253_s1 + $0x88] sm:$0xff] }
  0x19   : > { %2712 = vmatpush.bf16.msra.mxu3 %v2565_v3  ;;  %403 = vmatpush.bf16.msra.mxu0 %v2565_v3  ;;  %v322_v3 = vor.u32 %v320_v58, %v318_v35  ;;  %v338_v12 = vor.u32 %v336_v61, %v334_v37  ;;  %v2942_v32 = vld [vmem:[%s2788_s25 + $0x10] sm:$0xff]  ;;  %v940_v33 = vshll.u32 %v2690_v28, 16  ;;  %v2554_v35 = vld [vmem:[%s3253_s1 + $0x8] sm:$0xff]  ;;  %v2569_v42 = vld [vmem:[%s3253_s1 + $0x80] sm:$0xff] }
  0x1a   : > { %v340_v62 = vshll.u32 %v2876_v54, 16  ;;  %v290_v15 = vor.u32 %v288_v63, %v286_v39  ;;  %v311_v19 = vsel %vm275_vm0, %v306_v2, %v2833_v24  ;;  %v2603_v24 = vld [vmem:[%s3253_s1 + $0x118] sm:$0xff]  ;;  %v2586_v37 = vld [vmem:[%s3253_s1 + $0xc8] sm:$0xff]  ;;  %v938_v39 = vshrl.u32 %v2690_v28, 16  ;;  %v2600_v49 = vld [vmem:[%s3253_s1 + $0x100] sm:$0xff] }
  0x1b   : > { %v327_v20 = vsel %vm275_vm0, %v322_v3, %v2837_v27  ;;  %v2555_v27 = vld [vmem:[%s3253_s1 + $0x10] sm:$0xff]  ;;  %v2601_v38 = vld [vmem:[%s3253_s1 + $0x108] sm:$0xff]  ;;  %v949_v2 = vshrl.u32 %v2942_v32, 16 }
  0x1c   : > { %2713 = vmatpush.bf16.msra.mxu1 %v2564_v4  ;;  %2714 = vmatpush.bf16.msra.mxu2 %v2564_v4  ;;  %v342_v13 = vrot.slane %v340_v62, 1  ;;  %v295_v25 = vsel %vm275_vm0, %v290_v15, %v2831_v23  ;;  %v2587_v23 = vld [vmem:[%s3253_s1 + $0xd0] sm:$0xff]  ;;  %v2999_v62 = vld [vmem:[%s2788_s25 + $0x18] sm:$0xff]  ;;  %v2629_v63 = vld [vmem:[%s3253_s1 + $0x1a8] sm:$0xff] }
  0x1d   : > { %2715 = vmatpush.bf16.msra.mxu3 %v2564_v4  ;;  %404 = vmatpush.bf16.msra.mxu0 %v2564_v4  ;;  %v2589_v4 = vld [vmem:[%s3253_s1 + $0xe0] sm:$0xff]  ;;  %v2630_v58 = vld [vmem:[%s3253_s1 + $0x1b0] sm:$0xff]  ;;  %v953_v3 = vshll.u32 %v2999_v62, 16 }
  0x1e   : > { %v343_v21 = vsel %vm275_vm0, %v338_v12, %v342_v13  ;;  %v2653_v61 = vld [vmem:[%s3253_s1 + $0x230] sm:$0xff] }
  0x1f   : > { %v955_v12 = vrot.slane %v953_v3, 1  ;;  %v2578_v15 = vld [vmem:[%s2788_s25 + $0x10] sm:$0xff] }
  0x20   : > { %2716 = vmatpush.bf16.msra.mxu1 %v2563_v11  ;;  %2717 = vmatpush.bf16.msra.mxu2 %v2563_v11 }
  0x21   : > { %2718 = vmatpush.bf16.msra.mxu3 %v2563_v11  ;;  %405 = vmatpush.bf16.msra.mxu0 %v2563_v11  ;;  %v2604_v11 = vld [vmem:[%s3253_s1 + $0x120] sm:$0xff] }
  0x24   : > { %2719 = vmatpush.bf16.msra.mxu1 %v2562_v22  ;;  %2720 = vmatpush.bf16.msra.mxu2 %v2562_v22 }
  0x25   : > { %2721 = vmatpush.bf16.msra.mxu3 %v2562_v22  ;;  %406 = vmatpush.bf16.msra.mxu0 %v2562_v22  ;;  %v2588_v22 = vld [vmem:[%s3253_s1 + $0xd8] sm:$0xff] }
  0x28   : > { %2722 = vmatpush.bf16.msra.mxu1 %v2561_v31  ;;  %2723 = vmatpush.bf16.msra.mxu2 %v2561_v31 }
  0x29   : > { %2724 = vmatpush.bf16.msra.mxu3 %v2561_v31  ;;  %407 = vmatpush.bf16.msra.mxu0 %v2561_v31  ;;  %v2688_v31 = vld [vmem:[%s2788_s25] sm:$0xe] }
  0x2a   : > { %v2689_v36 = vor.u32 %v2688_v31, %v2687_v30  ;;  %v2627_v30 = vld [vmem:[%s3253_s1 + $0x198] sm:$0xff] }
  0x2b   : > { %416 = vmatmul.bf16.vlgmr.msra.gmra.mxu1 %v303_v43  ;;  %424 = vmatmul.bf16.vlgmr.msra.gmra.mxu2 %v319_v44  ;;  %v2553_v43 = vld [vmem:[%s3253_s1] sm:$0xff]  ;;  %v2631_v44 = vld [vmem:[%s3253_s1 + $0x1b8] sm:$0xff] }
  0x2c   : > { %633 = vmatpush.bf16.msrb.mxu2 %v2576_v40  ;;  %497 = vmatpush.bf16.msrb.mxu1 %v2560_v41  ;;  %v942_v40 = vrot.slane %v940_v33, 1  ;;  %v945_v41 = vshll.u32 %v2942_v32, 16  ;;  %v2642_v31 = vld [vmem:[%s3253_s1 + $0x1d8] sm:$0xff] }
  0x2d   : > { %432 = vmatmul.bf16.vlgmr.msra.gmra.mxu3 %v335_v45  ;;  %408 = vmatmul.bf16.vlgmr.msra.gmra.mxu0 %v287_v47  ;;  %v2615_v45 = vld [vmem:[%s3253_s1 + $0x178] sm:$0xff]  ;;  %v561_v47 = vrot.slane %v2821_v16, 1 }
  0x2e   : > { %811 = vmatpush.bf16.msrb.mxu3 %v2592_v46  ;;  %1061 = vmatpush.bf16.msrb.mxu0 %v2607_v48  ;;  %v560_v46 = vrot.slane %v2689_v36, 1  ;;  %v2585_v48 = vld [vmem:[%s3253_s1 + $0xc0] sm:$0xff]  ;;  %v2611_v33 = vld [vmem:[%s3253_s1 + $0x158] sm:$0xff] }
  0x30   : > { %634 = vmatpush.bf16.msrb.mxu2 %v2575_v50  ;;  %498 = vmatpush.bf16.msrb.mxu1 %v2559_v51  ;;  %v943_v50 = vor.u32 %v942_v40, %v938_v39  ;;  %v947_v51 = vrot.slane %v945_v41, 1  ;;  %v2580_v41 = vld [vmem:[%s2788_s25 + $0x20] sm:$0xff] }
  0x32   : > { %812 = vmatpush.bf16.msrb.mxu3 %v2591_v52  ;;  %1062 = vmatpush.bf16.msrb.mxu0 %v2606_v53  ;;  %v2646_v52 = vld [vmem:[%s3253_s1 + $0x1f8] sm:$0xff]  ;;  %v948_v57 = vsel %vm275_vm0, %v943_v50, %v947_v51 }
  0x33   : > { %v2654_v53 = vld [vmem:[%s3253_s1 + $0x238] sm:$0xff] }
  0x34   : > { %635 = vmatpush.bf16.msrb.mxu2 %v2574_v55  ;;  %499 = vmatpush.bf16.msrb.mxu1 %v2558_v56  ;;  %v562_v55 = vsel %vm559_vm1, %v560_v46, %v561_v47  ;;  %v2577_v56 = vld [vmem:[%s2788_s25 + $0x8] sm:$0xff]  ;;  %v3074_v46 = vld [vmem:[%s2788_s25 + $0x30] sm:$0xff] }
  0x36   : > { %813 = vmatpush.bf16.msrb.mxu3 %v2590_v59  ;;  %1063 = vmatpush.bf16.msrb.mxu0 %v2605_v60  ;;  %v2614_v59 = vld [vmem:[%s3253_s1 + $0x170] sm:$0xff] }
  0x37   : > { %v2645_v60 = vld [vmem:[%s3253_s1 + $0x1f0] sm:$0xff] }
  0x38   : > { %636 = vmatpush.bf16.msrb.mxu2 %v2573_v0  ;;  %500 = vmatpush.bf16.msrb.mxu1 %v2557_v1  ;;  %v2613_v0 = vld [vmem:[%s3253_s1 + $0x168] sm:$0xff] }
  0x39   : > { %v2652_v1 = vld [vmem:[%s3253_s1 + $0x228] sm:$0xff] }
  0x3a   : > { %814 = vmatpush.bf16.msrb.mxu3 %v2589_v4  ;;  %1064 = vmatpush.bf16.msrb.mxu0 %v2604_v11  ;;  %v563_v4 = vrot.slane %v2794_v5, 1  ;;  %v951_v11 = vor.u32 %v949_v2, %v947_v51  ;;  %v2582_v2 = vld [vmem:[%s2788_s25 + $0x30] sm:$0xff] }
  0x3b   : > { %420 = vmatmul.bf16.gmra.mxu1 %v311_v19  ;;  %428 = vmatmul.bf16.gmra.mxu2 %v327_v20  ;;  %v2643_v19 = vld [vmem:[%s3253_s1 + $0x1e0] sm:$0xff] }
  0x3c   : > { %637 = vmatpush.bf16.msrb.mxu2 %v2572_v17  ;;  %501 = vmatpush.bf16.msrb.mxu1 %v2556_v18  ;;  %v564_v13 = vsel %vm559_vm1, %v561_v47, %v563_v4  ;;  %v956_v17 = vsel %vm275_vm0, %v951_v11, %v955_v12  ;;  %v2628_v18 = vld [vmem:[%s3253_s1 + $0x1a0] sm:$0xff] }
  0x3d   : > { %436 = vmatmul.bf16.gmra.mxu3 %v343_v21  ;;  %412 = vmatmul.bf16.gmra.mxu0 %v295_v25  ;;  %v2612_v20 = vld [vmem:[%s3253_s1 + $0x160] sm:$0xff] }
  0x3e   : > { %815 = vmatpush.bf16.msrb.mxu3 %v2588_v22  ;;  %1065 = vmatpush.bf16.msrb.mxu0 %v2603_v24  ;;  %v3030_v21 = vld [vmem:[%s2788_s25 + $0x20] sm:$0xff]  ;;  %v957_v22 = vshrl.u32 %v2999_v62, 16  ;;  %v565_v24 = vrot.slane %v2806_v9, 1 }
  0x3f   : > { %v961_v25 = vshll.u32 %v3030_v21, 16  ;;  %v2639_v11 = vld [vmem:[%s3253_s1 + $0x1c0] sm:$0xff] }
  0x40   : > { %638 = vmatpush.bf16.msrb.mxu2 %v2571_v26  ;;  %502 = vmatpush.bf16.msrb.mxu1 %v2555_v27  ;;  %v959_v26 = vor.u32 %v957_v22, %v955_v12  ;;  %v566_v28 = vsel %vm559_vm1, %v563_v4, %v565_v24  ;;  %v2624_v4 = vld [vmem:[%s3253_s1 + $0x180] sm:$0xff] }
  0x41   : > { %v963_v27 = vrot.slane %v961_v25, 1  ;;  %v3115_v12 = vld [vmem:[%s2788_s25 + $0x40] sm:$0xff] }
  0x42   : > { %816 = vmatpush.bf16.msrb.mxu3 %v2587_v23  ;;  %1066 = vmatpush.bf16.msrb.mxu0 %v2602_v29  ;;  %v2579_v23 = vld [vmem:[%s2788_s25 + $0x18] sm:$0xff] }
  0x43   : > { %v964_v29 = vsel %vm275_vm0, %v959_v26, %v963_v27 }
  0x44   : > { %639 = vmatpush.bf16.msrb.mxu2 %v2570_v34  ;;  %503 = vmatpush.bf16.msrb.mxu1 %v2554_v35  ;;  %v3052_v34 = vld [vmem:[%s2788_s25 + $0x28] sm:$0xff]  ;;  %v965_v35 = vshrl.u32 %v3030_v21, 16 }
  0x45   : > { %v969_v36 = vshll.u32 %v3052_v34, 16  ;;  %v973_v47 = vshrl.u32 %v3052_v34, 16 }
  0x46   : > { %817 = vmatpush.bf16.msrb.mxu3 %v2586_v37  ;;  %1067 = vmatpush.bf16.msrb.mxu0 %v2601_v38  ;;  %v567_v37 = vrot.slane %v2797_v6, 1  ;;  %v967_v38 = vor.u32 %v965_v35, %v963_v27 }
  0x47   : > { %v971_v39 = vrot.slane %v969_v36, 1 }
  0x48   : > { %640 = vmatpush.bf16.msrb.mxu2 %v2569_v42  ;;  %504 = vmatpush.bf16.msrb.mxu1 %v2553_v43  ;;  %v568_v40 = vsel %vm559_vm1, %v565_v24, %v567_v37  ;;  %v2626_v43 = vld [vmem:[%s3253_s1 + $0x190] sm:$0xff]  ;;  %v2583_v24 = vld [vmem:[%s2788_s25 + $0x38] sm:$0xff] }
  0x49   : > { %v972_v42 = vsel %vm275_vm0, %v967_v38, %v971_v39  ;;  %v975_v50 = vor.u32 %v973_v47, %v971_v39  ;;  %v2632_v47 = vld [vmem:[%s2788_s25 + $0x18] sm:$0xff] }
  0x4a   : > { %818 = vmatpush.bf16.msrb.mxu3 %v2585_v48  ;;  %1068 = vmatpush.bf16.msrb.mxu0 %v2600_v49  ;;  %v977_v48 = vshll.u32 %v3074_v46, 16  ;;  %v569_v49 = vrot.slane %v2809_v10, 1 }
  0x4b   : > { %505 = vmatmul.bf16.vlgmr.msrb.gmra.mxu1 %v2803_v8  ;;  %641 = vmatmul.bf16.vlgmr.msrb.gmra.mxu2 %v562_v55  ;;  %v2644_v8 = vld [vmem:[%s3253_s1 + $0x1e8] sm:$0xff] }
  0x4c   : > { %1382 = vmatpush.bf16.msra.mxu2 %v2631_v44  ;;  %1204 = vmatpush.bf16.msra.mxu1 %v2615_v45  ;;  %v2641_v44 = vld [vmem:[%s3253_s1 + $0x1d0] sm:$0xff]  ;;  %v979_v51 = vrot.slane %v977_v48, 1 }
  0x4d   : > { %819 = vmatmul.bf16.vlgmr.msrb.gmra.mxu3 %v2577_v56  ;;  %1069 = vmatmul.bf16.vlgmr.msrb.gmra.mxu0 %v948_v57  ;;  %v2610_v45 = vld [vmem:[%s3253_s1 + $0x150] sm:$0xff]  ;;  %v2625_v56 = vld [vmem:[%s3253_s1 + $0x188] sm:$0xff] }
  0x4e   : > { %1632 = vmatpush.bf16.msra.mxu3 %v2646_v52  ;;  %1775 = vmatpush.bf16.msra.mxu0 %v2654_v53  ;;  %v570_v52 = vsel %vm559_vm1, %v567_v37, %v569_v49  ;;  %v2581_v53 = vld [vmem:[%s2788_s25 + $0x28] sm:$0xff]  ;;  %v980_v55 = vsel %vm275_vm0, %v975_v50, %v979_v51  ;;  %v2695_v50 = vld [vmem:[%s2788_s25 + $0x10] sm:$0xf0] }
  0x4f   : > { %v2640_v57 = vld [vmem:[%s3253_s1 + $0x1c8] sm:$0xff] }
  0x50   : > { %1383 = vmatpush.bf16.msra.mxu2 %v2630_v58  ;;  %1205 = vmatpush.bf16.msra.mxu1 %v2614_v59  ;;  %v3093_v58 = vld [vmem:[%s2788_s25 + $0x38] sm:$0xff]  ;;  %v981_v59 = vshrl.u32 %v3074_v46, 16 }
  0x52   : > { %1633 = vmatpush.bf16.msra.mxu3 %v2645_v60  ;;  %1776 = vmatpush.bf16.msra.mxu0 %v2653_v61  ;;  %v985_v60 = vshll.u32 %v3093_v58, 16  ;;  %v2648_v61 = vld [vmem:[%s3253_s1 + $0x208] sm:$0xff] }
  0x54   : > { %1384 = vmatpush.bf16.msra.mxu2 %v2629_v63  ;;  %1206 = vmatpush.bf16.msra.mxu1 %v2613_v0  ;;  %v571_v63 = vrot.slane %v2800_v7, 1  ;;  %v983_v0 = vor.u32 %v981_v59, %v979_v51  ;;  %v2696_v51 = vld [vmem:[%s2788_s25 + $0x10] sm:$0xe] }
  0x55   : > { %v2697_v59 = vor.u32 %v2696_v51, %v2695_v50 }
  0x56   : > { %1634 = vmatpush.bf16.msra.mxu3 %v2644_v8  ;;  %1777 = vmatpush.bf16.msra.mxu0 %v2652_v1  ;;  %v987_v8 = vrot.slane %v985_v60, 1  ;;  %v572_v1 = vsel %vm559_vm1, %v569_v49, %v571_v63 }
  0x58   : > { %1385 = vmatpush.bf16.msra.mxu2 %v2628_v18  ;;  %1207 = vmatpush.bf16.msra.mxu1 %v2612_v20  ;;  %v988_v3 = vsel %vm275_vm0, %v983_v0, %v987_v8  ;;  %v573_v18 = vrot.slane %v2817_v14, 1 }
  0x5a   : > { %1635 = vmatpush.bf16.msra.mxu3 %v2643_v19  ;;  %v574_v25 = vsel %vm559_vm1, %v571_v63, %v573_v18 }
  0x5b   : > { %509 = vmatmul.bf16.gmra.mxu1 %v2821_v16  ;;  %645 = vmatmul.bf16.gmra.mxu2 %v564_v13  ;;  %v2651_v16 = vld [vmem:[%s3253_s1 + $0x220] sm:$0xff]  ;;  %v989_v13 = vshrl.u32 %v3093_v58, 16 }
  0x5c   : > { %1778 = vmatpush.bf16.msra.mxu0 %v2651_v16  ;;  %1386 = vmatpush.bf16.msra.mxu2 %v2627_v30  ;;  %v876_v16 = vld [vmem:[%s2788_s25 + $0x48] sm:$0x1] }
  0x5d   : > { %823 = vmatmul.bf16.gmra.mxu3 %v2578_v15  ;;  %1073 = vmatmul.bf16.gmra.mxu0 %v956_v17  ;;  %v993_v15 = vshll.u32 %v3115_v12, 16  ;;  %v2647_v17 = vld [vmem:[%s3253_s1 + $0x200] sm:$0xff]  ;;  %v991_v19 = vor.u32 %v989_v13, %v987_v8  ;;  %v1702_v8 = vrot.slane %v2697_v59, 1 }
  0x5e   : > { %1636 = vmatpush.bf16.msra.mxu3 %v2642_v31  ;;  %1208 = vmatpush.bf16.msra.mxu1 %v2611_v33 }
  0x5f   : > { %v995_v20 = vrot.slane %v993_v15, 1 }
  0x60   : > { %1387 = vmatpush.bf16.msra.mxu2 %v2626_v43 }
  0x61   : > { %v996_v27 = vsel %vm275_vm0, %v991_v19, %v995_v20 }
  0x62   : > { %1637 = vmatpush.bf16.msra.mxu3 %v2641_v44  ;;  %1209 = vmatpush.bf16.msra.mxu1 %v2610_v45  ;;  %v2694_v45 = vld [vmem:[%s2788_s25 + $0x10] sm:$0xff]  }
  0x63   : > { %v1511_v48 = vshll.u32 %v2694_v45, 16 }
  0x64   : > { %1388 = vmatpush.bf16.msra.mxu2 %v2625_v56 }
  0x66   : > { %1638 = vmatpush.bf16.msra.mxu3 %v2640_v57  ;;  %v1509_v57 = vshrl.u32 %v2694_v45, 16 }
  0x68   : > { %1389 = vmatpush.bf16.msra.mxu2 %v2624_v4  ;;  %v2616_v4 = vld [vmem:[%s2788_s25 + $0x10] sm:$0xff] }
  0x6a   : > { %1639 = vmatpush.bf16.msra.mxu3 %v2639_v11 }
  0x6b   : > { %513 = vmatmul.bf16.gmra.mxu1 %v2794_v5  ;;  %649 = vmatmul.bf16.gmra.mxu2 %v566_v28  ;;  %v2650_v5 = vld [vmem:[%s3253_s1 + $0x218] sm:$0xff]  ;;  %v927_v28 = vunpack.c.l.b16 %v876_v16 }
  0x6c   : > { %1779 = vmatpush.bf16.msra.mxu0 %v2650_v5  ;;  %v997_v5 = vshrl.u32 %v3115_v12, 16 }
  0x6d   : > { %827 = vmatmul.bf16.gmra.mxu3 %v2579_v23  ;;  %1077 = vmatmul.bf16.gmra.mxu0 %v964_v29  ;;  %v3133_v23 = vpack.c.b16 %v927_v28, %v927_v28  ;;  %v1520_v28 = vshrl.u32 %v2632_v47, 16 }
  0x6e   : > { %v999_v36 = vor.u32 %v997_v5, %v995_v20 }
  0x6f   : > { %v1001_v35 = vshll.u32 %v3133_v23, 16 }
  0x71   : > { %v1003_v37 = vrot.slane %v1001_v35, 1 }
  0x73   : > { %v1004_v44 = vsel %vm275_vm0, %v999_v36, %v1003_v37 }
  0x7b   : > { %517 = vmatmul.bf16.gmra.mxu1 %v2806_v9  ;;  %653 = vmatmul.bf16.gmra.mxu2 %v568_v40  ;;  %v2649_v9 = vld [vmem:[%s3253_s1 + $0x210] sm:$0xff] }
  0x7c   : > { %1780 = vmatpush.bf16.msra.mxu0 %v2649_v9  ;;  %v2692_v9 = vld [vmem:[%s2788_s25 + $0x8] sm:$0xe] }
  0x7d   : > { %831 = vmatmul.bf16.gmra.mxu3 %v2580_v41  ;;  %1081 = vmatmul.bf16.gmra.mxu0 %v972_v42  ;;  %v2584_v42 = vld [vmem:[%s2788_s25 + $0x40] sm:$0xff] }
  0x80   : > { %1781 = vmatpush.bf16.msra.mxu0 %v2648_v61  ;;  %v1132_v61 = vrot.slane %v2942_v32, 1  ;;  %v2633_v32 = vld [vmem:[%s2788_s25 + $0x20] sm:$0xff] }
  0x84   : > { %1782 = vmatpush.bf16.msra.mxu0 %v2647_v17 }
  0x8b   : > { %521 = vmatmul.bf16.gmra.mxu1 %v2797_v6  ;;  %657 = vmatmul.bf16.gmra.mxu2 %v570_v52  ;;  %v2609_v6 = vld [vmem:[%s3253_s1 + $0x148] sm:$0xff] }
  0x8c   : > { %1210 = vmatpush.bf16.msra.mxu1 %v2609_v6  ;;  %v1513_v6 = vrot.slane %v1511_v48, 1 }
  0x8d   : > { %835 = vmatmul.bf16.gmra.mxu3 %v2581_v53  ;;  %1085 = vmatmul.bf16.gmra.mxu0 %v980_v55 }
  0x8e   : > { %v1514_v63 = vor.u32 %v1513_v6, %v1509_v57  ;;  %v1136_v57 = vrot.slane %v3030_v21, 1  ;;  %v2635_v21 = vld [vmem:[%s2788_s25 + $0x30] sm:$0xff] }
  0x9b   : > { %525 = vmatmul.bf16.gmra.mxu1 %v2809_v10  ;;  %661 = vmatmul.bf16.gmra.mxu2 %v572_v1  ;;  %v2608_v10 = vld [vmem:[%s3253_s1 + $0x140] sm:$0xff]  ;;  %v1703_v1 = vrot.slane %v2632_v47, 1 }
  0x9c   : > { %1211 = vmatpush.bf16.msra.mxu1 %v2608_v10 }
  0x9d   : > { %839 = vmatmul.bf16.gmra.mxu3 %v2582_v2  ;;  %1089 = vmatmul.bf16.gmra.mxu0 %v988_v3 }
  0xa8   : > { %v3127_v22 = vpop.f32.mrf.mxu1 }
  0xaa   : > { %v409_v26 = vpop.f32.mrf.mxu0 }
  0xab   : > { %529 = vmatmul.bf16.gmra.mxu1 %v2800_v7  ;;  %665 = vmatmul.bf16.gmra.mxu2 %v574_v25  ;;  %v575_v7 = vrot.slane %v2876_v54, 1  ;;  %v2691_v54 = vld [vmem:[%s2788_s25 + $0x8] sm:$0xf0] }
  0xac   : > { %v2693_v55 = vor.u32 %v2692_v9, %v2691_v54 }
  0xad   : > { %843 = vmatmul.bf16.gmra.mxu3 %v2583_v24  ;;  %1093 = vmatmul.bf16.gmra.mxu0 %v996_v27  ;;  %v576_v41 = vsel %vm559_vm1, %v573_v18, %v575_v7  ;;  %v1704_v18 = vsel %vm559_vm1, %v1702_v8, %v1703_v1  ;;  %v1705_v7 = vrot.slane %v2633_v32, 1 }
  0xae   : > { %v3135_v29 = vpop.f32.mrf.mxu2  ;;  %v1131_v60 = vrot.slane %v2693_v55, 1  ;;  %v1528_v55 = vshrl.u32 %v2633_v32, 16 }
  0xaf   : > { %v1706_v54 = vsel %vm559_vm1, %v1703_v1, %v1705_v7 }
  0xb0   : > { %v3137_v30 = vpop.f32.mrf.mxu3  ;;  %v419_v31 = vpop.f32.mrf.mxu1  ;;  %v1133_v10 = vsel %vm559_vm1, %v1131_v60, %v1132_v61 }
  0xb1   : > { %v1524_v31 = vshll.u32 %v2633_v32, 16 }
  0xb2   : > { %v411_v33 = vpop.f32.mrf.mxu0 }
  0xb3   : > { %v1134_v33 = vrot.slane %v2999_v62, 1  ;;  %v1526_v35 = vrot.slane %v1524_v31, 1  ;;  %v2634_v62 = vld [vmem:[%s2788_s25 + $0x28] sm:$0xff] }
  0xb4   : > { %v1707_v59 = vrot.slane %v2634_v62, 1  ;;  %v1536_v32 = vshrl.u32 %v2634_v62, 16  ;;  %v2619_v31 = vld [vmem:[%s2788_s25 + $0x28] sm:$0xff] }
  0xb5   : > { %v1530_v6 = vor.u32 %v1528_v55, %v1526_v35  ;;  %v1137_v8 = vsel %vm559_vm1, %v1134_v33, %v1136_v57  ;;  %v2620_v55 = vld [vmem:[%s2788_s25 + $0x30] sm:$0xff] }
  0xb6   : > { %v427_v38 = vpop.f32.mrf.mxu2 }
  0xb7   : > { %v2617_v38 = vld [vmem:[%s2788_s25 + $0x18] sm:$0xff] }
  0xb8   : > { %v435_v39 = vpop.f32.mrf.mxu3  ;;  %v3142_v40 = vpop.f32.mrf.mxu1 }
  0xba   : > { %v413_v43 = vpop.f32.mrf.mxu0 }
  0xbb   : > { %533 = vmatmul.bf16.gmra.mxu1 %v2817_v14  ;;  %669 = vmatmul.bf16.gmra.mxu2 %v576_v41  ;;  %v1516_v14 = vshll.u32 %v2632_v47, 16  ;;  %v1135_v41 = vsel %vm559_vm1, %v1132_v61, %v1134_v33 }
  0xbd   : > { %847 = vmatmul.bf16.gmra.mxu3 %v2584_v42  ;;  %1097 = vmatmul.bf16.gmra.mxu0 %v1004_v44  ;;  %v1518_v0 = vrot.slane %v1516_v14, 1 }
  0xbe   : > { %v3152_v49 = vpop.f32.mrf.mxu2 }
  0xbf   : > { %v1519_v17 = vsel %vm275_vm0, %v1514_v63, %v1518_v0  ;;  %v1522_v5 = vor.u32 %v1520_v28, %v1518_v0  ;;  %v2618_v63 = vld [vmem:[%s2788_s25 + $0x20] sm:$0xff] }
  0xc0   : > { %v3156_v52 = vpop.f32.mrf.mxu3  ;;  %v423_v53 = vpop.f32.mrf.mxu1 }
  0xc1   : > { %v1527_v45 = vsel %vm275_vm0, %v1522_v5, %v1526_v35 }
  0xc2   : > { %v415_v56 = vpop.f32.mrf.mxu0 }
  0xc3   : > { %v1532_v56 = vshll.u32 %v2634_v62, 16 }
  0xc5   : > { %v1534_v14 = vrot.slane %v1532_v56, 1 }
  0xc6   : > { %v431_v2 = vpop.f32.mrf.mxu2 }
  0xc8   : > { %v439_v3 = vpop.f32.mrf.mxu3  ;;  %v506_v11 = vpop.f32.mrf.mxu1 }
  0xc9   : > { %v507_v13 = vadd.f32 %v506_v11, %v409_v26  ;;  %v1535_v3 = vsel %vm275_vm0, %v1530_v6, %v1534_v14 }
  0xca   : > { %v1070_v15 = vpop.f32.mrf.mxu0 }
  0xcb   : > { %1212 = vmatmul.bf16.vlgmr.msra.gmra.mxu1 %v1133_v10  ;;  %1390 = vmatmul.bf16.vlgmr.msra.gmra.mxu2 %v2616_v4  ;;  %v1708_v4 = vsel %vm559_vm1, %v1705_v7, %v1707_v59 }
  0xcd   : > { %1640 = vmatmul.bf16.vlgmr.msra.gmra.mxu3 %v1519_v17  ;;  %1783 = vmatmul.bf16.vlgmr.msra.gmra.mxu0 %v1704_v18 }
  0xce   : > { %v642_v19 = vpop.f32.mrf.mxu2 }
  0xcf   : > { %v674_v20 = vadd.f32 %v642_v19, %v507_v13  ;;  %v1540_v19 = vshll.u32 %v2635_v21, 16 }
  0xd0   : > { %v820_v16 = vpop.f32.mrf.mxu3  ;;  %v508_v25 = vpop.f32.mrf.mxu1 }
  0xd1   : > { %v852_v24 = vadd.f32 %v820_v16, %v674_v20  ;;  %v1138_v20 = vrot.slane %v3052_v34, 1  ;;  %v1538_v16 = vor.u32 %v1536_v32, %v1534_v14  ;;  %v1542_v25 = vrot.slane %v1540_v19, 1  ;;  %v2636_v34 = vld [vmem:[%s2788_s25 + $0x38] sm:$0xff] }
  0xd2   : > { %v1072_v27 = vpop.f32.mrf.mxu0  ;;  %v1548_v62 = vshll.u32 %v2636_v34, 16 }
  0xd3   : > { %v3164_v26 = vadd.f32 %v1070_v15, %v852_v24  ;;  %v1709_v24 = vrot.slane %v2635_v21, 1  ;;  %v1139_v5 = vsel %vm559_vm1, %v1136_v57, %v1138_v20 }
  0xd6   : > { %v644_v36 = vpop.f32.mrf.mxu2 }
  0xd7   : > { %v1543_v36 = vsel %vm275_vm0, %v1538_v16, %v1542_v25 }
  0xd8   : > { %v822_v37 = vpop.f32.mrf.mxu3  ;;  %v510_v39 = vpop.f32.mrf.mxu1 }
  0xd9   : > { %v511_v42 = vadd.f32 %v510_v39, %v413_v43  ;;  %v1710_v37 = vsel %vm559_vm1, %v1707_v59, %v1709_v24 }
  0xda   : > { %v1074_v44 = vpop.f32.mrf.mxu0 }
  0xdb   : > { %1216 = vmatmul.bf16.gmra.mxu1 %v1135_v41  ;;  %1394 = vmatmul.bf16.gmra.mxu2 %v2617_v38 }
  0xdd   : > { %1644 = vmatmul.bf16.gmra.mxu3 %v1527_v45  ;;  %1787 = vmatmul.bf16.gmra.mxu0 %v1706_v54  ;;  %v1544_v54 = vshrl.u32 %v2635_v21, 16 }
  0xde   : > { %v646_v9 = vpop.f32.mrf.mxu2 }
  0xdf   : > { %v675_v47 = vadd.f32 %v646_v9, %v511_v42  ;;  %v1140_v9 = vrot.slane %v3074_v46, 1 }
  0xe0   : > { %v824_v48 = vpop.f32.mrf.mxu3  ;;  %v512_v50 = vpop.f32.mrf.mxu1 }
  0xe1   : > { %v853_v51 = vadd.f32 %v824_v48, %v675_v47  ;;  %v1546_v47 = vor.u32 %v1544_v54, %v1542_v25  ;;  %v1550_v48 = vrot.slane %v1548_v62, 1  ;;  %v1711_v50 = vrot.slane %v2636_v34, 1 }
  0xe2   : > { %v1076_v53 = vpop.f32.mrf.mxu0  ;;  %v1141_v57 = vsel %vm559_vm1, %v1138_v20, %v1140_v9 }
  0xe3   : > { %v3172_v43 = vadd.f32 %v1074_v44, %v853_v51  ;;  %v1551_v14 = vsel %vm275_vm0, %v1546_v47, %v1550_v48  ;;  %v1712_v59 = vsel %vm559_vm1, %v1709_v24, %v1711_v50  ;;  %v2638_v24 = vld [vmem:[%s2788_s25 + $0x48] sm:$0xff] }
  0xe6   : > { %v648_v60 = vpop.f32.mrf.mxu2 }
  0xe7   : > { %v2637_v60 = vld [vmem:[%s2788_s25 + $0x40] sm:$0xff] }
  0xe8   : > { %v826_v61 = vpop.f32.mrf.mxu3  ;;  %v514_v0 = vpop.f32.mrf.mxu1 }
  0xe9   : > { %v515_v1 = vadd.f32 %v514_v0, %v3127_v22 }
  0xea   : > { %v1078_v2 = vpop.f32.mrf.mxu0 }
  0xeb   : > { %1220 = vmatmul.bf16.gmra.mxu1 %v1137_v8  ;;  %1398 = vmatmul.bf16.gmra.mxu2 %v2618_v63 }
  0xed   : > { %1648 = vmatmul.bf16.gmra.mxu3 %v1535_v3  ;;  %1791 = vmatmul.bf16.gmra.mxu0 %v1708_v4  ;;  %v1552_v3 = vshrl.u32 %v2636_v34, 16  ;;  %v1556_v4 = vshll.u32 %v2637_v60, 16  ;;  %v1144_v34 = vrot.slane %v3115_v12, 1 }
  0xee   : > { %v650_v11 = vpop.f32.mrf.mxu2 }
  0xef   : > { %v676_v10 = vadd.f32 %v650_v11, %v515_v1  ;;  %v1142_v11 = vrot.slane %v3093_v58, 1 }
  0xf0   : > { %v828_v13 = vpop.f32.mrf.mxu3  ;;  %v516_v15 = vpop.f32.mrf.mxu1 }
  0xf1   : > { %v854_v17 = vadd.f32 %v828_v13, %v676_v10  ;;  %v1554_v10 = vor.u32 %v1552_v3, %v1550_v48  ;;  %v1558_v13 = vrot.slane %v1556_v4, 1  ;;  %v1713_v15 = vrot.slane %v2637_v60, 1 }
  0xf2   : > { %v1080_v18 = vpop.f32.mrf.mxu0  ;;  %v1143_v19 = vsel %vm559_vm1, %v1140_v9, %v1142_v11  ;;  %v1145_v62 = vsel %vm559_vm1, %v1142_v11, %v1144_v34 }
  0xf3   : > { %v3181_v22 = vadd.f32 %v1078_v2, %v854_v17  ;;  %v2621_v18 = vld [vmem:[%s2788_s25 + $0x38] sm:$0xff]  ;;  %v1559_v16 = vsel %vm275_vm0, %v1554_v10, %v1558_v13  ;;  %v1714_v25 = vsel %vm559_vm1, %v1711_v50, %v1713_v15 }
  0xf6   : > { %v652_v27 = vpop.f32.mrf.mxu2 }
  0xf8   : > { %v830_v28 = vpop.f32.mrf.mxu3  ;;  %v518_v33 = vpop.f32.mrf.mxu1 }
  0xf9   : > { %v519_v35 = vadd.f32 %v518_v33, %v3142_v40 }
  0xfa   : > { %v1082_v7 = vpop.f32.mrf.mxu0 }
  0xfb   : > { %1224 = vmatmul.bf16.gmra.mxu1 %v1139_v5  ;;  %1402 = vmatmul.bf16.gmra.mxu2 %v2619_v31 }
  0xfd   : > { %1652 = vmatmul.bf16.gmra.mxu3 %v1543_v36  ;;  %1795 = vmatmul.bf16.gmra.mxu0 %v1710_v37  ;;  %v1564_v36 = vshll.u32 %v2638_v24, 16 }
  0xfe   : > { %v654_v38 = vpop.f32.mrf.mxu2 }
  0xff   : > { %v677_v39 = vadd.f32 %v654_v38, %v519_v35 }
 0x100   : > { %v832_v41 = vpop.f32.mrf.mxu3  ;;  %v520_v42 = vpop.f32.mrf.mxu1 }
 0x101   : > { %v855_v44 = vadd.f32 %v832_v41, %v677_v39  ;;  %v1566_v39 = vrot.slane %v1564_v36, 1  ;;  %v1715_v41 = vrot.slane %v2638_v24, 1 }
 0x102   : > { %v1084_v45 = vpop.f32.mrf.mxu0 }
 0x103   : > { %v3190_v40 = vadd.f32 %v1082_v7, %v855_v44  ;;  %v1560_v7 = vshrl.u32 %v2637_v60, 16  ;;  %v2622_v45 = vld [vmem:[%s2788_s25 + $0x40] sm:$0xff]  ;;  %v1716_v48 = vsel %vm559_vm1, %v1713_v15, %v1715_v41 }
 0x105   : > { %v1562_v38 = vor.u32 %v1560_v7, %v1558_v13 }
 0x106   : > { %v656_v51 = vpop.f32.mrf.mxu2 }
 0x107   : > { %v1567_v47 = vsel %vm275_vm0, %v1562_v38, %v1566_v39 }
 0x108   : > { %v834_v53 = vpop.f32.mrf.mxu3  ;;  %v522_v56 = vpop.f32.mrf.mxu1 }
 0x109   : > { %v523_v46 = vadd.f32 %v522_v56, %v3135_v29 }
 0x10a   : > { %v1086_v6 = vpop.f32.mrf.mxu0 }
 0x10b   : > { %1228 = vmatmul.bf16.gmra.mxu1 %v1141_v57  ;;  %1406 = vmatmul.bf16.gmra.mxu2 %v2620_v55 }
 0x10d   : > { %1656 = vmatmul.bf16.gmra.mxu3 %v1551_v14  ;;  %1799 = vmatmul.bf16.gmra.mxu0 %v1712_v59  ;;  %v1568_v59 = vshrl.u32 %v2638_v24, 16 }
 0x10e   : > { %v658_v61 = vpop.f32.mrf.mxu2 }
 0x10f   : > { %v678_v63 = vadd.f32 %v658_v61, %v523_v46  ;;  %v1146_v61 = vrot.slane %v3133_v23, 1 }
 0x110   : > { %v836_v0 = vpop.f32.mrf.mxu3  ;;  %v524_v8 = vpop.f32.mrf.mxu1 }
 0x111   : > { %v856_v1 = vadd.f32 %v836_v0, %v678_v63  ;;  %v1570_v63 = vor.u32 %v1568_v59, %v1566_v39  ;;  %v1147_v4 = vsel %vm559_vm1, %v1144_v34, %v1146_v61 }
 0x112   : > { %v1088_v2 = vpop.f32.mrf.mxu0 }
 0x113   : > { %v3199_v21 = vadd.f32 %v1086_v6, %v856_v1 }
 0x116   : > { %v660_v17 = vpop.f32.mrf.mxu2 }
 0x118   : > { %v838_v29 = vpop.f32.mrf.mxu3  ;;  %v526_v32 = vpop.f32.mrf.mxu1 }
 0x119   : > { %v527_v58 = vadd.f32 %v526_v32, %v3152_v49  ;;  %v1447_v49 = vld [vmem:[%s2788_s25 + $0x50] sm:$0x1] }
 0x11a   : > { %v1090_v20 = vpop.f32.mrf.mxu0  ;;  %v1498_v50 = vunpack.c.l.b16 %v1447_v49 }
 0x11b   : > { %1232 = vmatmul.bf16.gmra.mxu1 %v1143_v19  ;;  %1410 = vmatmul.bf16.gmra.mxu2 %v2621_v18 }
 0x11c   : > { %v1507_v51 = vpack.c.b16 %v1498_v50, %v1498_v50 }
 0x11d   : > { %1660 = vmatmul.bf16.gmra.mxu3 %v1559_v16  ;;  %1803 = vmatmul.bf16.gmra.mxu0 %v1714_v25 }
 0x11e   : > { %v662_v27 = vpop.f32.mrf.mxu2  ;;  %v1572_v46 = vshll.u32 %v1507_v51, 16  ;;  %v1717_v8 = vrot.slane %v1507_v51, 1 }
 0x11f   : > { %v679_v28 = vadd.f32 %v662_v27, %v527_v58 }
 0x120   : > { %v840_v31 = vpop.f32.mrf.mxu3  ;;  %v528_v33 = vpop.f32.mrf.mxu1  ;;  %v1574_v0 = vrot.slane %v1572_v46, 1  ;;  %v1718_v13 = vsel %vm559_vm1, %v1715_v41, %v1717_v8 }
 0x121   : > { %v857_v5 = vadd.f32 %v840_v31, %v679_v28 }
 0x122   : > { %v1092_v35 = vpop.f32.mrf.mxu0  ;;  %v1575_v10 = vsel %vm275_vm0, %v1570_v63, %v1574_v0 }
 0x123   : > { %v3208_v37 = vadd.f32 %v1090_v20, %v857_v5 }
 0x126   : > { %v664_v42 = vpop.f32.mrf.mxu2 }
 0x128   : > { %v842_v44 = vpop.f32.mrf.mxu3  ;;  %v530_v54 = vpop.f32.mrf.mxu1 }
 0x129   : > { %v531_v12 = vadd.f32 %v530_v54, %v3137_v30  ;;  %v2623_v30 = vld [vmem:[%s2788_s25 + $0x48] sm:$0xff]  ;;  %s2545_s25 = sshll.u32 %s3257_s13, 5 }
 0x12a   : > { %v1094_v9 = vpop.f32.mrf.mxu0  ;;  %s3233_s19 = scalar_lea.vmem %s3254_s2, %s2545_s25 }
 0x12b   : > { %1236 = vmatmul.bf16.gmra.mxu1 %v1145_v62  ;;  %1414 = vmatmul.bf16.gmra.mxu2 %v2622_v45 }
 0x12d   : > { %1664 = vmatmul.bf16.gmra.mxu3 %v1567_v47  ;;  %1807 = vmatmul.bf16.gmra.mxu0 %v1716_v48 }
 0x12e   : > { %v666_v53 = vpop.f32.mrf.mxu2 }
 0x12f   : > { %v680_v55 = vadd.f32 %v666_v53, %v531_v12 }
 0x130   : > { %v844_v56 = vpop.f32.mrf.mxu3  ;;  %v532_v57 = vpop.f32.mrf.mxu1 }
 0x131   : > { %v858_v6 = vadd.f32 %v844_v56, %v680_v55 }
 0x132   : > { %v1096_v14 = vpop.f32.mrf.mxu0 }
 0x133   : > { %v3217_v60 = vadd.f32 %v1094_v9, %v858_v6 }
 0x136   : > { %v668_v1 = vpop.f32.mrf.mxu2 }
 0x138   : > { %v846_v2 = vpop.f32.mrf.mxu3  ;;  %v534_v3 = vpop.f32.mrf.mxu1 }
 0x139   : > { %v535_v23 = vadd.f32 %v534_v3, %v3156_v52 }
 0x13a   : > { %v1098_v11 = vpop.f32.mrf.mxu0 }
 0x13b   : > { %1240 = vmatmul.bf16.gmra.mxu1 %v1147_v4  ;;  %1418 = vmatmul.bf16.gmra.mxu2 %v2623_v30 }
 0x13d   : > { %1668 = vmatmul.bf16.gmra.mxu3 %v1575_v10  ;;  %1811 = vmatmul.bf16.gmra.mxu0 %v1718_v13 }
 0x13e   : > { %v670_v15 = vpop.f32.mrf.mxu2 }
 0x13f   : > { %v681_v17 = vadd.f32 %v670_v15, %v535_v23 }
 0x140   : > { %v848_v29 = vpop.f32.mrf.mxu3  ;;  %v536_v18 = vpop.f32.mrf.mxu1 }
 0x141   : > { %v859_v32 = vadd.f32 %v848_v29, %v681_v17 }
 0x142   : > { %v1100_v19 = vpop.f32.mrf.mxu0 }
 0x143   : > { %v3225_v20 = vadd.f32 %v1098_v11, %v859_v32 }
 0x146   : > { %v672_v16 = vpop.f32.mrf.mxu2 }
 0x148   : > { %v850_v25 = vpop.f32.mrf.mxu3  ;;  %v1213_v58 = vpop.f32.mrf.mxu1 }
 0x149   : > { %v1245_v5 = vadd.f32 %v1213_v58, %v3164_v26 }
 0x14a   : > { %v1784_v24 = vpop.f32.mrf.mxu0 }
 0x14e   : > { %v1391_v27 = vpop.f32.mrf.mxu2 }
 0x14f   : > { %v1423_v52 = vadd.f32 %v1391_v27, %v1245_v5 }
 0x150   : > { %v1641_v28 = vpop.f32.mrf.mxu3  ;;  %v1215_v31 = vpop.f32.mrf.mxu1 }
 0x151   : > { %v1673_v34 = vadd.f32 %v1641_v28, %v1423_v52 }
 0x152   : > { %v1786_v33 = vpop.f32.mrf.mxu0 }
 0x153   : > { %v1816_v39 = vadd.f32 %v1784_v24, %v1673_v34 }
 0x155   : > { %v1824_v54 = vpack.c.bf16 %v1816_v39, %v1816_v39 }
 0x156   : > { %v1393_v35 = vpop.f32.mrf.mxu2 }
 0x157   : > { %v1840_v26 = vunpack.c.l.bf16 %v1824_v54 }
 0x158   : > { %v1643_v7 = vpop.f32.mrf.mxu3  ;;  %v1217_v36 = vpop.f32.mrf.mxu1 }
 0x159   : > { %v1246_v41 = vadd.f32 %v1217_v36, %v3172_v43  ;;  %v1862_v55 = vmul.f32 %v1840_v26, %v1840_v26 }
 0x15a   : > { %v1788_v38 = vpop.f32.mrf.mxu0 }
 0x15e   : > { %v1395_v42 = vpop.f32.mrf.mxu2 }
 0x15f   : > { %v1424_v49 = vadd.f32 %v1395_v42, %v1246_v41 }
 0x160   : > { %v1645_v44 = vpop.f32.mrf.mxu3  ;;  %v1219_v45 = vpop.f32.mrf.mxu1 }
 0x161   : > { %v1674_v62 = vadd.f32 %v1645_v44, %v1424_v49 }
 0x162   : > { %v1790_v9 = vpop.f32.mrf.mxu0 }
 0x163   : > { %v1817_v47 = vadd.f32 %v1788_v38, %v1674_v62 }
 0x165   : > { %v1825_v48 = vpack.c.bf16 %v1817_v47, %v1817_v47  ;;  %v2670_v50 = vpack.c.bf16 %v1817_v47, %v1816_v39 }
 0x166   : > { %v1397_v12 = vpop.f32.mrf.mxu2 }
 0x167   : > { %2671 = vst [vmem:[%s3233_s19] sm:$0xff] %v2670_v50   ;;  %v1841_v43 = vunpack.c.l.bf16 %v1825_v48 }
 0x168   : > { %v1647_v51 = vpop.f32.mrf.mxu3  ;;  %v1221_v53 = vpop.f32.mrf.mxu1 }
 0x169   : > { %v1848_v56 = vadd.f32 %v1841_v43, %v1840_v26  ;;  %v1863_v57 = vmul.f32 %v1841_v43, %v1841_v43  ;;  %v1247_v59 = vadd.f32 %v1221_v53, %v3181_v22 }
 0x16a   : > { %v1792_v6 = vpop.f32.mrf.mxu0 }
 0x16b   : > { %v1870_v14 = vadd.f32 %v1863_v57, %v1862_v55 }
 0x16e   : > { %v1399_v46 = vpop.f32.mrf.mxu2 }
 0x16f   : > { %v1425_v61 = vadd.f32 %v1399_v46, %v1247_v59 }
 0x170   : > { %v1649_v63 = vpop.f32.mrf.mxu3  ;;  %v1223_v0 = vpop.f32.mrf.mxu1 }
 0x171   : > { %v1675_v8 = vadd.f32 %v1649_v63, %v1425_v61 }
 0x172   : > { %v1794_v1 = vpop.f32.mrf.mxu0 }
 0x173   : > { %v1818_v2 = vadd.f32 %v1792_v6, %v1675_v8 }
 0x175   : > { %v1826_v30 = vpack.c.bf16 %v1818_v2, %v1818_v2 }
 0x176   : > { %v1401_v3 = vpop.f32.mrf.mxu2 }
 0x177   : > { %v1842_v4 = vunpack.c.l.bf16 %v1826_v30 }
 0x178   : > { %v1651_v11 = vpop.f32.mrf.mxu3  ;;  %v1225_v10 = vpop.f32.mrf.mxu1 }
 0x179   : > { %v1849_v13 = vadd.f32 %v1848_v56, %v1842_v4  ;;  %v1864_v23 = vmul.f32 %v1842_v4, %v1842_v4  ;;  %v1248_v29 = vadd.f32 %v1225_v10, %v3190_v40 }
 0x17a   : > { %v1796_v15 = vpop.f32.mrf.mxu0 }
 0x17b   : > { %v1871_v17 = vadd.f32 %v1870_v14, %v1864_v23 }
 0x17e   : > { %v1403_v22 = vpop.f32.mrf.mxu2 }
 0x17f   : > { %v1426_v18 = vadd.f32 %v1403_v22, %v1248_v29 }
 0x180   : > { %v1653_v32 = vpop.f32.mrf.mxu3  ;;  %v1227_v19 = vpop.f32.mrf.mxu1 }
 0x181   : > { %v1676_v16 = vadd.f32 %v1653_v32, %v1426_v18 }
 0x182   : > { %v1798_v25 = vpop.f32.mrf.mxu0 }
 0x183   : > { %v1819_v58 = vadd.f32 %v1796_v15, %v1676_v16 }
 0x185   : > { %v1827_v24 = vpack.c.bf16 %v1819_v58, %v1819_v58  ;;  %v2675_v27 = vpack.c.bf16 %v1819_v58, %v1818_v2 }
 0x186   : > { %v1405_v28 = vpop.f32.mrf.mxu2 }
 0x187   : > { %2698 = vst [vmem:[%s3233_s19 + $0x8] sm:$0xff] %v2675_v27   ;;  %v1843_v31 = vunpack.c.l.bf16 %v1827_v24 }
 0x188   : > { %v1655_v33 = vpop.f32.mrf.mxu3  ;;  %v1229_v5 = vpop.f32.mrf.mxu1 }
 0x189   : > { %v1850_v52 = vadd.f32 %v1849_v13, %v1843_v31  ;;  %v1865_v35 = vmul.f32 %v1843_v31, %v1843_v31  ;;  %v1249_v40 = vadd.f32 %v1229_v5, %v3199_v21 }
 0x18a   : > { %v1800_v7 = vpop.f32.mrf.mxu0 }
 0x18b   : > { %v1872_v36 = vadd.f32 %v1871_v17, %v1865_v35 }
 0x18e   : > { %v1407_v34 = vpop.f32.mrf.mxu2 }
 0x18f   : > { %v1427_v38 = vadd.f32 %v1407_v34, %v1249_v40 }
 0x190   : > { %v1657_v39 = vpop.f32.mrf.mxu3  ;;  %v1231_v41 = vpop.f32.mrf.mxu1 }
 0x191   : > { %v1677_v42 = vadd.f32 %v1657_v39, %v1427_v38 }
 0x192   : > { %v1802_v49 = vpop.f32.mrf.mxu0 }
 0x193   : > { %v1820_v44 = vadd.f32 %v1800_v7, %v1677_v42 }
 0x195   : > { %v1828_v45 = vpack.c.bf16 %v1820_v44, %v1820_v44 }
 0x196   : > { %v1409_v54 = vpop.f32.mrf.mxu2 }
 0x197   : > { %v1844_v62 = vunpack.c.l.bf16 %v1828_v45 }
 0x198   : > { %v1659_v9 = vpop.f32.mrf.mxu3  ;;  %v1233_v47 = vpop.f32.mrf.mxu1 }
 0x199   : > { %v1851_v26 = vadd.f32 %v1850_v52, %v1844_v62  ;;  %v1866_v48 = vmul.f32 %v1844_v62, %v1844_v62  ;;  %v1250_v43 = vadd.f32 %v1233_v47, %v3208_v37 }
 0x19a   : > { %v1804_v50 = vpop.f32.mrf.mxu0 }
 0x19b   : > { %v1873_v12 = vadd.f32 %v1872_v36, %v1866_v48 }
 0x19e   : > { %v1411_v21 = vpop.f32.mrf.mxu2 }
 0x19f   : > { %v1428_v51 = vadd.f32 %v1411_v21, %v1250_v43 }
 0x1a0   : > { %v1661_v53 = vpop.f32.mrf.mxu3  ;;  %v1235_v55 = vpop.f32.mrf.mxu1 }
 0x1a1   : > { %v1678_v56 = vadd.f32 %v1661_v53, %v1428_v51 }
 0x1a2   : > { %v1806_v57 = vpop.f32.mrf.mxu0 }
 0x1a3   : > { %v1821_v6 = vadd.f32 %v1804_v50, %v1678_v56 }
 0x1a5   : > { %v1829_v14 = vpack.c.bf16 %v1821_v6, %v1821_v6  ;;  %v2680_v59 = vpack.c.bf16 %v1821_v6, %v1820_v44 }
 0x1a6   : > { %v1413_v46 = vpop.f32.mrf.mxu2 }
 0x1a7   : > { %2699 = vst [vmem:[%s3233_s19 + $0x10] sm:$0xff] %v2680_v59   ;;  %v1845_v61 = vunpack.c.l.bf16 %v1829_v14 }
 0x1a8   : > { %v1663_v63 = vpop.f32.mrf.mxu3  ;;  %v1237_v0 = vpop.f32.mrf.mxu1 }
 0x1a9   : > { %v1852_v8 = vadd.f32 %v1851_v26, %v1845_v61  ;;  %v1867_v1 = vmul.f32 %v1845_v61, %v1845_v61  ;;  %v1251_v37 = vadd.f32 %v1237_v0, %v3217_v60 }
 0x1aa   : > { %v1808_v2 = vpop.f32.mrf.mxu0 }
 0x1ab   : > { %v1874_v30 = vadd.f32 %v1873_v12, %v1867_v1 }
 0x1ae   : > { %v1415_v3 = vpop.f32.mrf.mxu2 }
 0x1af   : > { %v1429_v4 = vadd.f32 %v1415_v3, %v1251_v37 }
 0x1b0   : > { %v1665_v11 = vpop.f32.mrf.mxu3  ;;  %v1239_v10 = vpop.f32.mrf.mxu1 }
 0x1b1   : > { %v1679_v13 = vadd.f32 %v1665_v11, %v1429_v4 }
 0x1b2   : > { %v1810_v23 = vpop.f32.mrf.mxu0 }
 0x1b3   : > { %v1822_v15 = vadd.f32 %v1808_v2, %v1679_v13 }
 0x1b5   : > { %v1830_v17 = vpack.c.bf16 %v1822_v15, %v1822_v15 }
 0x1b6   : > { %v1417_v29 = vpop.f32.mrf.mxu2 }
 0x1b7   : > { %v1846_v22 = vunpack.c.l.bf16 %v1830_v17 }
 0x1b8   : > { %v1667_v18 = vpop.f32.mrf.mxu3  ;;  %v1241_v32 = vpop.f32.mrf.mxu1 }
 0x1b9   : > { %v1853_v19 = vadd.f32 %v1852_v8, %v1846_v22  ;;  %v1868_v16 = vmul.f32 %v1846_v22, %v1846_v22  ;;  %v1252_v24 = vadd.f32 %v1241_v32, %v3225_v20 }
 0x1ba   : > { %v1812_v25 = vpop.f32.mrf.mxu0 }
 0x1bb   : > { %v1875_v58 = vadd.f32 %v1874_v30, %v1868_v16 }
 0x1be   : > { %v1419_v60 = vpop.f32.mrf.mxu2 }
 0x1bf   : > { %v1430_v27 = vadd.f32 %v1419_v60, %v1252_v24 }
 0x1c0   : > { %v1669_v28 = vpop.f32.mrf.mxu3  ;;  %v1243_v31 = vpop.f32.mrf.mxu1 }
 0x1c1   : > { %v1680_v33 = vadd.f32 %v1669_v28, %v1430_v27 }
 0x1c2   : > { %v1814_v5 = vpop.f32.mrf.mxu0 }
 0x1c3   : > { %v1823_v52 = vadd.f32 %v1812_v25, %v1680_v33 }
 0x1c5   : > { %v1831_v35 = vpack.c.bf16 %v1823_v52, %v1823_v52  ;;  %v2685_v7 = vpack.c.bf16 %v1823_v52, %v1822_v15 }
 0x1c6   : > { %v1421_v36 = vpop.f32.mrf.mxu2 }
 0x1c7   : > { %2700 = vst [vmem:[%s3233_s19 + $0x18] sm:$0xff] %v2685_v7   ;;  %v1847_v40 = vunpack.c.l.bf16 %v1831_v35 }
 0x1c8   : > { %v1671_v34 = vpop.f32.mrf.mxu3 }
 0x1c9   : > { %v1854_v38 = vadd.f32 %v1853_v19, %v1847_v40  ;;  %v1869_v39 = vmul.f32 %v1847_v40, %v1847_v40 }
 0x1cb   : > { %v1855_v41 = vrot.slane %v1854_v38, 4  ;;  %v1876_v42 = vadd.f32 %v1875_v58, %v1869_v39 }
 0x1cd   : > { %v1856_v49 = vadd.f32 %v1855_v41, %v1854_v38  ;;  %v1877_v20 = vrot.slane %v1876_v42, 4 }
 0x1cf   : > { %v1857_v44 = vrot.slane %v1856_v49, 2  ;;  %v1878_v45 = vadd.f32 %v1877_v20, %v1876_v42 }
 0x1d1   : > { %v1858_v54 = vadd.f32 %v1857_v44, %v1856_v49  ;;  %v1879_v62 = vrot.slane %v1878_v45, 2 }
 0x1d3   : > { %v1859_v9 = vrot.slane %v1858_v54, 1  ;;  %v1880_v47 = vadd.f32 %v1879_v62, %v1878_v45 }
 0x1d5   : > { %v1860_v26 = vadd.f32 %v1859_v9, %v1858_v54  ;;  %v1881_v48 = vrot.slane %v1880_v47, 1 }
 0x1d7   : > { %1861 = vst [vmem:[%s181_s23] sm:$0x1] %v1860_v26  ;;  %v1882_v50 = vadd.f32 %v1881_v48, %v1880_v47 }
 0x1d9   : > { %1883 = vst [vmem:[%s181_s23 + $0x1] sm:$0x1] %v1882_v50 }
 0x1da PF: > { %s14_s12 = sadd.s32 1, %s2740_s12  }
 0x1db   : > { %p11_p4 = scmp.ge.s32.totalorder %s14_s12, 4  }
 0x1dd   :  { %13 = sbr.rel (!%p11_p4) target bundleno = 1 (0x1), region = 78 }

</bundles_post_ra>
